<compile_context>
chip_gen: v5e
topology: v5e:2x2
jax: 0.10.0
libtpu: 0.0.40
codegen_flags: <defaults>
</compile_context>

<pallas_src>
import functools
import math

import jax
import jax.numpy as jnp
from jax import lax
from jax.experimental import pallas as pl
from jax.experimental.pallas import tpu as pltpu


def _encoder_layer_kernel(*refs, nhead, use_pos):
    idx = 0
    src_ref = refs[idx]; idx += 1
    pos_ref = None
    if use_pos:
        pos_ref = refs[idx]; idx += 1
    (wq_ref, wk_ref, wv_ref, wo_ref,
     g1_ref, b1_ref, g2_ref, b2_ref,
     w1_ref, bb1_ref, w2_ref, bb2_ref,
     out_ref) = refs[idx:]

    Bb, L, D = src_ref.shape
    hd = D // nhead
    R = Bb * L                           # rows for all position-wise matmuls
    eps = 1e-5
    cdt = wq_ref.dtype                   # matmul-input dtype (bf16)

    # Fold (batch, seq) into one M dimension (leading-dim merge, layout-free).
    x = src_ref[...].reshape(R, D)       # (R, D) float32

    # ---- norm1 (f32 statistics) --------------------------------------------
    mu = jnp.mean(x, axis=-1, keepdims=True)
    xc = x - mu
    var = jnp.mean(xc * xc, axis=-1, keepdims=True)
    x2 = xc * lax.rsqrt(var + eps) * g1_ref[...] + b1_ref[...]

    # ---- self attention (q = k = x2 + pos, v = x2) ---------------------------
    v_in = x2.astype(cdt)
    if use_pos:
        qk_in = (x2 + pos_ref[...].reshape(R, D)).astype(cdt)
    else:
        qk_in = v_in

    # Q/K/V projections: M = Bb*L rows, K = D contraction (MXU friendly).
    # The 1/sqrt(hd) scale is pre-folded into wq in the wrapper.
    q = jnp.dot(qk_in, wq_ref[...], preferred_element_type=jnp.float32)
    k = jnp.dot(qk_in, wk_ref[...], preferred_element_type=jnp.float32)
    v = jnp.dot(v_in,  wv_ref[...], preferred_element_type=jnp.float32)

    # Per-sequence views (free leading-dim split, rows are batch-major).
    q3 = q.astype(cdt).reshape(Bb, L, D)
    k3 = k.astype(cdt).reshape(Bb, L, D)
    v3 = v.astype(cdt).reshape(Bb, L, D)

    # Scores / P@V, batched over the Bb sequences with canonical einsums.
    # The short head loop only slices lanes; every matmul inside is batched.
    head_outs = []
    for h in range(nhead):
        sl = slice(h * hd, (h + 1) * hd)
        s = jnp.einsum('bqd,bkd->bqk', q3[:, :, sl], k3[:, :, sl],
                       preferred_element_type=jnp.float32)        # (Bb, L, L)
        s = s - jnp.max(s, axis=-1, keepdims=True)
        p = jnp.exp(s)
        p = p * pl.reciprocal(jnp.sum(p, axis=-1, keepdims=True), approx=True)
        oh = jnp.einsum('bqk,bkd->bqd', p.astype(cdt), v3[:, :, sl],
                        preferred_element_type=jnp.float32)       # (Bb, L, hd)
        head_outs.append(oh.astype(cdt))

    # Concatenate heads -> ONE output projection with a full K = D contraction.
    o = jnp.concatenate(head_outs, axis=-1).reshape(R, D)
    attn = jnp.dot(o, wo_ref[...], preferred_element_type=jnp.float32)

    # residual 1 (dropout1 == identity in eval)
    y = x + attn

    # ---- norm2 ----------------------------------------------------------------
    mu2 = jnp.mean(y, axis=-1, keepdims=True)
    yc = y - mu2
    var2 = jnp.mean(yc * yc, axis=-1, keepdims=True)
    y2 = yc * lax.rsqrt(var2 + eps) * g2_ref[...] + b2_ref[...]

    # ---- feed-forward: linear2(relu(linear1(y2))) ------------------------------
    ff = jnp.dot(y2.astype(cdt), w1_ref[...],
                 preferred_element_type=jnp.float32) + bb1_ref[...]
    ff = jnp.maximum(ff, 0.0)
    ff = jnp.dot(ff.astype(cdt), w2_ref[...],
                 preferred_element_type=jnp.float32) + bb2_ref[...]

    # residual 2 (dropout2 == identity in eval)
    out_ref[...] = (y + ff).reshape(Bb, L, D).astype(out_ref.dtype)


def _choose_block_b(B, L, target_rows=256):
    """Pick how many sequences go into one grid step.

    Prefers >= 2 grid steps (keeps both v7x TensorCores busy) and Bb*L rows
    close to `target_rows` so the MXU M dimension is well filled.
    """
    divisors = [d for d in range(1, B + 1) if B % d == 0]
    best, best_key = B, None
    for bb in divisors:
        steps = B // bb
        key = (0 if steps >= min(2, B) else 1, abs(L * bb - target_rows))
        if best_key is None or key < best_key:
            best, best_key = bb, key
    return best


def transformer_encoder_layer(src, params, *, nhead, pos=None,
                              compute_dtype=jnp.bfloat16,
                              vmem_limit_bytes=None):
    """src: (L, B, D) float32 — PyTorch nn.MultiheadAttention layout."""
    L, B, D = src.shape
    dff = params["w1"].shape[0]
    hd = D // nhead
    use_pos = pos is not None
    cdt = compute_dtype
    Bb = _choose_block_b(B, L)

    # Batch-major working layout (see TODO at top about removing these).
    src_bld = jnp.transpose(src, (1, 0, 2))                       # (B, L, D)

    # One-time weight prep (amortized by XLA): split, transpose, scale, cast.
    wq, wk, wv = jnp.split(params["in_proj_weight"], 3, axis=0)   # each (D, D)
    wq_t = (wq.T * (1.0 / math.sqrt(hd))).astype(cdt)             # scale folded
    wk_t = wk.T.astype(cdt)
    wv_t = wv.T.astype(cdt)
    wo_t = params["out_proj_weight"].T.astype(cdt)                # (D, D)
    w1_t = params["w1"].T.astype(cdt)                             # (D, dff)
    w2_t = params["w2"].T.astype(cdt)                             # (dff, D)

    # 1-D layernorm / bias params kept in f32, reshaped to (1, N).
    g1 = params["g1"].reshape(1, D).astype(jnp.float32)
    b1 = params["b1"].reshape(1, D).astype(jnp.float32)
    g2 = params["g2"].reshape(1, D).astype(jnp.float32)
    b2 = params["b2"].reshape(1, D).astype(jnp.float32)
    bb1 = params["bb1"].reshape(1, dff).astype(jnp.float32)
    bb2 = params["bb2"].reshape(1, D).astype(jnp.float32)

    # Block covers Bb full sequences; last two dims equal the array dims.
    seq_spec = pl.BlockSpec((Bb, L, D), lambda i: (i, 0, 0))
    full = lambda shape: pl.BlockSpec(shape, lambda i: (0,) * len(shape))

    inputs = [src_bld]
    in_specs = [seq_spec]
    if use_pos:
        inputs.append(jnp.transpose(pos, (1, 0, 2)))
        in_specs.append(seq_spec)
    inputs += [wq_t, wk_t, wv_t, wo_t, g1, b1, g2, b2, w1_t, bb1, w2_t, bb2]
    in_specs += ([full((D, D))] * 4
                 + [full((1, D))] * 4
                 + [full((D, dff)), full((1, dff)), full((dff, D)), full((1, D))])

    # Advisory cost estimate (helps XLA schedule the surrounding transposes).
    wbytes = jnp.dtype(cdt).itemsize
    flops = B * (8 * L * D * D + 4 * L * L * D + 4 * L * D * dff)
    transcendentals = B * nhead * L * L
    bytes_accessed = (2 * B * L * D * 4
                      + (B * L * D * 4 if use_pos else 0)
                      + (4 * D * D + 2 * D * dff) * wbytes
                      + (3 * D + dff) * 4)

    cp_kwargs = dict(dimension_semantics=("parallel",))
    if vmem_limit_bytes is not None:
        # Production-size weights (D~1024, dff~4096) get double-buffered by
        # Pallas; raise the scoped-VMEM limit (or single-buffer the weights)
        # on v7x where only 64 MiB is physical.
        cp_kwargs["vmem_limit_bytes"] = vmem_limit_bytes

    kernel = functools.partial(_encoder_layer_kernel, nhead=nhead, use_pos=use_pos)

    out = pl.pallas_call(
        kernel,
        out_shape=jax.ShapeDtypeStruct((B, L, D), src.dtype),
        grid_spec=pltpu.PrefetchScalarGridSpec(
            num_scalar_prefetch=0,
            grid=(B // Bb,),
            in_specs=in_specs,
            out_specs=seq_spec,
        ),
        compiler_params=pltpu.CompilerParams(**cp_kwargs),
        cost_estimate=pl.CostEstimate(flops=flops,
                                      transcendentals=transcendentals,
                                      bytes_accessed=bytes_accessed),
    )(*inputs)

    return jnp.transpose(out, (1, 0, 2))                          # back to (L, B, D)


# ----------------------------- reference (pure JAX, f32) ---------------------
def _reference(src, params, *, nhead, pos=None):
    D = src.shape[-1]
    hd = D // nhead
    eps = 1e-5

    def ln(x, g, b):
        mu = jnp.mean(x, axis=-1, keepdims=True)
        var = jnp.mean((x - mu) ** 2, axis=-1, keepdims=True)
        return (x - mu) / jnp.sqrt(var + eps) * g + b

    x2 = ln(src, params["g1"], params["b1"])
    qk = x2 if pos is None else x2 + pos
    wq, wk, wv = jnp.split(params["in_proj_weight"], 3, axis=0)
    q = qk @ wq.T
    k = qk @ wk.T
    v = x2 @ wv.T
    L, B, _ = src.shape
    q = q.reshape(L, B * nhead, hd).transpose(1, 0, 2) / math.sqrt(hd)
    k = k.reshape(L, B * nhead, hd).transpose(1, 0, 2)
    v = v.reshape(L, B * nhead, hd).transpose(1, 0, 2)
    s = jnp.einsum("blh,bmh->blm", q, k)
    p = jax.nn.softmax(s, axis=-1)
    o = jnp.einsum("blm,bmh->blh", p, v)
    o = o.transpose(1, 0, 2).reshape(L, B, D) @ params["out_proj_weight"].T
    y = src + o
    y2 = ln(y, params["g2"], params["b2"])
    ff = jnp.maximum(y2 @ params["w1"].T + params["bb1"], 0.0)
    ff = ff @ params["w2"].T + params["bb2"]
    return y + ff


# ----------------------------- params / main ---------------------------------
def make_params(key, d_model, nhead, dim_feedforward):
    ks = jax.random.split(key, 8)

    def unif(k, shape, fan_in):
        bound = 1.0 / math.sqrt(fan_in)
        return jax.random.uniform(k, shape, jnp.float32, -bound, bound)

    return {
        "in_proj_weight":  unif(ks[0], (3 * d_model, d_model), d_model),
        "out_proj_weight": unif(ks[1], (d_model, d_model), d_model),
        "w1":  unif(ks[2], (dim_feedforward, d_model), d_model),
        "bb1": unif(ks[3], (dim_feedforward,), d_model),
        "w2":  unif(ks[4], (d_model, dim_feedforward), dim_feedforward),
        "bb2": unif(ks[5], (d_model,), dim_feedforward),
        "g1": jnp.ones((d_model,), jnp.float32),
        "b1": jnp.zeros((d_model,), jnp.float32),
        "g2": jnp.ones((d_model,), jnp.float32),
        "b2": jnp.zeros((d_model,), jnp.float32),
    }


if __name__ == "__main__":
    # Small but lane-dense shapes (D, dff multiples of 128); B large enough
    # that the kernel runs 2 parallel grid steps of Bb=4 sequences each.
    L, B, D, NHEAD, DFF = 16, 8, 128, 4, 256
    key = jax.random.PRNGKey(0)
    k_src, k_pos, k_par = jax.random.split(key, 3)
    src = jax.random.normal(k_src, (L, B, D), jnp.float32)
    pos = jax.random.normal(k_pos, (L, B, D), jnp.float32)
    params = make_params(k_par, D, NHEAD, DFF)

    # pos=None path (default call in the original module)
    out = transformer_encoder_layer(src, params, nhead=NHEAD, pos=None)
    out = jax.block_until_ready(out)
    ref = _reference(src, params, nhead=NHEAD, pos=None)
    assert out.shape == (L, B, D)
    err = float(jnp.max(jnp.abs(out - ref)))
    assert err < 5e-2, f"mismatch vs reference (pos=None): max err {err}"

    # pos-embedding path
    out_p = transformer_encoder_layer(src, params, nhead=NHEAD, pos=pos)
    out_p = jax.block_until_ready(out_p)
    ref_p = _reference(src, params, nhead=NHEAD, pos=pos)
    err_p = float(jnp.max(jnp.abs(out_p - ref_p)))
    assert err_p < 5e-2, f"mismatch vs reference (with pos): max err {err_p}"

    print("KERNEL_OK")
</pallas_src>

<mosaic_0001>
module attributes {stable_mosaic.version = 11 : i64} {
  func.func @_encoder_layer_kernel(%arg0: i32, %arg1: memref<4x16x128xf32, #tpu.memory_space<vmem>>, %arg2: memref<128x128xbf16, #tpu.memory_space<vmem>>, %arg3: memref<128x128xbf16, #tpu.memory_space<vmem>>, %arg4: memref<128x128xbf16, #tpu.memory_space<vmem>>, %arg5: memref<128x128xbf16, #tpu.memory_space<vmem>>, %arg6: memref<1x128xf32, #tpu.memory_space<vmem>>, %arg7: memref<1x128xf32, #tpu.memory_space<vmem>>, %arg8: memref<1x128xf32, #tpu.memory_space<vmem>>, %arg9: memref<1x128xf32, #tpu.memory_space<vmem>>, %arg10: memref<128x256xbf16, #tpu.memory_space<vmem>>, %arg11: memref<1x256xf32, #tpu.memory_space<vmem>>, %arg12: memref<256x128xbf16, #tpu.memory_space<vmem>>, %arg13: memref<1x128xf32, #tpu.memory_space<vmem>>, %arg14: memref<4x16x128xf32, #tpu.memory_space<vmem>>) attributes {dimension_semantics = [#tpu.dimension_semantics<parallel>], iteration_bounds = array<i64: 2>, scalar_prefetch = 0 : i64, scratch_operands = 0 : i64, tpu.core_type = #tpu.core_type<tc>, window_params = [{transform_indices = @transform_0, window_bounds = array<i64: 4, 16, 128>}, {pipeline_mode = #tpu.pipeline_mode<synchronous>, transform_indices = @transform_1, window_bounds = array<i64: 128, 128>}, {pipeline_mode = #tpu.pipeline_mode<synchronous>, transform_indices = @transform_2, window_bounds = array<i64: 128, 128>}, {pipeline_mode = #tpu.pipeline_mode<synchronous>, transform_indices = @transform_3, window_bounds = array<i64: 128, 128>}, {pipeline_mode = #tpu.pipeline_mode<synchronous>, transform_indices = @transform_4, window_bounds = array<i64: 128, 128>}, {pipeline_mode = #tpu.pipeline_mode<synchronous>, transform_indices = @transform_5, window_bounds = array<i64: 1, 128>}, {pipeline_mode = #tpu.pipeline_mode<synchronous>, transform_indices = @transform_6, window_bounds = array<i64: 1, 128>}, {pipeline_mode = #tpu.pipeline_mode<synchronous>, transform_indices = @transform_7, window_bounds = array<i64: 1, 128>}, {pipeline_mode = #tpu.pipeline_mode<synchronous>, transform_indices = @transform_8, window_bounds = array<i64: 1, 128>}, {pipeline_mode = #tpu.pipeline_mode<synchronous>, transform_indices = @transform_9, window_bounds = array<i64: 128, 256>}, {pipeline_mode = #tpu.pipeline_mode<synchronous>, transform_indices = @transform_10, window_bounds = array<i64: 1, 256>}, {pipeline_mode = #tpu.pipeline_mode<synchronous>, transform_indices = @transform_11, window_bounds = array<i64: 256, 128>}, {pipeline_mode = #tpu.pipeline_mode<synchronous>, transform_indices = @transform_12, window_bounds = array<i64: 1, 128>}, {transform_indices = @transform_13, window_bounds = array<i64: 4, 16, 128>}]} {
    %c0 = arith.constant 0 : index
    %c0_0 = arith.constant 0 : index
    %c0_1 = arith.constant 0 : index
    %0 = vector.load %arg1[%c0, %c0_0, %c0_1] : memref<4x16x128xf32, #tpu.memory_space<vmem>>, vector<4x16x128xf32>
    %1 = vector.shape_cast %0 : vector<4x16x128xf32> to vector<64x128xf32>
    %cst = arith.constant dense<0.000000e+00> : vector<64xf32>
    %2 = vector.multi_reduction <add>, %1, %cst [1] : vector<64x128xf32> to vector<64xf32>
    %3 = vector.shape_cast %2 : vector<64xf32> to vector<64x1xf32>
    %cst_2 = arith.constant 1.280000e+02 : f32
    %4 = vector.broadcast %cst_2 : f32 to vector<64x1xf32>
    %5 = arith.divf %3, %4 : vector<64x1xf32>
    %6 = vector.broadcast %5 : vector<64x1xf32> to vector<64x128xf32>
    %7 = arith.subf %1, %6 : vector<64x128xf32>
    %8 = arith.mulf %7, %7 : vector<64x128xf32>
    %cst_3 = arith.constant dense<0.000000e+00> : vector<64xf32>
    %9 = vector.multi_reduction <add>, %8, %cst_3 [1] : vector<64x128xf32> to vector<64xf32>
    %10 = vector.shape_cast %9 : vector<64xf32> to vector<64x1xf32>
    %cst_4 = arith.constant 1.280000e+02 : f32
    %11 = vector.broadcast %cst_4 : f32 to vector<64x1xf32>
    %12 = arith.divf %10, %11 : vector<64x1xf32>
    %cst_5 = arith.constant 9.99999974E-6 : f32
    %13 = vector.broadcast %cst_5 : f32 to vector<64x1xf32>
    %14 = arith.addf %12, %13 : vector<64x1xf32>
    %15 = math.rsqrt %14 : vector<64x1xf32>
    %16 = vector.broadcast %15 : vector<64x1xf32> to vector<64x128xf32>
    %17 = arith.mulf %7, %16 : vector<64x128xf32>
    %c0_6 = arith.constant 0 : index
    %c0_7 = arith.constant 0 : index
    %18 = vector.load %arg6[%c0_6, %c0_7] : memref<1x128xf32, #tpu.memory_space<vmem>>, vector<1x128xf32>
    %19 = vector.broadcast %18 : vector<1x128xf32> to vector<64x128xf32>
    %20 = arith.mulf %17, %19 : vector<64x128xf32>
    %c0_8 = arith.constant 0 : index
    %c0_9 = arith.constant 0 : index
    %21 = vector.load %arg7[%c0_8, %c0_9] : memref<1x128xf32, #tpu.memory_space<vmem>>, vector<1x128xf32>
    %22 = vector.broadcast %21 : vector<1x128xf32> to vector<64x128xf32>
    %23 = arith.addf %20, %22 : vector<64x128xf32>
    %24 = arith.truncf %23 : vector<64x128xf32> to vector<64x128xbf16>
    %c0_10 = arith.constant 0 : index
    %c0_11 = arith.constant 0 : index
    %25 = vector.load %arg2[%c0_10, %c0_11] : memref<128x128xbf16, #tpu.memory_space<vmem>>, vector<128x128xbf16>
    %cst_12 = arith.constant dense<0.000000e+00> : vector<64x128xf32>
    %26 = tpu.matmul %24, %25, %cst_12 {dimension_numbers = #tpu.dot_dimension_numbers<[1], [0], [0], [1], [0, 0, 1, 1], [], []>} : vector<64x128xbf16>, vector<128x128xbf16>, vector<64x128xf32> -> vector<64x128xf32>
    %c0_13 = arith.constant 0 : index
    %c0_14 = arith.constant 0 : index
    %27 = vector.load %arg3[%c0_13, %c0_14] : memref<128x128xbf16, #tpu.memory_space<vmem>>, vector<128x128xbf16>
    %cst_15 = arith.constant dense<0.000000e+00> : vector<64x128xf32>
    %28 = tpu.matmul %24, %27, %cst_15 {dimension_numbers = #tpu.dot_dimension_numbers<[1], [0], [0], [1], [0, 0, 1, 1], [], []>} : vector<64x128xbf16>, vector<128x128xbf16>, vector<64x128xf32> -> vector<64x128xf32>
    %c0_16 = arith.constant 0 : index
    %c0_17 = arith.constant 0 : index
    %29 = vector.load %arg4[%c0_16, %c0_17] : memref<128x128xbf16, #tpu.memory_space<vmem>>, vector<128x128xbf16>
    %cst_18 = arith.constant dense<0.000000e+00> : vector<64x128xf32>
    %30 = tpu.matmul %24, %29, %cst_18 {dimension_numbers = #tpu.dot_dimension_numbers<[1], [0], [0], [1], [0, 0, 1, 1], [], []>} : vector<64x128xbf16>, vector<128x128xbf16>, vector<64x128xf32> -> vector<64x128xf32>
    %31 = arith.truncf %26 : vector<64x128xf32> to vector<64x128xbf16>
    %32 = vector.shape_cast %31 : vector<64x128xbf16> to vector<4x16x128xbf16>
    %33 = arith.truncf %28 : vector<64x128xf32> to vector<64x128xbf16>
    %34 = vector.shape_cast %33 : vector<64x128xbf16> to vector<4x16x128xbf16>
    %35 = arith.truncf %30 : vector<64x128xf32> to vector<64x128xbf16>
    %36 = vector.shape_cast %35 : vector<64x128xbf16> to vector<4x16x128xbf16>
    %37 = vector.extract_strided_slice %32 {offsets = [0, 0, 0], sizes = [4, 16, 32], strides = [1, 1, 1]} : vector<4x16x128xbf16> to vector<4x16x32xbf16>
    %38 = vector.extract_strided_slice %34 {offsets = [0, 0, 0], sizes = [4, 16, 32], strides = [1, 1, 1]} : vector<4x16x128xbf16> to vector<4x16x32xbf16>
    "tpu.trace_start"() <{level = 10 : i32, message = "bqd,bkd->bqk"}> : () -> ()
    %cst_19 = arith.constant dense<0.000000e+00> : vector<4x16x16xf32>
    %39 = tpu.matmul %37, %38, %cst_19 {dimension_numbers = #tpu.dot_dimension_numbers<[2], [2], [1], [1], [0, 0, 0, 1, 1, 1], [0], [0]>} : vector<4x16x32xbf16>, vector<4x16x32xbf16>, vector<4x16x16xf32> -> vector<4x16x16xf32>
    "tpu.trace_stop"() : () -> ()
    %cst_20 = arith.constant dense<0xFF800000> : vector<4x16xf32>
    %40 = vector.multi_reduction <maximumf>, %39, %cst_20 [2] : vector<4x16x16xf32> to vector<4x16xf32>
    %41 = vector.shape_cast %40 : vector<4x16xf32> to vector<4x16x1xf32>
    %42 = vector.broadcast %41 : vector<4x16x1xf32> to vector<4x16x16xf32>
    %43 = arith.subf %39, %42 : vector<4x16x16xf32>
    %44 = math.exp %43 : vector<4x16x16xf32>
    %cst_21 = arith.constant dense<0.000000e+00> : vector<4x16xf32>
    %45 = vector.multi_reduction <add>, %44, %cst_21 [2] : vector<4x16x16xf32> to vector<4x16xf32>
    %46 = vector.shape_cast %45 : vector<4x16xf32> to vector<4x16x1xf32>
    %47 = tpu.reciprocal %46 {approx = true} : vector<4x16x1xf32> -> vector<4x16x1xf32>
    %48 = vector.broadcast %47 : vector<4x16x1xf32> to vector<4x16x16xf32>
    %49 = arith.mulf %44, %48 : vector<4x16x16xf32>
    %50 = arith.truncf %49 : vector<4x16x16xf32> to vector<4x16x16xbf16>
    %51 = vector.extract_strided_slice %36 {offsets = [0, 0, 0], sizes = [4, 16, 32], strides = [1, 1, 1]} : vector<4x16x128xbf16> to vector<4x16x32xbf16>
    "tpu.trace_start"() <{level = 10 : i32, message = "bqk,bkd->bqd"}> : () -> ()
    %cst_22 = arith.constant dense<0.000000e+00> : vector<4x16x32xf32>
    %52 = tpu.matmul %50, %51, %cst_22 {dimension_numbers = #tpu.dot_dimension_numbers<[2], [1], [1], [2], [0, 0, 0, 1, 1, 2], [0], [0]>} : vector<4x16x16xbf16>, vector<4x16x32xbf16>, vector<4x16x32xf32> -> vector<4x16x32xf32>
    "tpu.trace_stop"() : () -> ()
    %53 = arith.truncf %52 : vector<4x16x32xf32> to vector<4x16x32xbf16>
    %54 = vector.extract_strided_slice %32 {offsets = [0, 0, 32], sizes = [4, 16, 32], strides = [1, 1, 1]} : vector<4x16x128xbf16> to vector<4x16x32xbf16>
    %55 = vector.extract_strided_slice %34 {offsets = [0, 0, 32], sizes = [4, 16, 32], strides = [1, 1, 1]} : vector<4x16x128xbf16> to vector<4x16x32xbf16>
    "tpu.trace_start"() <{level = 10 : i32, message = "bqd,bkd->bqk"}> : () -> ()
    %cst_23 = arith.constant dense<0.000000e+00> : vector<4x16x16xf32>
    %56 = tpu.matmul %54, %55, %cst_23 {dimension_numbers = #tpu.dot_dimension_numbers<[2], [2], [1], [1], [0, 0, 0, 1, 1, 1], [0], [0]>} : vector<4x16x32xbf16>, vector<4x16x32xbf16>, vector<4x16x16xf32> -> vector<4x16x16xf32>
    "tpu.trace_stop"() : () -> ()
    %cst_24 = arith.constant dense<0xFF800000> : vector<4x16xf32>
    %57 = vector.multi_reduction <maximumf>, %56, %cst_24 [2] : vector<4x16x16xf32> to vector<4x16xf32>
    %58 = vector.shape_cast %57 : vector<4x16xf32> to vector<4x16x1xf32>
    %59 = vector.broadcast %58 : vector<4x16x1xf32> to vector<4x16x16xf32>
    %60 = arith.subf %56, %59 : vector<4x16x16xf32>
    %61 = math.exp %60 : vector<4x16x16xf32>
    %cst_25 = arith.constant dense<0.000000e+00> : vector<4x16xf32>
    %62 = vector.multi_reduction <add>, %61, %cst_25 [2] : vector<4x16x16xf32> to vector<4x16xf32>
    %63 = vector.shape_cast %62 : vector<4x16xf32> to vector<4x16x1xf32>
    %64 = tpu.reciprocal %63 {approx = true} : vector<4x16x1xf32> -> vector<4x16x1xf32>
    %65 = vector.broadcast %64 : vector<4x16x1xf32> to vector<4x16x16xf32>
    %66 = arith.mulf %61, %65 : vector<4x16x16xf32>
    %67 = arith.truncf %66 : vector<4x16x16xf32> to vector<4x16x16xbf16>
    %68 = vector.extract_strided_slice %36 {offsets = [0, 0, 32], sizes = [4, 16, 32], strides = [1, 1, 1]} : vector<4x16x128xbf16> to vector<4x16x32xbf16>
    "tpu.trace_start"() <{level = 10 : i32, message = "bqk,bkd->bqd"}> : () -> ()
    %cst_26 = arith.constant dense<0.000000e+00> : vector<4x16x32xf32>
    %69 = tpu.matmul %67, %68, %cst_26 {dimension_numbers = #tpu.dot_dimension_numbers<[2], [1], [1], [2], [0, 0, 0, 1, 1, 2], [0], [0]>} : vector<4x16x16xbf16>, vector<4x16x32xbf16>, vector<4x16x32xf32> -> vector<4x16x32xf32>
    "tpu.trace_stop"() : () -> ()
    %70 = arith.truncf %69 : vector<4x16x32xf32> to vector<4x16x32xbf16>
    %71 = vector.extract_strided_slice %32 {offsets = [0, 0, 64], sizes = [4, 16, 32], strides = [1, 1, 1]} : vector<4x16x128xbf16> to vector<4x16x32xbf16>
    %72 = vector.extract_strided_slice %34 {offsets = [0, 0, 64], sizes = [4, 16, 32], strides = [1, 1, 1]} : vector<4x16x128xbf16> to vector<4x16x32xbf16>
    "tpu.trace_start"() <{level = 10 : i32, message = "bqd,bkd->bqk"}> : () -> ()
    %cst_27 = arith.constant dense<0.000000e+00> : vector<4x16x16xf32>
    %73 = tpu.matmul %71, %72, %cst_27 {dimension_numbers = #tpu.dot_dimension_numbers<[2], [2], [1], [1], [0, 0, 0, 1, 1, 1], [0], [0]>} : vector<4x16x32xbf16>, vector<4x16x32xbf16>, vector<4x16x16xf32> -> vector<4x16x16xf32>
    "tpu.trace_stop"() : () -> ()
    %cst_28 = arith.constant dense<0xFF800000> : vector<4x16xf32>
    %74 = vector.multi_reduction <maximumf>, %73, %cst_28 [2] : vector<4x16x16xf32> to vector<4x16xf32>
    %75 = vector.shape_cast %74 : vector<4x16xf32> to vector<4x16x1xf32>
    %76 = vector.broadcast %75 : vector<4x16x1xf32> to vector<4x16x16xf32>
    %77 = arith.subf %73, %76 : vector<4x16x16xf32>
    %78 = math.exp %77 : vector<4x16x16xf32>
    %cst_29 = arith.constant dense<0.000000e+00> : vector<4x16xf32>
    %79 = vector.multi_reduction <add>, %78, %cst_29 [2] : vector<4x16x16xf32> to vector<4x16xf32>
    %80 = vector.shape_cast %79 : vector<4x16xf32> to vector<4x16x1xf32>
    %81 = tpu.reciprocal %80 {approx = true} : vector<4x16x1xf32> -> vector<4x16x1xf32>
    %82 = vector.broadcast %81 : vector<4x16x1xf32> to vector<4x16x16xf32>
    %83 = arith.mulf %78, %82 : vector<4x16x16xf32>
    %84 = arith.truncf %83 : vector<4x16x16xf32> to vector<4x16x16xbf16>
    %85 = vector.extract_strided_slice %36 {offsets = [0, 0, 64], sizes = [4, 16, 32], strides = [1, 1, 1]} : vector<4x16x128xbf16> to vector<4x16x32xbf16>
    "tpu.trace_start"() <{level = 10 : i32, message = "bqk,bkd->bqd"}> : () -> ()
    %cst_30 = arith.constant dense<0.000000e+00> : vector<4x16x32xf32>
    %86 = tpu.matmul %84, %85, %cst_30 {dimension_numbers = #tpu.dot_dimension_numbers<[2], [1], [1], [2], [0, 0, 0, 1, 1, 2], [0], [0]>} : vector<4x16x16xbf16>, vector<4x16x32xbf16>, vector<4x16x32xf32> -> vector<4x16x32xf32>
    "tpu.trace_stop"() : () -> ()
    %87 = arith.truncf %86 : vector<4x16x32xf32> to vector<4x16x32xbf16>
    %88 = vector.extract_strided_slice %32 {offsets = [0, 0, 96], sizes = [4, 16, 32], strides = [1, 1, 1]} : vector<4x16x128xbf16> to vector<4x16x32xbf16>
    %89 = vector.extract_strided_slice %34 {offsets = [0, 0, 96], sizes = [4, 16, 32], strides = [1, 1, 1]} : vector<4x16x128xbf16> to vector<4x16x32xbf16>
    "tpu.trace_start"() <{level = 10 : i32, message = "bqd,bkd->bqk"}> : () -> ()
    %cst_31 = arith.constant dense<0.000000e+00> : vector<4x16x16xf32>
    %90 = tpu.matmul %88, %89, %cst_31 {dimension_numbers = #tpu.dot_dimension_numbers<[2], [2], [1], [1], [0, 0, 0, 1, 1, 1], [0], [0]>} : vector<4x16x32xbf16>, vector<4x16x32xbf16>, vector<4x16x16xf32> -> vector<4x16x16xf32>
    "tpu.trace_stop"() : () -> ()
    %cst_32 = arith.constant dense<0xFF800000> : vector<4x16xf32>
    %91 = vector.multi_reduction <maximumf>, %90, %cst_32 [2] : vector<4x16x16xf32> to vector<4x16xf32>
    %92 = vector.shape_cast %91 : vector<4x16xf32> to vector<4x16x1xf32>
    %93 = vector.broadcast %92 : vector<4x16x1xf32> to vector<4x16x16xf32>
    %94 = arith.subf %90, %93 : vector<4x16x16xf32>
    %95 = math.exp %94 : vector<4x16x16xf32>
    %cst_33 = arith.constant dense<0.000000e+00> : vector<4x16xf32>
    %96 = vector.multi_reduction <add>, %95, %cst_33 [2] : vector<4x16x16xf32> to vector<4x16xf32>
    %97 = vector.shape_cast %96 : vector<4x16xf32> to vector<4x16x1xf32>
    %98 = tpu.reciprocal %97 {approx = true} : vector<4x16x1xf32> -> vector<4x16x1xf32>
    %99 = vector.broadcast %98 : vector<4x16x1xf32> to vector<4x16x16xf32>
    %100 = arith.mulf %95, %99 : vector<4x16x16xf32>
    %101 = arith.truncf %100 : vector<4x16x16xf32> to vector<4x16x16xbf16>
    %102 = vector.extract_strided_slice %36 {offsets = [0, 0, 96], sizes = [4, 16, 32], strides = [1, 1, 1]} : vector<4x16x128xbf16> to vector<4x16x32xbf16>
    "tpu.trace_start"() <{level = 10 : i32, message = "bqk,bkd->bqd"}> : () -> ()
    %cst_34 = arith.constant dense<0.000000e+00> : vector<4x16x32xf32>
    %103 = tpu.matmul %101, %102, %cst_34 {dimension_numbers = #tpu.dot_dimension_numbers<[2], [1], [1], [2], [0, 0, 0, 1, 1, 2], [0], [0]>} : vector<4x16x16xbf16>, vector<4x16x32xbf16>, vector<4x16x32xf32> -> vector<4x16x32xf32>
    "tpu.trace_stop"() : () -> ()
    %104 = arith.truncf %103 : vector<4x16x32xf32> to vector<4x16x32xbf16>
    %105 = tpu.concatenate %53, %70, %87, %104 in 2 : vector<4x16x32xbf16>, vector<4x16x32xbf16>, vector<4x16x32xbf16>, vector<4x16x32xbf16> -> vector<4x16x128xbf16>
    %106 = vector.shape_cast %105 : vector<4x16x128xbf16> to vector<64x128xbf16>
    %c0_35 = arith.constant 0 : index
    %c0_36 = arith.constant 0 : index
    %107 = vector.load %arg5[%c0_35, %c0_36] : memref<128x128xbf16, #tpu.memory_space<vmem>>, vector<128x128xbf16>
    %cst_37 = arith.constant dense<0.000000e+00> : vector<64x128xf32>
    %108 = tpu.matmul %106, %107, %cst_37 {dimension_numbers = #tpu.dot_dimension_numbers<[1], [0], [0], [1], [0, 0, 1, 1], [], []>} : vector<64x128xbf16>, vector<128x128xbf16>, vector<64x128xf32> -> vector<64x128xf32>
    %109 = arith.addf %1, %108 : vector<64x128xf32>
    %cst_38 = arith.constant dense<0.000000e+00> : vector<64xf32>
    %110 = vector.multi_reduction <add>, %109, %cst_38 [1] : vector<64x128xf32> to vector<64xf32>
    %111 = vector.shape_cast %110 : vector<64xf32> to vector<64x1xf32>
    %cst_39 = arith.constant 1.280000e+02 : f32
    %112 = vector.broadcast %cst_39 : f32 to vector<64x1xf32>
    %113 = arith.divf %111, %112 : vector<64x1xf32>
    %114 = vector.broadcast %113 : vector<64x1xf32> to vector<64x128xf32>
    %115 = arith.subf %109, %114 : vector<64x128xf32>
    %116 = arith.mulf %115, %115 : vector<64x128xf32>
    %cst_40 = arith.constant dense<0.000000e+00> : vector<64xf32>
    %117 = vector.multi_reduction <add>, %116, %cst_40 [1] : vector<64x128xf32> to vector<64xf32>
    %118 = vector.shape_cast %117 : vector<64xf32> to vector<64x1xf32>
    %cst_41 = arith.constant 1.280000e+02 : f32
    %119 = vector.broadcast %cst_41 : f32 to vector<64x1xf32>
    %120 = arith.divf %118, %119 : vector<64x1xf32>
    %cst_42 = arith.constant 9.99999974E-6 : f32
    %121 = vector.broadcast %cst_42 : f32 to vector<64x1xf32>
    %122 = arith.addf %120, %121 : vector<64x1xf32>
    %123 = math.rsqrt %122 : vector<64x1xf32>
    %124 = vector.broadcast %123 : vector<64x1xf32> to vector<64x128xf32>
    %125 = arith.mulf %115, %124 : vector<64x128xf32>
    %c0_43 = arith.constant 0 : index
    %c0_44 = arith.constant 0 : index
    %126 = vector.load %arg8[%c0_43, %c0_44] : memref<1x128xf32, #tpu.memory_space<vmem>>, vector<1x128xf32>
    %127 = vector.broadcast %126 : vector<1x128xf32> to vector<64x128xf32>
    %128 = arith.mulf %125, %127 : vector<64x128xf32>
    %c0_45 = arith.constant 0 : index
    %c0_46 = arith.constant 0 : index
    %129 = vector.load %arg9[%c0_45, %c0_46] : memref<1x128xf32, #tpu.memory_space<vmem>>, vector<1x128xf32>
    %130 = vector.broadcast %129 : vector<1x128xf32> to vector<64x128xf32>
    %131 = arith.addf %128, %130 : vector<64x128xf32>
    %132 = arith.truncf %131 : vector<64x128xf32> to vector<64x128xbf16>
    %c0_47 = arith.constant 0 : index
    %c0_48 = arith.constant 0 : index
    %133 = vector.load %arg10[%c0_47, %c0_48] : memref<128x256xbf16, #tpu.memory_space<vmem>>, vector<128x256xbf16>
    %cst_49 = arith.constant dense<0.000000e+00> : vector<64x256xf32>
    %134 = tpu.matmul %132, %133, %cst_49 {dimension_numbers = #tpu.dot_dimension_numbers<[1], [0], [0], [1], [0, 0, 1, 1], [], []>} : vector<64x128xbf16>, vector<128x256xbf16>, vector<64x256xf32> -> vector<64x256xf32>
    %c0_50 = arith.constant 0 : index
    %c0_51 = arith.constant 0 : index
    %135 = vector.load %arg11[%c0_50, %c0_51] : memref<1x256xf32, #tpu.memory_space<vmem>>, vector<1x256xf32>
    %136 = vector.broadcast %135 : vector<1x256xf32> to vector<64x256xf32>
    %137 = arith.addf %134, %136 : vector<64x256xf32>
    %cst_52 = arith.constant 0.000000e+00 : f32
    %138 = vector.broadcast %cst_52 : f32 to vector<64x256xf32>
    %139 = arith.maximumf %137, %138 : vector<64x256xf32>
    %140 = arith.truncf %139 : vector<64x256xf32> to vector<64x256xbf16>
    %c0_53 = arith.constant 0 : index
    %c0_54 = arith.constant 0 : index
    %141 = vector.load %arg12[%c0_53, %c0_54] : memref<256x128xbf16, #tpu.memory_space<vmem>>, vector<256x128xbf16>
    %cst_55 = arith.constant dense<0.000000e+00> : vector<64x128xf32>
    %142 = tpu.matmul %140, %141, %cst_55 {dimension_numbers = #tpu.dot_dimension_numbers<[1], [0], [0], [1], [0, 0, 1, 1], [], []>} : vector<64x256xbf16>, vector<256x128xbf16>, vector<64x128xf32> -> vector<64x128xf32>
    %c0_56 = arith.constant 0 : index
    %c0_57 = arith.constant 0 : index
    %143 = vector.load %arg13[%c0_56, %c0_57] : memref<1x128xf32, #tpu.memory_space<vmem>>, vector<1x128xf32>
    %144 = vector.broadcast %143 : vector<1x128xf32> to vector<64x128xf32>
    %145 = arith.addf %142, %144 : vector<64x128xf32>
    %146 = arith.addf %109, %145 : vector<64x128xf32>
    %147 = vector.shape_cast %146 : vector<64x128xf32> to vector<4x16x128xf32>
    %c0_58 = arith.constant 0 : index
    %c0_59 = arith.constant 0 : index
    %c0_60 = arith.constant 0 : index
    %148 = vector.load %arg14[%c0_58, %c0_59, %c0_60] : memref<4x16x128xf32, #tpu.memory_space<vmem>>, vector<4x16x128xf32>
    tpu.vector_store %arg14[%c0_58, %c0_59, %c0_60], %147 {strides = array<i32>} : memref<4x16x128xf32, #tpu.memory_space<vmem>>, vector<4x16x128xf32>,
    return
  }
  func.func @transform_0(%arg0: i32) -> (i32, i32, i32) {
    %c0_i32 = arith.constant 0 : i32
    %c0_i32_0 = arith.constant 0 : i32
    %c0_i32_1 = arith.constant 0 : i32
    return %arg0, %c0_i32, %c0_i32_0 : i32, i32, i32
  }
  func.func @transform_1(%arg0: i32) -> (i32, i32) {
    %c0_i32 = arith.constant 0 : i32
    %c0_i32_0 = arith.constant 0 : i32
    %c0_i32_1 = arith.constant 0 : i32
    return %c0_i32, %c0_i32_0 : i32, i32
  }
  func.func @transform_2(%arg0: i32) -> (i32, i32) {
    %c0_i32 = arith.constant 0 : i32
    %c0_i32_0 = arith.constant 0 : i32
    %c0_i32_1 = arith.constant 0 : i32
    return %c0_i32, %c0_i32_0 : i32, i32
  }
  func.func @transform_3(%arg0: i32) -> (i32, i32) {
    %c0_i32 = arith.constant 0 : i32
    %c0_i32_0 = arith.constant 0 : i32
    %c0_i32_1 = arith.constant 0 : i32
    return %c0_i32, %c0_i32_0 : i32, i32
  }
  func.func @transform_4(%arg0: i32) -> (i32, i32) {
    %c0_i32 = arith.constant 0 : i32
    %c0_i32_0 = arith.constant 0 : i32
    %c0_i32_1 = arith.constant 0 : i32
    return %c0_i32, %c0_i32_0 : i32, i32
  }
  func.func @transform_5(%arg0: i32) -> (i32, i32) {
    %c0_i32 = arith.constant 0 : i32
    %c0_i32_0 = arith.constant 0 : i32
    %c0_i32_1 = arith.constant 0 : i32
    return %c0_i32, %c0_i32_0 : i32, i32
  }
  func.func @transform_6(%arg0: i32) -> (i32, i32) {
    %c0_i32 = arith.constant 0 : i32
    %c0_i32_0 = arith.constant 0 : i32
    %c0_i32_1 = arith.constant 0 : i32
    return %c0_i32, %c0_i32_0 : i32, i32
  }
  func.func @transform_7(%arg0: i32) -> (i32, i32) {
    %c0_i32 = arith.constant 0 : i32
    %c0_i32_0 = arith.constant 0 : i32
    %c0_i32_1 = arith.constant 0 : i32
    return %c0_i32, %c0_i32_0 : i32, i32
  }
  func.func @transform_8(%arg0: i32) -> (i32, i32) {
    %c0_i32 = arith.constant 0 : i32
    %c0_i32_0 = arith.constant 0 : i32
    %c0_i32_1 = arith.constant 0 : i32
    return %c0_i32, %c0_i32_0 : i32, i32
  }
  func.func @transform_9(%arg0: i32) -> (i32, i32) {
    %c0_i32 = arith.constant 0 : i32
    %c0_i32_0 = arith.constant 0 : i32
    %c0_i32_1 = arith.constant 0 : i32
    return %c0_i32, %c0_i32_0 : i32, i32
  }
  func.func @transform_10(%arg0: i32) -> (i32, i32) {
    %c0_i32 = arith.constant 0 : i32
    %c0_i32_0 = arith.constant 0 : i32
    %c0_i32_1 = arith.constant 0 : i32
    return %c0_i32, %c0_i32_0 : i32, i32
  }
  func.func @transform_11(%arg0: i32) -> (i32, i32) {
    %c0_i32 = arith.constant 0 : i32
    %c0_i32_0 = arith.constant 0 : i32
    %c0_i32_1 = arith.constant 0 : i32
    return %c0_i32, %c0_i32_0 : i32, i32
  }
  func.func @transform_12(%arg0: i32) -> (i32, i32) {
    %c0_i32 = arith.constant 0 : i32
    %c0_i32_0 = arith.constant 0 : i32
    %c0_i32_1 = arith.constant 0 : i32
    return %c0_i32, %c0_i32_0 : i32, i32
  }
  func.func @transform_13(%arg0: i32) -> (i32, i32, i32) {
    %c0_i32 = arith.constant 0 : i32
    %c0_i32_0 = arith.constant 0 : i32
    %c0_i32_1 = arith.constant 0 : i32
    return %arg0, %c0_i32, %c0_i32_0 : i32, i32, i32
  }
}

</mosaic_0001>

<bundles_post_ra>
// kernel: tpu_custom_call.1
= control target key start
LH: loop header
LB: loop body
LE: loop exit
PB: predicated region body
PF: predicated region fallthrough
CT: control target
= control target key end

     0   :  { %s5288_s0 = inlined_call_operand.hbm [shape: f32[8,16,128], index: 0, kind: input, shape index: {}]   ;;  %s5289_s1 = inlined_call_operand.hbm [shape: bf16[128,128], index: 1, kind: input, shape index: {}]   ;;  %s5290_s2 = inlined_call_operand.hbm [shape: bf16[128,128], index: 2, kind: input, shape index: {}]   ;;  %s5291_s3 = inlined_call_operand.hbm [shape: bf16[128,128], index: 3, kind: input, shape index: {}]   ;;  %s5292_s4 = inlined_call_operand.hbm [shape: bf16[128,128], index: 4, kind: input, shape index: {}]   ;;  %s5293_s5 = inlined_call_operand.vmem [shape: f32[1,128], index: 5, kind: input, shape index: {}]   ;;  %s5294_s6 = inlined_call_operand.vmem [shape: f32[1,128], index: 6, kind: input, shape index: {}]   ;;  %s5295_s7 = inlined_call_operand.vmem [shape: f32[1,128], index: 7, kind: input, shape index: {}]   ;;  %s5296_s8 = inlined_call_operand.vmem [shape: f32[1,128], index: 8, kind: input, shape index: {}]   ;;  %s5297_s9 = inlined_call_operand.hbm [shape: bf16[128,256], index: 9, kind: input, shape index: {}]   ;;  %s5298_s10 = inlined_call_operand.vmem [shape: f32[1,256], index: 10, kind: input, shape index: {}]   ;;  %s5299_s11 = inlined_call_operand.hbm [shape: bf16[256,128], index: 11, kind: input, shape index: {}]   ;;  %s5300_s12 = inlined_call_operand.vmem [shape: f32[1,128], index: 12, kind: input, shape index: {}]   ;;  %s5301_s13 = inlined_call_operand.hbm [shape: f32[8,16,128], index: 13, kind: output, shape index: {}]  }
   0x1   :  { %5305 = sst [smem:[#allocation21_spill]] %s5289_s1 }
   0x2   :  { %5306 = sst [smem:[#allocation22_spill]] %s5290_s2 }
   0x3   :  { %5307 = sst [smem:[#allocation23_spill]] %s5291_s3 }
   0x4   :  { %5308 = sst [smem:[#allocation24_spill]] %s5292_s4 }
   0x5   :  { %5309 = sst [smem:[#allocation25_spill]] %s5297_s9 }
   0x6   :  { %5310 = sst [smem:[#allocation26_spill]] %s5299_s11 }
   0x7   :  { %5311 = sst [smem:[#allocation27_spill]] %s5301_s13 }
   0x8   :  { %18 = vsyncpa [#allocation3], 0 }
   0x9   :  { %20 = vsyncpa [#allocation3 + $0x1], 0 }
   0xa   :  { %21 = vsyncpa [#allocation6], 0 }
   0xb   :  { %22 = vsyncpa [#allocation9], 0 }
   0xc   :  { %23 = vsyncpa [#allocation12], 0 }
   0xd   :  { %24 = vsyncpa [#allocation4], 0 }
   0xe   :  { %26 = vsyncpa [#allocation4 + $0x1], 0  ;;  %s4332_s25 = smov 0   ;;  %s4334_s26 = smov 0  }
   0xf   :  { %s4336_s27 = smov 0   ;;  %s4338_s28 = smov 0  }
  0x10 LB: > { %s5312_s1 = sld [smem:[#allocation21_spill]]  ;;  %s4356_s15 = sadd.s32 4294967295, %s4244_s28   ;;  %s4244_s28 = sphi %s4338_s28, %s5334_s28   ;;  %s4240_s27 = sphi %s4336_s27, %s5333_s27   ;;  %s4236_s26 = sphi %s4334_s26, %s5332_s26   ;;  %s4232_s25 = sphi %s4332_s25, %s5331_s25  }
  0x11   : > { %p3273_p0 = scmp.ge.s32.totalorder %s4244_s28, 1  ;;  %p53_p1 = scmp.eq.s32.totalorder %s4356_s15, 0 }
  0x12   : > { %p341_p2 = scmp.lt.s32.totalorder %s4244_s28, 3  ;;  %s4246_s17 = smov [#allocation5]  }
  0x13   : > { %s354_s18 = sshll.u32 %s4246_s17, 4  ;;  %s5314_s3 = sld [smem:[#allocation23_spill]]  ;;  %s355_s18 = int_to_ptr.vmem [resolvable:$true] %s354_s18 }
  0x14   : > { %p4361_p3 = pnand %p3273_p0, %p341_p2  ;;  %s5316_s9 = sld [smem:[#allocation25_spill]] }
  0x15   : > { %s4247_s30 = smov [#allocation8]   ;;  %s4249_s13 = smov 4  }
  0x16   : > { %s352_s14 = sshll.u32 %s5312_s1, 4  ;;  %p3692_p4 = pneg %p4361_p3  ;;  %s353_s14 = int_to_ptr.hbm [resolvable:$true] %s352_s14 }
  0x17   : > { %s382_s17 = sshll.u32 %s4247_s30, 4  ;;  %s4248_s1 = smov 64   ;;  %s383_s17 = int_to_ptr.vmem [resolvable:$true] %s382_s17 }
  0x18   : > { %p4373_p6 = pnand %p3692_p4, %p53_p1  ;;  %s4250_s19 = smov [#allocation11]  }
  0x19   : > { %s380_s21 = sshll.u32 %s5314_s3, 4  ;;  %s422_s20 = sshll.u32 %s4250_s19, 4  ;;  %s381_s21 = int_to_ptr.hbm [resolvable:$true] %s380_s21  ;;  %s423_s20 = int_to_ptr.vmem [resolvable:$true] %s422_s20 }
  0x1a   : > { %s420_s29 = sshll.u32 %s5316_s9, 4  ;;  %s5317_s2 = sld [smem:[#allocation22_spill]]  ;;  %s421_s29 = int_to_ptr.hbm [resolvable:$true] %s420_s29 }
  0x1b   : > { %3695 = dma.hbm_to_vmem [thread:$0]  (!%p4373_p6), %s353_s14, 1024, %s355_s18, [#allocation6], %s4248_s1, %s4248_s1, %s4249_s13  }
  0x1c   : > { %3701 = dma.hbm_to_vmem [thread:$0]  (!%p4373_p6), %s381_s21, 1024, %s383_s17, [#allocation9], %s4248_s1, %s4248_s1, %s4249_s13  }
  0x1d   : > { %s5303_s3 = smov 128   ;;  %s5304_s9 = smov 8  }
  0x1e   : > { %3707 = dma.hbm_to_vmem [thread:$0]  (!%p4373_p6), %s421_s29, 2048, %s423_s20, [#allocation12], %s5303_s3, %s5303_s3, %s5304_s9  }
  0x1f   : > { %s4253_s14 = smov [#allocation7]   ;;  %s5318_s4 = sld [smem:[#allocation24_spill]] }
  0x20   : > { %s366_s30 = sshll.u32 %s5317_s2, 4  ;;  %s368_s18 = sshll.u32 %s4253_s14, 4  ;;  %s367_s30 = int_to_ptr.hbm [resolvable:$true] %s366_s30  ;;  %s369_s18 = int_to_ptr.vmem [resolvable:$true] %s368_s18 }
  0x21   : > { %3698 = dma.hbm_to_vmem [thread:$0]  (!%p4373_p6), %s367_s30, 1024, %s369_s18, [#allocation6], %s4248_s1, %s4248_s1, %s4249_s13  }
  0x22   : > { %s5319_s11 = sld [smem:[#allocation26_spill]]  ;;  %s4254_s24 = smov [#allocation10]  }
  0x23   : > { %s396_s14 = sshll.u32 %s4254_s24, 4  ;;  %s4255_s30 = smov [#allocation13]   ;;  %s397_s14 = int_to_ptr.vmem [resolvable:$true] %s396_s14 }
  0x24   : > { %s439_s18 = sshll.u32 %s4255_s30, 4  ;;  %s3272_s21 = sadd.s32 4294967294, %s4244_s28   ;;  %s440_s18 = int_to_ptr.vmem [resolvable:$true] %s439_s18 }
  0x25   : > { %s394_s19 = sshll.u32 %s5318_s4, 4  ;;  %s4421_s17 = sadd.s32 1, %s4244_s28   ;;  %s395_s19 = int_to_ptr.hbm [resolvable:$true] %s394_s19 }
  0x26   : > { %3704 = dma.hbm_to_vmem [thread:$0]  (!%p4373_p6), %s395_s19, 1024, %s397_s14, [#allocation9], %s4248_s1, %s4248_s1, %s4249_s13  }
  0x27   : > { %s36_s29 = ssub.s32 %s4244_s28, %s4421_s17  ;;  %s39_s20 = sadd.s32 1, %s4240_s27 }
  0x28   : > { %s437_s23 = sshll.u32 %s5319_s11, 4  ;;  %p37_p7 = scmp.eq.s32.totalorder %s36_s29, 0  ;;  %s438_s23 = int_to_ptr.hbm [resolvable:$true] %s437_s23 }
  0x29   : > { %3710 = dma.hbm_to_vmem [thread:$0]  (!%p4373_p6), %s438_s23, 2048, %s440_s18, [#allocation12], %s4248_s1, %s4248_s1, %s4249_s13  }
  0x2a   : > { %p46_p8 = scmp.ne.s32.totalorder %s4240_s27, %s4236_s26  ;;  %p47_p9 = scmp.eq.s32.totalorder %s4244_s28, 0 }
  0x2b   : > { %p52_p10 = scmp.ne.s32.totalorder %s4236_s26, %s4232_s25  ;;  %p328_p13 = scmp.eq.s32.totalorder %s4356_s15, 1 }
  0x2c   : > { %s4432_s19 = scalar_select %p37_p7, %s4240_s27, %s39_s20  }
  0x2d   : > { %p4434_p11 = por %p47_p9, %p46_p8  ;;  %p4440_p12 = por %p53_p1, %p52_p10 }
  0x2e   : > { %5320 = sst [smem:[#allocation20_spill]] %s4432_s19  ;;  %p334_p0 = scmp.eq.s32.totalorder %s3272_s21, 1 }
  0x2f   : > { %p3725_p2 = scmp.lt.s32.totalorder %s4244_s28, 2  ;;  %s456_s13 = sand.u32 1, %s4240_s27  }
  0x30   : > { %p4447_p4 = por %p328_p13, %p46_p8  ;;  %p4451_p6 = por %p334_p0, %p52_p10 }
  0x31   : > { %s3281_s14 = sshll.u32 %s456_s13, 6  ;;  %s3589_s30 = sshll.u32 %s4244_s28, 6 }
  0x32   : > { %s466_s20 = scalar_lea.hbm %s5288_s0, %s3589_s30  ;;  %s460_s3 = scalar_lea.vmem [#allocation2], %s3281_s14 }
  0x33   : > { %s469_s9 = sshll.u32 %s460_s3, 4  ;;  %s467_s2 = sshll.u32 %s466_s20, 4  ;;  %s470_s9 = int_to_ptr.vmem [resolvable:$true] %s469_s9  ;;  %s468_s2 = int_to_ptr.hbm [resolvable:$true] %s467_s2 }
  0x34   : > { %p4461_p7 = pnand %p3725_p2, %p4434_p11  ;;  %s457_s4 = scalar_lea.sflag [#allocation3], %s456_s13 }
  0x35   : > { %s4136_s11 = sshra.s32 %s468_s2, 4  ;;  %s4143_s30 = scalar_lea.hbm %s5288_s0, 128  ;;  %s4137_s11 = int_to_ptr.hbm [resolvable:$true] %s4136_s11 }
  0x36   : > { %s4138_s19 = scalar_lea.hbm %s4137_s11, 64  ;;  %p4140_p9 = pneg %p4461_p7 }
  0x37   : > { %p4139_p8 = scmp.ne.s32.totalorder %s4137_s11, %s4138_s19  ;;  %p4144_p11 = scmp.lt.s32.totalorder %s4137_s11, %s5288_s0 }
  0x38   : > { %p4145_p0 = scmp.lt.s32.totalorder %s4143_s30, %s4138_s19 }
  0x39   : > { %p4141_p10 = pnand %p4140_p9, %p4139_p8 }
  0x3a   : > { %p4146_p2 = por %p4145_p0, %p4144_p11 }
  0x3b   : > { %p4142_p13 = pneg %p4141_p10 }
  0x3d   : > { %p4147_p5 = pnand %p4146_p2, %p4142_p13 }
  0x3f   : > { %4150 = shalt.err (!%p4147_p5)
}
  0x40   : > { %s5326_s13 = smov 8   ;;  %s5327_s29 = smov 128  }
  0x41   : > { %3714 = dma.hbm_to_vmem [thread:$0]  (!%p4461_p7), %s468_s2, 1024, %s470_s9, %s457_s4, %s5327_s29, %s5327_s29, %s5326_s13  }
  0x42   : > { %481 = sbr.rel (%p4361_p3) target bundleno = 3373 (0xd2d), region = 72  ;;  %s4481_s20 = sand.u32 (!%p4361_p3), 1, %s4236_s26  }
  0x43   : > { %s3286_s11 = sshll.u32 (!%p4361_p3), %s4481_s20, 6  ;;  %s484_s19 = scalar_lea.sflag (!%p4361_p3), [#allocation3], %s4481_s20 }
  0x44   : > { %s4487_s14 = scalar_lea.vmem (!%p4361_p3), [#allocation2], %s3286_s11 }
  0x47   : > { %4211 = dma.done.wait (%p4440_p12), %s484_s19, 1024  }
  0x48   : > { %4213 = vsyncadd (%p4440_p12), %s484_s19, 4294966272 }
  0x49   : > { %4215 = dma.done.wait (%p53_p1), [#allocation6], 2048  }
  0x4a   : > { %4217 = vsyncadd (%p53_p1), [#allocation6], 4294965248 }
  0x4b   : > { %4219 = dma.done.wait (%p53_p1), [#allocation9], 2048  }
  0x4c   : > { %4221 = vsyncadd (%p53_p1), [#allocation9], 4294965248 }
  0x4d   : > { %4223 = dma.done.wait (%p53_p1), [#allocation12], 4096  }
  0x4e   : > { %4225 = vsyncadd (%p53_p1), [#allocation12], 4294963200  ;;  %v566_v0 = vld [vmem:[%s4487_s14 + $0x10] sm:$0xff]  ;;  %v564_v1 = vld [vmem:[%s4487_s14] sm:$0xff]  ;;  %v4256_v7 = vmov 128.0   ;;  %s4257_s1 = smov 96  }
  0x4f   : > { %576 = vadd.xlane.f32.xlu1 %v566_v0  ;;  %572 = vadd.xlane.f32.xlu0 %v564_v1  ;;  %v567_v2 = vld [vmem:[%s4487_s14 + $0x18] sm:$0xff]  ;;  %v565_v3 = vld [vmem:[%s4487_s14 + $0x8] sm:$0xff]  ;;  %v568_v5 = vld [vmem:[%s4487_s14 + $0x20] sm:$0xff]  ;;  %3786 = vrcp.f32 %v4256_v7  ;;  %s4258_s21 = smov 64   ;;  %s4259_s3 = smov 32  }
  0x50   : > { %v569_v4 = vld [vmem:[%s4487_s14 + $0x28] sm:$0xff]  ;;  %v570_v6 = vld [vmem:[%s4487_s14 + $0x30] sm:$0xff]  ;;  %v4546_v40 = vld [vmem:[%s4487_s14 + $0x38] sm:$0xff]  ;;  %s5226_s4 = scalar_lea.vmem [#allocation14], %s3286_s11  ;;  %s3655_s11 = sshll.u32 %s4356_s15, 6 }
  0x51   : > { %v3597_v43 = vld [vmem:[#allocation5 + $0x38] sm:$0xff]  ;;  %v3596_v46 = vld [vmem:[#allocation5 + $0x30] sm:$0xff]  ;;  %v3595_v49 = vld [vmem:[#allocation5 + $0x28] sm:$0xff]  ;;  %s3126_s15 = scalar_lea.sflag [#allocation4], %s4481_s20 }
  0x52   : > { %v3605_v44 = vld [vmem:[#allocation7 + $0x38] sm:$0xff]  ;;  %831 = vmatpush.bf16.msra.mxu0 %v3597_v43  ;;  %v3604_v47 = vld [vmem:[#allocation7 + $0x30] sm:$0xff]  ;;  %v3603_v50 = vld [vmem:[#allocation7 + $0x28] sm:$0xff] }
  0x53   : > { %v3613_v45 = vld [vmem:[#allocation8 + $0x38] sm:$0xff]  ;;  %924 = vmatpush.bf16.msra.mxu1 %v3605_v44  ;;  %v3612_v48 = vld [vmem:[#allocation8 + $0x30] sm:$0xff]  ;;  %v3611_v51 = vld [vmem:[#allocation8 + $0x28] sm:$0xff] }
  0x54   : > { %1017 = vmatpush.bf16.msra.mxu2 %v3613_v45  ;;  %v3594_v52 = vld [vmem:[#allocation5 + $0x20] sm:$0xff]  ;;  %v3593_v55 = vld [vmem:[#allocation5 + $0x18] sm:$0xff]  ;;  %v3592_v58 = vld [vmem:[#allocation5 + $0x10] sm:$0xff] }
  0x55   : > { %v3787_v8 = vpop.eup %3786  ;;  %v3602_v53 = vld [vmem:[#allocation7 + $0x20] sm:$0xff]  ;;  %v3601_v56 = vld [vmem:[#allocation7 + $0x18] sm:$0xff]  ;;  %v3600_v59 = vld [vmem:[#allocation7 + $0x10] sm:$0xff] }
  0x56   : > { %v589_v9 = vmul.f32 128.0, %v3787_v8  ;;  %vm593_vm0 = vweird.f32 %v3787_v8  ;;  %832 = vmatpush.bf16.msra.mxu0 %v3596_v46  ;;  %v3610_v54 = vld [vmem:[#allocation8 + $0x20] sm:$0xff]  ;;  %v3609_v57 = vld [vmem:[#allocation8 + $0x18] sm:$0xff]  ;;  %v3608_v60 = vld [vmem:[#allocation8 + $0x10] sm:$0xff] }
  0x57   : > { %578 = vadd.xlane.f32.xlu1 %v567_v2  ;;  %574 = vadd.xlane.f32.xlu0 %v565_v3  ;;  %v3591_v62 = vld [vmem:[#allocation5 + $0x8] sm:$0xff] }
  0x58   : > { %v590_v10 = vsub.f32 1.0, %v589_v9  ;;  %925 = vmatpush.bf16.msra.mxu1 %v3604_v47  ;;  %1018 = vmatpush.bf16.msra.mxu2 %v3612_v48  ;;  %v3599_v63 = vld [vmem:[#allocation7 + $0x8] sm:$0xff] }
  0x5a   : > { %v591_v11 = vmul.f32 %v3787_v8, %v590_v10  ;;  %833 = vmatpush.bf16.msra.mxu0 %v3595_v49  ;;  %v4581_v49 = vld [vmem:[%s5293_s5] ss:$0 sm:$0xff] }
  0x5c   : > { %v592_v12 = vadd.f32 %v3787_v8, %v591_v11  ;;  %926 = vmatpush.bf16.msra.mxu1 %v3603_v50  ;;  %1019 = vmatpush.bf16.msra.mxu2 %v3611_v51 }
  0x5e   : > { %v4512_v13 = vsel %vm593_vm0, %v3787_v8, %v592_v12  ;;  %834 = vmatpush.bf16.msra.mxu0 %v3594_v52 }
  0x5f   : > { %582 = vadd.xlane.f32.xlu1 %v569_v4  ;;  %580 = vadd.xlane.f32.xlu0 %v568_v5 }
  0x60   : > { %927 = vmatpush.bf16.msra.mxu1 %v3602_v53  ;;  %1020 = vmatpush.bf16.msra.mxu2 %v3610_v54 }
  0x62   : > { %835 = vmatpush.bf16.msra.mxu0 %v3593_v55 }
  0x64   : > { %928 = vmatpush.bf16.msra.mxu1 %v3601_v56  ;;  %1021 = vmatpush.bf16.msra.mxu2 %v3609_v57 }
  0x66   : > { %836 = vmatpush.bf16.msra.mxu0 %v3592_v58 }
  0x67   : > { %584 = vadd.xlane.f32.xlu1 %v570_v6 }
  0x68   : > { %929 = vmatpush.bf16.msra.mxu1 %v3600_v59  ;;  %1022 = vmatpush.bf16.msra.mxu2 %v3608_v60  ;;  %v4590_v59 = vld [vmem:[%s5294_s6] ss:$0 sm:$0xff] }
  0x6a   : > { %837 = vmatpush.bf16.msra.mxu0 %v3591_v62 }
  0x6c   : > { %930 = vmatpush.bf16.msra.mxu1 %v3599_v63 }
  0xc2   : > { %v577_v14 = vpop.xlane.xlu1 %576  ;;  %v573_v15 = vpop.xlane.xlu0 %572 }
  0xc3   : > { %v595_v16 = vmul.f32 %v4512_v13, %v573_v15  ;;  %v597_v23 = vmul.f32 %v4512_v13, %v577_v14 }
  0xc5   : > { %v4515_v17 = vsub.f32 %v564_v1, %v595_v16  ;;  %v4530_v28 = vsub.f32 %v566_v0, %v597_v23  ;;  %v3607_v0 = vld [vmem:[#allocation8 + $0x8] sm:$0xff] }
  0xc6   : > { %1023 = vmatpush.bf16.msra.mxu2 %v3607_v0 }
  0xc7   : > { %v611_v18 = vmul.f32 %v4515_v17, %v4515_v17  ;;  %v613_v35 = vmul.f32 %v4530_v28, %v4530_v28 }
  0xc9   : > { %619 = vadd.xlane.f32.xlu2 %v611_v18 }
  0xca   : > { %v579_v19 = vpop.xlane.xlu1 %578  ;;  %v575_v20 = vpop.xlane.xlu0 %574 }
  0xcb   : > { %v598_v21 = vmul.f32 %v4512_v13, %v579_v19  ;;  %v596_v22 = vmul.f32 %v4512_v13, %v575_v20 }
  0xcd   : > { %v4522_v24 = vsub.f32 %v567_v2, %v598_v21  ;;  %v4524_v25 = vsub.f32 %v565_v3, %v596_v22  ;;  %v3590_v3 = vld [vmem:[#allocation5] sm:$0xff] }
  0xce   : > { %838 = vmatpush.bf16.msra.mxu0 %v3590_v3 }
  0xcf   : > { %v614_v26 = vmul.f32 %v4522_v24, %v4522_v24  ;;  %v612_v27 = vmul.f32 %v4524_v25, %v4524_v25 }
  0xd1   : > { %625 = vadd.xlane.f32.xlu0 %v614_v26  ;;  %621 = vadd.xlane.f32.xlu2 %v612_v27 }
  0xd2   : > { %v583_v29 = vpop.xlane.xlu1 %582  ;;  %v581_v30 = vpop.xlane.xlu0 %580 }
  0xd3   : > { %v600_v31 = vmul.f32 %v4512_v13, %v583_v29  ;;  %v599_v32 = vmul.f32 %v4512_v13, %v581_v30 }
  0xd5   : > { %v4534_v33 = vsub.f32 %v569_v4, %v600_v31  ;;  %v4536_v34 = vsub.f32 %v568_v5, %v599_v32  ;;  %v3598_v4 = vld [vmem:[#allocation7] sm:$0xff] }
  0xd6   : > { %v3606_v5 = vld [vmem:[#allocation8] sm:$0xff]  ;;  %931 = vmatpush.bf16.msra.mxu1 %v3598_v4 }
  0xd7   : > { %v616_v36 = vmul.f32 %v4534_v33, %v4534_v33  ;;  %v615_v37 = vmul.f32 %v4536_v34, %v4536_v34  ;;  %1024 = vmatpush.bf16.msra.mxu2 %v3606_v5 }
  0xd9   : > { %629 = vadd.xlane.f32.xlu1 %v616_v36  ;;  %623 = vadd.xlane.f32.xlu2 %v613_v35 }
  0xda   : > { %627 = vadd.xlane.f32.xlu0 %v615_v37  ;;  %v585_v38 = vpop.xlane.xlu1 %584 }
  0xdb   : > { %v601_v39 = vmul.f32 %v4512_v13, %v585_v38 }
  0xdd   : > { %v4549_v41 = vsub.f32 %v570_v6, %v601_v39 }
  0xdf   : > { %v617_v42 = vmul.f32 %v4549_v41, %v4549_v41 }
  0xe1   : > { %586 = vadd.xlane.f32.xlu2 %v4546_v40 }
  0xe9   : > { %631 = vadd.xlane.f32.xlu2 %v617_v42 }
 0x13c   : > { %v620_v61 = vpop.xlane.xlu2 %619 }
 0x13d   : > { %v635_v1 = vmul.f32 %v620_v61, %v4512_v13 }
 0x13f   : > { %v643_v2 = vadd.f32 1e-05, %v635_v1 }
 0x141   : > { %3788 = vrsqrt.f32 %v643_v2  ;;  %vm657_vm2 = vweird.f32 %v643_v2 }
 0x144   : > { %v622_v6 = vpop.xlane.xlu2 %621  ;;  %v626_v7 = vpop.xlane.xlu0 %625 }
 0x145   : > { %v636_v8 = vmul.f32 %v622_v6, %v4512_v13  ;;  %v638_v9 = vmul.f32 %v626_v7, %v4512_v13 }
 0x147   : > { %v3789_v10 = vpop.eup %3788  ;;  %v644_v11 = vadd.f32 1e-05, %v636_v8  ;;  %v4556_v12 = vadd.f32 1e-05, %v638_v9 }
 0x148   : > { %v652_v14 = vmul.f32 %v3789_v10, %v643_v2  ;;  %vm658_vm1 = vweird.f32 %v3789_v10 }
 0x149   : > { %3790 = vrsqrt.f32 %v644_v11  ;;  %vm659_vm3 = vmor %vm657_vm2, %vm658_vm1  ;;  %vm667_vm5 = vweird.f32 %v644_v11  ;;  %vm687_vm7 = vweird.f32 %v4556_v12 }
 0x14a   : > { %v653_v15 = vmul.f32 %v3789_v10, %v652_v14  ;;  %3792 = vrsqrt.f32 %v4556_v12 }
 0x14c   : > { %v654_v16 = vmul.f32 0.5, %v653_v15  ;;  %v630_v18 = vpop.xlane.xlu1 %629  ;;  %v624_v19 = vpop.xlane.xlu2 %623 }
 0x14d   : > { %v640_v20 = vmul.f32 %v630_v18, %v4512_v13  ;;  %v637_v21 = vmul.f32 %v624_v19, %v4512_v13  ;;  %v628_v22 = vpop.xlane.xlu0 %627 }
 0x14e   : > { %v655_v23 = vsub.f32 1.5, %v654_v16  ;;  %v639_v26 = vmul.f32 %v628_v22, %v4512_v13 }
 0x14f   : > { %v3791_v27 = vpop.eup %3790  ;;  %v645_v29 = vadd.f32 1e-05, %v637_v21  ;;  %v4564_v35 = vadd.f32 1e-05, %v640_v20 }
 0x150   : > { %v4562_v30 = vpop.eup %3792  ;;  %v656_v31 = vmul.f32 %v3789_v10, %v655_v23  ;;  %v662_v32 = vmul.f32 %v3791_v27, %v644_v11  ;;  %v4568_v37 = vadd.f32 1e-05, %v639_v26  ;;  %vm668_vm4 = vweird.f32 %v3791_v27 }
 0x151   : > { %v682_v36 = vmul.f32 %v4562_v30, %v4556_v12  ;;  %3794 = vrsqrt.f32 %v645_v29  ;;  %vm669_vm6 = vmor %vm667_vm5, %vm668_vm4  ;;  %vm688_vm8 = vweird.f32 %v4562_v30  ;;  %vm677_vm11 = vweird.f32 %v645_v29 }
 0x152   : > { %v663_v38 = vmul.f32 %v3791_v27, %v662_v32  ;;  %v660_v39 = vsel %vm659_vm3, %v3789_v10, %v656_v31  ;;  %3796 = vrsqrt.f32 %v4564_v35  ;;  %vm689_vm10 = vmor %vm687_vm7, %vm688_vm8  ;;  %vm707_vm13 = vweird.f32 %v4564_v35 }
 0x153   : > { %v683_v43 = vmul.f32 %v4562_v30, %v682_v36  ;;  %3798 = vrsqrt.f32 %v4568_v37  ;;  %v731_v47 = vmul.f32 %v660_v39, %v4515_v17  ;;  %vm697_vm15 = vweird.f32 %v4568_v37 }
 0x154   : > { %v664_v42 = vmul.f32 0.5, %v663_v38  ;;  %v587_v44 = vpop.xlane.xlu2 %586 }
 0x155   : > { %v602_v45 = vmul.f32 %v4512_v13, %v587_v44  ;;  %v684_v52 = vmul.f32 0.5, %v683_v43  ;;  %v743_v58 = vmul.f32 %v4581_v49, %v731_v47 }
 0x156   : > { %v665_v46 = vsub.f32 1.5, %v664_v42 }
 0x157   : > { %v4576_v48 = vsub.f32 %v4546_v40, %v602_v45  ;;  %v3795_v50 = vpop.eup %3794  ;;  %v685_v60 = vsub.f32 1.5, %v684_v52  ;;  %v755_v1 = vadd.f32 %v4590_v59, %v743_v58 }
 0x158   : > { %v666_v51 = vmul.f32 %v3791_v27, %v665_v46  ;;  %v672_v53 = vmul.f32 %v3795_v50, %v645_v29  ;;  %v3797_v55 = vpop.eup %3796  ;;  %vm678_vm9 = vweird.f32 %v3795_v50 }
 0x159   : > { %v618_v54 = vmul.f32 %v4576_v48, %v4576_v48  ;;  %v3799_v17 = vpop.eup %3798  ;;  %v702_v63 = vmul.f32 %v3797_v55, %v4564_v35  ;;  %v686_v3 = vmul.f32 %v4562_v30, %v685_v60  ;;  %vm679_vm12 = vmor %vm677_vm11, %vm678_vm9  ;;  %vm708_vm14 = vweird.f32 %v3797_v55 }
 0x15a   : > { %v670_v56 = vsel %vm669_vm6, %v3791_v27, %v666_v51  ;;  %v673_v57 = vmul.f32 %v3795_v50, %v672_v53  ;;  %vm698_vm0 = vweird.f32 %v3799_v17  ;;  %vm709_vm1 = vmor %vm707_vm13, %vm708_vm14  ;;  %vm1080_vm9 = vcmask 261120  }
 0x15b   : > { %v732_v40 = vmul.f32 %v670_v56, %v4524_v25  ;;  %633 = vadd.xlane.f32.xlu0 %v618_v54  ;;  %v692_v25 = vmul.f32 %v3799_v17, %v4568_v37  ;;  %v703_v6 = vmul.f32 %v3797_v55, %v702_v63  ;;  %v690_v9 = vsel %vm689_vm10, %v4562_v30, %v686_v3  ;;  %vm699_vm2 = vmor %vm697_vm15, %vm698_vm0 }
 0x15c   : > { %v674_v61 = vmul.f32 0.5, %v673_v57  ;;  %v734_v14 = vmul.f32 %v690_v9, %v4522_v24  ;;  %v632_v37 = vpop.xlane.xlu2 %631  ;;  %vm1191_vm10 = vcmask 130048   ;;  %vm2424_vm11 = vcmask 523264  }
 0x15d   : > { %v744_v62 = vmul.f32 %v4581_v49, %v732_v40  ;;  %v693_v7 = vmul.f32 %v3799_v17, %v692_v25  ;;  %v704_v11 = vmul.f32 0.5, %v703_v6  ;;  %v641_v38 = vmul.f32 %v632_v37, %v4512_v13 }
 0x15e   : > { %v675_v0 = vsub.f32 1.5, %v674_v61  ;;  %v746_v19 = vmul.f32 %v4581_v49, %v734_v14 }
 0x15f   : > { %v756_v2 = vadd.f32 %v4590_v59, %v744_v62  ;;  %v694_v12 = vmul.f32 0.5, %v693_v7  ;;  %v705_v16 = vsub.f32 1.5, %v704_v11  ;;  %v649_v39 = vadd.f32 1e-05, %v641_v38 }
 0x160   : > { %v676_v4 = vmul.f32 %v3795_v50, %v675_v0  ;;  %v758_v24 = vadd.f32 %v4590_v59, %v746_v19 }
 0x161   : > { %v763_v5 = vpack.c.bf16 %v756_v2, %v755_v1  ;;  %v695_v18 = vsub.f32 1.5, %v694_v12  ;;  %v706_v21 = vmul.f32 %v3797_v55, %v705_v16  ;;  %3800 = vrsqrt.f32 %v649_v39 }
 0x162   : > { %v680_v8 = vsel %vm679_vm12, %v3795_v50, %v676_v4  ;;  %vm717_vm3 = vweird.f32 %v649_v39  ;;  %vm2433_vm12 = vcmask 785408  }
 0x163   : > { %839 = vmatmul.bf16.vlgmr.msra.gmra.mxu0 %v763_v5  ;;  %932 = vmatmul.bf16.vlgmr.msra.gmra.mxu1 %v763_v5  ;;  %v733_v10 = vmul.f32 %v680_v8, %v4530_v28  ;;  %v696_v28 = vmul.f32 %v3799_v17, %v695_v18  ;;  %v710_v23 = vsel %vm709_vm1, %v3797_v55, %v706_v21 }
 0x164   : > { %1025 = vmatmul.bf16.vlgmr.msra.gmra.mxu2 %v763_v5  ;;  %v736_v27 = vmul.f32 %v710_v23, %v4534_v33 }
 0x165   : > { %v745_v15 = vmul.f32 %v4581_v49, %v733_v10  ;;  %v700_v26 = vsel %vm699_vm2, %v3799_v17, %v696_v28 }
 0x166   : > { %v735_v29 = vmul.f32 %v700_v26, %v4536_v34  ;;  %v748_v31 = vmul.f32 %v4581_v49, %v736_v27 }
 0x167   : > { %v757_v20 = vadd.f32 %v4590_v59, %v745_v15  ;;  %v3801_v33 = vpop.eup %3800 }
 0x168   : > { %v747_v30 = vmul.f32 %v4581_v49, %v735_v29  ;;  %v760_v35 = vadd.f32 %v4590_v59, %v748_v31  ;;  %v712_v42 = vmul.f32 %v3801_v33, %v649_v39  ;;  %vm718_vm4 = vweird.f32 %v3801_v33 }
 0x169   : > { %v764_v22 = vpack.c.bf16 %v758_v24, %v757_v20  ;;  %vm719_vm5 = vmor %vm717_vm3, %vm718_vm4 }
 0x16a   : > { %v759_v32 = vadd.f32 %v4590_v59, %v747_v30  ;;  %v713_v34 = vmul.f32 %v3801_v33, %v712_v42 }
 0x16c   : > { %v765_v36 = vpack.c.bf16 %v760_v35, %v759_v32  ;;  %v714_v46 = vmul.f32 0.5, %v713_v34 }
 0x16e   : > { %v715_v47 = vsub.f32 1.5, %v714_v46 }
 0x170   : > { %v716_v51 = vmul.f32 %v3801_v33, %v715_v47 }
 0x172   : > { %v720_v54 = vsel %vm719_vm5, %v3801_v33, %v716_v51 }
 0x173   : > { %844 = vmatmul.bf16.gmra.mxu0 %v764_v22  ;;  %937 = vmatmul.bf16.gmra.mxu1 %v764_v22  ;;  %v737_v57 = vmul.f32 %v720_v54, %v4549_v41 }
 0x174   : > { %1030 = vmatmul.bf16.gmra.mxu2 %v764_v22 }
 0x175   : > { %v749_v62 = vmul.f32 %v4581_v49, %v737_v57 }
 0x177   : > { %v761_v4 = vadd.f32 %v4590_v59, %v749_v62 }
 0x183   : > { %849 = vmatmul.bf16.gmra.mxu0 %v765_v36  ;;  %942 = vmatmul.bf16.gmra.mxu1 %v765_v36 }
 0x184   : > { %1035 = vmatmul.bf16.gmra.mxu2 %v765_v36 }
 0x1ce   : > { %v634_v43 = vpop.xlane.xlu0 %633 }
 0x1cf   : > { %v642_v44 = vmul.f32 %v634_v43, %v4512_v13 }
 0x1d1   : > { %v650_v45 = vadd.f32 1e-05, %v642_v44 }
 0x1d3   : > { %3802 = vrsqrt.f32 %v650_v45  ;;  %vm727_vm6 = vweird.f32 %v650_v45 }
 0x1d9   : > { %v3803_v50 = vpop.eup %3802 }
 0x1da   : > { %v722_v52 = vmul.f32 %v3803_v50, %v650_v45  ;;  %vm728_vm7 = vweird.f32 %v3803_v50 }
 0x1db   : > { %vm729_vm8 = vmor %vm727_vm6, %vm728_vm7 }
 0x1dc   : > { %v723_v53 = vmul.f32 %v3803_v50, %v722_v52 }
 0x1de   : > { %v724_v55 = vmul.f32 0.5, %v723_v53 }
 0x1e0   : > { %v725_v56 = vsub.f32 1.5, %v724_v55  ;;  %v840_v17 = vpop.f32.mrf.mxu0  ;;  %v933_v40 = vpop.f32.mrf.mxu1 }
 0x1e1   : > { %v1054_v63 = vpack.c.bf16 %v933_v40, %v933_v40  ;;  %v1046_v12 = vpack.c.bf16 %v840_v17, %v840_v17 }
 0x1e2   : > { %v726_v58 = vmul.f32 %v3803_v50, %v725_v56 }
 0x1e3   : > { %v1077_v41 = vunpack.c.l.b16 %v1054_v63  ;;  %v1072_v19 = vunpack.c.l.b16 %v1046_v12 }
 0x1e4   : > { %v730_v60 = vsel %vm729_vm8, %v3803_v50, %v726_v58 }
 0x1e5   : > { %v738_v61 = vmul.f32 %v730_v60, %v4576_v48 }
 0x1e7   : > { %v4620_v25 = vpop.f32.mrf.mxu2  ;;  %v750_v0 = vmul.f32 %v4581_v49, %v738_v61 }
 0x1e8   : > { %v842_v1 = vpop.f32.mrf.mxu0  ;;  %v935_v2 = vpop.f32.mrf.mxu1 }
 0x1e9   : > { %v1055_v3 = vpack.c.bf16 %v935_v2, %v935_v2  ;;  %v762_v5 = vadd.f32 %v4590_v59, %v750_v0  ;;  %v1047_v11 = vpack.c.bf16 %v842_v1, %v842_v1  ;;  %v1062_v1 = vpack.c.bf16 %v4620_v25, %v4620_v25 }
 0x1eb   : > { %v1078_v6 = vunpack.c.l.b16 %v1055_v3  ;;  %v766_v7 = vpack.c.bf16 %v762_v5, %v761_v4  ;;  %v1073_v14 = vunpack.c.l.b16 %v1047_v11 }
 0x1ed   : > { %v4625_v8 = vpack.c.b16 %v1078_v6, %v1077_v41  ;;  %854 = vmatmul.bf16.gmra.mxu0 %v766_v7  ;;  %947 = vmatmul.bf16.gmra.mxu1 %v766_v7  ;;  %v4631_v21 = vpack.c.b16 %v1073_v14, %v1072_v19  ;;  %v1295_v41 = vunpack.c.l.b16 %v1062_v1 }
 0x1ee   : > { %1040 = vmatmul.bf16.gmra.mxu2 %v766_v7 }
 0x1ef   : > { %v1028_v48 = vpop.f32.mrf.mxu2  ;;  %v1085_v49 = vsel %vm1080_vm9, %v4625_v8, 0 }
 0x1f0   : > { %v845_v9 = vpop.f32.mrf.mxu0  ;;  %v938_v10 = vpop.f32.mrf.mxu1  ;;  %1094 = vmatpush.bf16.xpose.msrb.mxu0 %v1085_v49  ;;  %v1063_v60 = vpack.c.bf16 %v1028_v48, %v1028_v48 }
 0x1f1   : > { %v1056_v59 = vpack.c.bf16 %v938_v10, %v938_v10  ;;  %v1048_v26 = vpack.c.bf16 %v845_v9, %v845_v9 }
 0x1f2   : > { %v1296_v3 = vunpack.c.l.b16 %v1063_v60 }
 0x1f3   : > { %v1108_v28 = vunpack.c.l.b16 %v1056_v59  ;;  %v1103_v35 = vunpack.c.l.b16 %v1048_v26 }
 0x1f4   : > { %v4658_v10 = vpack.c.b16 %v1296_v3, %v1295_v41 }
 0x1f7   : > { %v4629_v15 = vpop.f32.mrf.mxu2 }
 0x1f8   : > { %v847_v16 = vpop.f32.mrf.mxu0  ;;  %v940_v18 = vpop.f32.mrf.mxu1  ;;  %v1064_v25 = vpack.c.bf16 %v4629_v15, %v4629_v15 }
 0x1f9   : > { %v1057_v20 = vpack.c.bf16 %v940_v18, %v940_v18  ;;  %v1049_v22 = vpack.c.bf16 %v847_v16, %v847_v16 }
 0x1fb   : > { %v1109_v24 = vunpack.c.l.b16 %v1057_v20  ;;  %v1104_v32 = vunpack.c.l.b16 %v1049_v22  ;;  %v1323_v22 = vunpack.c.l.b16 %v1064_v25 }
 0x1fd   : > { %v4633_v23 = vpack.c.b16 %v1109_v24, %v1108_v28  ;;  %3390 = vmatmul.msk.bf16.vlgmr.msrb.gmra.mxu0 %vm1080_vm9, %v4631_v21  ;;  %v4639_v36 = vpack.c.b16 %v1104_v32, %v1103_v35 }
 0x1ff   : > { %v1033_v27 = vpop.f32.mrf.mxu2  ;;  %v1115_v29 = vsel %vm1080_vm9, %v4633_v23, 0 }
 0x200   : > { %v850_v30 = vpop.f32.mrf.mxu0  ;;  %v943_v31 = vpop.f32.mrf.mxu1  ;;  %1124 = vmatpush.bf16.xpose.msra.mxu3 %v1115_v29  ;;  %v1065_v49 = vpack.c.bf16 %v1033_v27, %v1033_v27 }
 0x201   : > { %v1058_v37 = vpack.c.bf16 %v943_v31, %v943_v31  ;;  %v1050_v47 = vpack.c.bf16 %v850_v30, %v850_v30 }
 0x202   : > { %v1324_v19 = vunpack.c.l.b16 %v1065_v49 }
 0x203   : > { %v1138_v34 = vunpack.c.l.b16 %v1058_v37  ;;  %v1133_v56 = vunpack.c.l.b16 %v1050_v47 }
 0x204   : > { %v4670_v29 = vpack.c.b16 %v1324_v19, %v1323_v22 }
 0x207   : > { %v1036_v38 = vpop.f32.mrf.mxu2  ;;  %3391 = vmatmul.msk.bf16.vlgmr.msra.gmra.mxu3 %vm1080_vm9, %v4639_v36 }
 0x208   : > { %v945_v39 = vpop.f32.mrf.mxu1  ;;  %v852_v42 = vpop.f32.mrf.mxu0  ;;  %v1066_v46 = vpack.c.bf16 %v1036_v38, %v1036_v38 }
 0x209   : > { %v1059_v33 = vpack.c.bf16 %v945_v39, %v945_v39  ;;  %v1051_v44 = vpack.c.bf16 %v852_v42, %v852_v42 }
 0x20a   : > { %v1351_v54 = vunpack.c.l.b16 %v1066_v46 }
 0x20b   : > { %v1139_v43 = vunpack.c.l.b16 %v1059_v33  ;;  %v1134_v53 = vunpack.c.l.b16 %v1051_v44 }
 0x20d   : > { %v4643_v45 = vpack.c.b16 %v1139_v43, %v1138_v34  ;;  %v4649_v40 = vpack.c.b16 %v1134_v53, %v1133_v56 }
 0x20f   : > { %v1038_v50 = vpop.f32.mrf.mxu2  ;;  %v1145_v51 = vsel %vm1080_vm9, %v4643_v45, 0 }
 0x210   : > { %v1067_v52 = vpack.c.bf16 %v1038_v50, %v1038_v50  ;;  %1154 = vmatpush.bf16.xpose.msrb.mxu3 %v1145_v51 }
 0x212   : > { %v1352_v55 = vunpack.c.l.b16 %v1067_v52 }
 0x214   : > { %v4647_v17 = vpack.c.b16 %v1352_v55, %v1351_v54 }
 0x216   : > { %1365 = vmatpush.bf16.msra.mxu0 %v4647_v17 }
 0x217   : > { %3392 = vmatmul.msk.bf16.vlgmr.msrb.gmra.mxu3 %vm1080_vm9, %v4649_v40 }
 0x26a   : > { %v855_v57 = vpop.f32.mrf.mxu0  ;;  %v948_v58 = vpop.f32.mrf.mxu1 }
 0x26b   : > { %v1060_v61 = vpack.c.bf16 %v948_v58, %v948_v58  ;;  %v1052_v48 = vpack.c.bf16 %v855_v57, %v855_v57 }
 0x26d   : > { %v1168_v4 = vunpack.c.l.b16 %v1060_v61  ;;  %v1163_v24 = vunpack.c.l.b16 %v1052_v48 }
 0x271   : > { %v1041_v62 = vpop.f32.mrf.mxu2 }
 0x272   : > { %v857_v63 = vpop.f32.mrf.mxu0  ;;  %v950_v0 = vpop.f32.mrf.mxu1  ;;  %v1068_v9 = vpack.c.bf16 %v1041_v62, %v1041_v62 }
 0x273   : > { %v1061_v2 = vpack.c.bf16 %v950_v0, %v950_v0  ;;  %v1053_v6 = vpack.c.bf16 %v857_v63, %v857_v63 }
 0x274   : > { %v1379_v20 = vunpack.c.l.b16 %v1068_v9 }
 0x275   : > { %v1169_v5 = vunpack.c.l.b16 %v1061_v2  ;;  %v1164_v16 = vunpack.c.l.b16 %v1053_v6 }
 0x277   : > { %v4656_v7 = vpack.c.b16 %v1169_v5, %v1168_v4  ;;  %v4668_v27 = vpack.c.b16 %v1164_v16, %v1163_v24 }
 0x279   : > { %v1043_v11 = vpop.f32.mrf.mxu2  ;;  %v1175_v12 = vsel %vm1080_vm9, %v4656_v7, 0 }
 0x27a   : > { %v1069_v14 = vpack.c.bf16 %v1043_v11, %v1043_v11  ;;  %v1096_v59 = vpop.f32.mrf.mxu0  ;;  %1184 = vmatpush.bf16.xpose.msra.mxu3 %v1175_v12 }
 0x27b   : > { %v1192_v18 = vsel %vm1191_vm10, %v1096_v59, -inf }
 0x27c   : > { %v1380_v28 = vunpack.c.l.b16 %v1069_v14  ;;  %1193 = vmax.xlane.f32.xlu1 %v1192_v18 }
 0x27e   : > { %v4666_v26 = vpack.c.b16 %v1380_v28, %v1379_v20 }
 0x280   : > { %1393 = vmatpush.bf16.msrb.mxu1 %v4666_v26 }
 0x281   : > { %3393 = vmatmul.msk.bf16.vlgmr.msra.gmra.mxu3 %vm1080_vm9, %v4668_v27 }
 0x282   : > { %1309 = vmatpush.bf16.msrb.mxu3 %v4658_v10  ;;  %v1098_v15 = vpop.f32.mrf.mxu0 }
 0x283   : > { %v1195_v30 = vsel %vm1191_vm10, %v1098_v15, -inf }
 0x284   : > { %1196 = vmax.xlane.f32.xlu2 %v1195_v30 }
 0x286   : > { %1337 = vmatpush.bf16.msra.mxu3 %v4670_v29 }
 0x28a   : > { %v1126_v31 = vpop.f32.mrf.mxu3 }
 0x28b   : > { %v1198_v32 = vsel %vm1191_vm10, %v1126_v31, -inf }
 0x28c   : > { %1199 = vmax.xlane.f32.xlu0 %v1198_v32 }
 0x292   : > { %v1128_v35 = vpop.f32.mrf.mxu3 }
 0x293   : > { %v1201_v37 = vsel %vm1191_vm10, %v1128_v35, -inf }
 0x294   : > { %1202 = vmax.xlane.f32.xlu1 %v1201_v37 }
 0x29a   : > { %v1156_v38 = vpop.f32.mrf.mxu3 }
 0x29b   : > { %v1204_v39 = vsel %vm1191_vm10, %v1156_v38, -inf }
 0x29c   : > { %1205 = vmax.xlane.f32.xlu1 %v1204_v39 }
 0x2a2   : > { %v1158_v33 = vpop.f32.mrf.mxu3 }
 0x2a3   : > { %v1207_v42 = vsel %vm1191_vm10, %v1158_v33, -inf }
 0x2a4   : > { %1208 = vmax.xlane.f32.xlu2 %v1207_v42 }
 0x2ef   : > { %v1194_v34 = vpop.xlane.xlu1 %1193 }
 0x2f0   : > { %v1216_v43 = vsub.f32 %v1096_v59, %v1194_v34 }
 0x2f2   : > { %v1224_v44 = vmul.f32 1.442695, %v1216_v43 }
 0x2f4   : > { %3804 = vpow2.f32 %v1224_v44 }
 0x2f7   : > { %v1197_v46 = vpop.xlane.xlu2 %1196 }
 0x2f8   : > { %v1217_v47 = vsub.f32 %v1098_v15, %v1197_v46 }
 0x2fa   : > { %v1226_v52 = vmul.f32 1.442695, %v1217_v47  ;;  %v3805_v56 = vpop.eup %3804 }
 0x2fb   : > { %v1240_v61 = vsel %vm1191_vm10, %v3805_v56, 0.0 }
 0x2fc   : > { %3806 = vpow2.f32 %v1226_v52 }
 0x2ff   : > { %v1200_v55 = vpop.xlane.xlu0 %1199 }
 0x300   : > { %v1218_v58 = vsub.f32 %v1126_v31, %v1200_v55 }
 0x302   : > { %v1228_v63 = vmul.f32 1.442695, %v1218_v58  ;;  %v3807_v0 = vpop.eup %3806 }
 0x303   : > { %v1243_v3 = vsel %vm1191_vm10, %v3807_v0, 0.0 }
 0x304   : > { %v1186_v50 = vpop.f32.mrf.mxu3 }
 0x305   : > { %v1210_v51 = vsel %vm1191_vm10, %v1186_v50, -inf }
 0x306   : > { %1211 = vmax.xlane.f32.xlu2 %v1210_v51 }
 0x307   : > { %v1203_v53 = vpop.xlane.xlu1 %1202 }
 0x308   : > { %v1219_v54 = vsub.f32 %v1128_v35, %v1203_v53 }
 0x30a   : > { %v1230_v57 = vmul.f32 1.442695, %v1219_v54 }
 0x30c   : > { %3808 = vpow2.f32 %v1230_v57  ;;  %v1188_v60 = vpop.f32.mrf.mxu3 }
 0x30d   : > { %v1213_v62 = vsel %vm1191_vm10, %v1188_v60, -inf  ;;  %3810 = vpow2.f32 %v1228_v63 }
 0x30e   : > { %1241 = vadd.xlane.f32.xlu2 %v1240_v61  ;;  %1214 = vmax.xlane.f32.xlu0 %v1213_v62 }
 0x30f   : > { %v1206_v41 = vpop.xlane.xlu1 %1205 }
 0x310   : > { %v1220_v6 = vsub.f32 %v1156_v38, %v1206_v41 }
 0x312   : > { %v4684_v1 = vpop.eup %3808  ;;  %v1232_v9 = vmul.f32 1.442695, %v1220_v6 }
 0x313   : > { %v1249_v2 = vsel %vm1191_vm10, %v4684_v1, 0.0  ;;  %v3811_v4 = vpop.eup %3810 }
 0x314   : > { %1250 = vadd.xlane.f32.xlu1 %v1249_v2  ;;  %v1246_v5 = vsel %vm1191_vm10, %v3811_v4, 0.0  ;;  %3812 = vpow2.f32 %v1232_v9 }
 0x316   : > { %1244 = vadd.xlane.f32.xlu0 %v1243_v3 }
 0x317   : > { %v1209_v49 = vpop.xlane.xlu2 %1208 }
 0x318   : > { %v1221_v48 = vsub.f32 %v1158_v33, %v1209_v49 }
 0x31a   : > { %v1234_v11 = vmul.f32 1.442695, %v1221_v48  ;;  %v4698_v12 = vpop.eup %3812 }
 0x31b   : > { %v1252_v25 = vsel %vm1191_vm10, %v4698_v12, 0.0 }
 0x31c   : > { %3814 = vpow2.f32 %v1234_v11 }
 0x31e   : > { %1247 = vadd.xlane.f32.xlu0 %v1246_v5 }
 0x322   : > { %v4702_v14 = vpop.eup %3814 }
 0x323   : > { %v1255_v59 = vsel %vm1191_vm10, %v4702_v14, 0.0 }
 0x326   : > { %1408 = vrot.lane.b32.xlu2 %v4631_v21, %s4257_s1 }
 0x32d   : > { %1410 = vrot.lane.b32.xlu1 %v4625_v8, %s4257_s1 }
 0x32e   : > { %1432 = vrot.lane.b32.xlu2 %v4639_v36, %s4257_s1 }
 0x332   : > { %1434 = vrot.lane.b32.xlu0 %v4633_v23, %s4257_s1 }
 0x357   : > { %1253 = vadd.xlane.f32.xlu1 %v1252_v25 }
 0x35c   : > { %1256 = vadd.xlane.f32.xlu0 %v1255_v59 }
 0x370   : > { %1458 = vrot.lane.b32.xlu0 %v4643_v45, %s4257_s1 }
 0x378   : > { %1480 = vrot.lane.b32.xlu0 %v4668_v27, %s4257_s1 }
 0x379   : > { %v1212_v16 = vpop.xlane.xlu2 %1211 }
 0x37a   : > { %v1222_v18 = vsub.f32 %v1186_v50, %v1212_v16 }
 0x37c   : > { %v1236_v19 = vmul.f32 1.442695, %v1222_v18 }
 0x37e   : > { %3816 = vpow2.f32 %v1236_v19 }
 0x381   : > { %v1242_v20 = vpop.xlane.xlu2 %1241  ;;  %v1215_v28 = vpop.xlane.xlu0 %1214 }
 0x382   : > { %v1223_v24 = vsub.f32 %v1188_v60, %v1215_v28  ;;  %3818 = vrcp.f32 %v1242_v20 }
 0x384   : > { %v4710_v22 = vpop.eup %3816  ;;  %v1238_v15 = vmul.f32 1.442695, %v1223_v24 }
 0x385   : > { %v1258_v30 = vsel %vm1191_vm10, %v4710_v22, 0.0 }
 0x386   : > { %3820 = vpow2.f32 %v1238_v15  ;;  %1259 = vadd.xlane.f32.xlu2 %v1258_v30 }
 0x387   : > { %v1251_v42 = vpop.xlane.xlu1 %1250 }
 0x388   : > { %v3819_v32 = vpop.eup %3818 }
 0x389   : > { %v1245_v31 = vpop.xlane.xlu0 %1244  ;;  %v1272_v37 = vmul.f32 %v3819_v32, %v3805_v56 }
 0x38a   : > { %3822 = vrcp.f32 %v1245_v31 }
 0x38b   : > { %v1280_v33 = vpack.c.bf16 %v1272_v37, %v1272_v37 }
 0x38c   : > { %v4714_v35 = vpop.eup %3820 }
 0x38d   : > { %v1261_v38 = vsel %vm1191_vm10, %v4714_v35, 0.0  ;;  %v1290_v46 = vunpack.c.l.b16 %v1280_v33 }
 0x38e   : > { %1262 = vadd.xlane.f32.xlu1 %v1261_v38 }
 0x390   : > { %v3823_v39 = vpop.eup %3822 }
 0x391   : > { %v1273_v34 = vmul.f32 %v3823_v39, %v3807_v0  ;;  %v1248_v43 = vpop.xlane.xlu0 %1247  ;;  %v1409_v0 = vpop.permute.xlu2 %1408 }
 0x392   : > { %3824 = vrcp.f32 %v1248_v43 }
 0x393   : > { %v1281_v44 = vpack.c.bf16 %v1273_v34, %v1273_v34  ;;  %3826 = vrcp.f32 %v1251_v42 }
 0x395   : > { %v1291_v47 = vunpack.c.l.b16 %v1281_v44 }
 0x397   : > { %v1292_v50 = vpack.c.b16 %v1291_v47, %v1290_v46 }
 0x398   : > { %v3825_v51 = vpop.eup %3824 }
 0x399   : > { %3394 = vmatmul.msk.bf16.vlgmr.msrb.gmra.mxu3 %vm1191_vm10, %v1292_v50  ;;  %v3827_v52 = vpop.eup %3826  ;;  %v1274_v53 = vmul.f32 %v3825_v51, %v3811_v4 }
 0x39a   : > { %v1275_v54 = vmul.f32 %v3827_v52, %v4684_v1  ;;  %v1433_v1 = vpop.permute.xlu2 %1432 }
 0x39b   : > { %v1282_v55 = vpack.c.bf16 %v1274_v53, %v1274_v53 }
 0x39c   : > { %v1283_v58 = vpack.c.bf16 %v1275_v54, %v1275_v54 }
 0x39d   : > { %v1318_v60 = vunpack.c.l.b16 %v1282_v55 }
 0x39e   : > { %1456 = vrot.lane.b32.xlu2 %v4649_v40, %s4257_s1  ;;  %v1319_v62 = vunpack.c.l.b16 %v1283_v58 }
 0x39f   : > { %v1411_v56 = vpop.permute.xlu1 %1410 }
 0x3a0   : > { %v1416_v57 = vsel %vm1080_vm9, %v1411_v56, 0  ;;  %v1320_v2 = vpack.c.b16 %v1319_v62, %v1318_v60 }
 0x3a1   : > { %1425 = vmatpush.bf16.xpose.msrb.mxu2 %v1416_v57 }
 0x3a4   : > { %v1435_v61 = vpop.permute.xlu0 %1434 }
 0x3a5   : > { %v1440_v63 = vsel %vm1080_vm9, %v1435_v61, 0 }
 0x3a6   : > { %1449 = vmatpush.bf16.xpose.msrb.mxu3 %v1440_v63 }
 0x3a7   : > { %1482 = vrot.lane.b32.xlu1 %v4656_v7, %s4257_s1 }
 0x3a8   : > { %3398 = vmatmul.msk.bf16.vlgmr.msrb.gmra.mxu2 %vm1080_vm9, %v1409_v0 }
 0x3a9   : > { %3395 = vmatmul.msk.bf16.vlgmr.msra.gmra.mxu3 %vm1191_vm10, %v1320_v2 }
 0x3af   : > { %1605 = vrot.lane.b32.xlu1 %v4658_v10, %s4257_s1 }
 0x3b9   : > { %3399 = vmatmul.msk.bf16.vlgmr.msrb.gmra.mxu3 %vm1080_vm9, %v1433_v1 }
 0x3ca   : > { %v1254_v3 = vpop.xlane.xlu1 %1253 }
 0x3cb   : > { %3828 = vrcp.f32 %v1254_v3 }
 0x3cf   : > { %v1257_v4 = vpop.xlane.xlu0 %1256 }
 0x3d0   : > { %3830 = vrcp.f32 %v1257_v4 }
 0x3d1   : > { %v3829_v5 = vpop.eup %3828 }
 0x3d2   : > { %v1276_v41 = vmul.f32 %v3829_v5, %v4698_v12 }
 0x3d4   : > { %v1284_v49 = vpack.c.bf16 %v1276_v41, %v1276_v41 }
 0x3d6   : > { %v3831_v6 = vpop.eup %3830  ;;  %v1346_v11 = vunpack.c.l.b16 %v1284_v49 }
 0x3d7   : > { %v1277_v9 = vmul.f32 %v3831_v6, %v4702_v14 }
 0x3d9   : > { %v1285_v48 = vpack.c.bf16 %v1277_v9, %v1277_v9 }
 0x3db   : > { %v1347_v25 = vunpack.c.l.b16 %v1285_v48 }
 0x3dd   : > { %v1348_v59 = vpack.c.b16 %v1347_v25, %v1346_v11 }
 0x3df   : > { %3396 = vmatmul.msk.bf16.vlgmr.msra.gmra.mxu0 %vm1191_vm10, %v1348_v59 }
 0x3e2   : > { %v1459_v16 = vpop.permute.xlu0 %1458 }
 0x3e3   : > { %v1464_v18 = vsel %vm1080_vm9, %v1459_v16, 0 }
 0x3e4   : > { %1473 = vmatpush.bf16.xpose.msrb.mxu0 %v1464_v18 }
 0x3ea   : > { %v1481_v34 = vpop.permute.xlu0 %1480 }
 0x3f9   : > { %v1260_v19 = vpop.xlane.xlu2 %1259 }
 0x3fa   : > { %3832 = vrcp.f32 %v1260_v19 }
 0x400   : > { %v3833_v24 = vpop.eup %3832 }
 0x401   : > { %v1457_v20 = vpop.permute.xlu2 %1456  ;;  %v1263_v28 = vpop.xlane.xlu1 %1262  ;;  %v1278_v12 = vmul.f32 %v3833_v24, %v4710_v22 }
 0x402   : > { %3834 = vrcp.f32 %v1263_v28  ;;  %3400 = vmatmul.msk.bf16.vlgmr.msrb.gmra.mxu0 %vm1080_vm9, %v1457_v20 }
 0x403   : > { %v1286_v15 = vpack.c.bf16 %v1278_v12, %v1278_v12 }
 0x405   : > { %v1374_v32 = vunpack.c.l.b16 %v1286_v15 }
 0x408   : > { %v3835_v14 = vpop.eup %3834 }
 0x409   : > { %v1279_v30 = vmul.f32 %v3835_v14, %v4714_v35 }
 0x40b   : > { %v1287_v31 = vpack.c.bf16 %v1279_v30, %v1279_v30 }
 0x40d   : > { %v1375_v37 = vunpack.c.l.b16 %v1287_v31 }
 0x40f   : > { %v1376_v38 = vpack.c.b16 %v1375_v37, %v1374_v32 }
 0x411   : > { %3397 = vmatmul.msk.bf16.vlgmr.msrb.gmra.mxu1 %vm1191_vm10, %v1376_v38 }
 0x419   : > { %v1483_v39 = vpop.permute.xlu1 %1482 }
 0x41a   : > { %v1488_v33 = vsel %vm1080_vm9, %v1483_v39, 0 }
 0x41b   : > { %1497 = vmatpush.bf16.xpose.msra.mxu1 %v1488_v33 }
 0x41c   : > { %v4740_v42 = vpop.f32.mrf.mxu3 }
 0x421   : > { %v1606_v43 = vpop.permute.xlu1 %1605 }
 0x422   : > { %3401 = vmatmul.msk.bf16.vlgmr.msra.gmra.mxu1 %vm1080_vm9, %v1481_v34  ;;  %1618 = vmatpush.bf16.msra.mxu2 %v1606_v43 }
 0x424   : > { %v4743_v22 = vpop.f32.mrf.mxu3 }
 0x42b   : > { %v1427_v35 = vpop.f32.mrf.mxu2 }
 0x42c   : > { %v4745_v44 = vpop.f32.mrf.mxu3  ;;  %v1504_v46 = vsel %vm1191_vm10, %v1427_v35, -inf }
 0x42d   : > { %1505 = vmax.xlane.f32.xlu2 %v1504_v46 }
 0x433   : > { %v1429_v47 = vpop.f32.mrf.mxu2 }
 0x434   : > { %v4748_v50 = vpop.f32.mrf.mxu3  ;;  %v1507_v51 = vsel %vm1191_vm10, %v1429_v47, -inf }
 0x435   : > { %1508 = vmax.xlane.f32.xlu0 %v1507_v51 }
 0x43c   : > { %v1451_v52 = vpop.f32.mrf.mxu3 }
 0x43d   : > { %v1510_v53 = vsel %vm1191_vm10, %v1451_v52, -inf }
 0x43e   : > { %1511 = vmax.xlane.f32.xlu1 %v1510_v53 }
 0x444   : > { %v1453_v19 = vpop.f32.mrf.mxu3 }
 0x445   : > { %v1513_v28 = vsel %vm1191_vm10, %v1453_v19, -inf }
 0x457   : > { %1708 = vrot.lane.b32.xlu1 %v4631_v21, %s4258_s21 }
 0x45c   : > { %v1367_v54 = vpop.f32.mrf.mxu0 }
 0x45d   : > { %v1404_v55 = vpack.c.bf16 %v1367_v54, %v1367_v54 }
 0x45f   : > { %1734 = vrot.lane.b32.xlu1 %v4633_v23, %s4258_s21  ;;  %v4756_v58 = vunpack.c.l.b16 %v1404_v55 }
 0x464   : > { %v1369_v56 = vpop.f32.mrf.mxu0 }
 0x465   : > { %v1405_v57 = vpack.c.bf16 %v1369_v56, %v1369_v56 }
 0x467   : > { %v4758_v60 = vunpack.c.l.b16 %v1405_v57  ;;  %1732 = vrot.lane.b32.xlu1 %v4639_v36, %s4258_s21 }
 0x469   : > { %v2326_v61 = vpack.c.b16 %v4758_v60, %v4756_v58 }
 0x47f   : > { %v4764_v62 = vpop.f32.mrf.mxu0 }
 0x480   : > { %v1516_v31 = vsel %vm1191_vm10, %v4764_v62, -inf }
 0x487   : > { %v4766_v63 = vpop.f32.mrf.mxu0 }
 0x488   : > { %v1519_v2 = vsel %vm1191_vm10, %v4766_v63, -inf }
 0x48e   : > { %v1395_v0 = vpop.f32.mrf.mxu1 }
 0x48f   : > { %v1406_v1 = vpack.c.bf16 %v1395_v0, %v1395_v0 }
 0x491   : > { %1520 = vmax.xlane.f32.xlu1 %v1519_v2  ;;  %v4770_v5 = vunpack.c.l.b16 %v1406_v1 }
 0x496   : > { %v1397_v3 = vpop.f32.mrf.mxu1 }
 0x497   : > { %v1407_v4 = vpack.c.bf16 %v1397_v3, %v1397_v3 }
 0x499   : > { %v4772_v41 = vunpack.c.l.b16 %v1407_v4 }
 0x49b   : > { %v2327_v6 = vpack.c.b16 %v4772_v41, %v4770_v5 }
 0x49f   : > { %v4785_v15 = vpop.f32.mrf.mxu1 }
 0x4a0   : > { %v1506_v49 = vpop.xlane.xlu2 %1505  ;;  %v1522_v32 = vsel %vm1191_vm10, %v4785_v15, -inf }
 0x4a1   : > { %v1528_v9 = vsub.f32 %v1427_v35, %v1506_v49 }
 0x4a3   : > { %v1536_v48 = vmul.f32 1.442695, %v1528_v9 }
 0x4a5   : > { %3836 = vpow2.f32 %v1536_v48 }
 0x4a7   : > { %v1501_v37 = vpop.f32.mrf.mxu1 }
 0x4a8   : > { %v1509_v11 = vpop.xlane.xlu0 %1508  ;;  %v1525_v33 = vsel %vm1191_vm10, %v1501_v37, -inf }
 0x4a9   : > { %v1529_v25 = vsub.f32 %v1429_v47, %v1509_v11 }
 0x4aa   : > { %1655 = vrot.lane.b32.xlu1 %v4647_v17, %s4257_s1 }
 0x4ab   : > { %v3837_v59 = vpop.eup %3836  ;;  %v1538_v16 = vmul.f32 1.442695, %v1529_v25 }
 0x4ac   : > { %v1552_v18 = vsel %vm1191_vm10, %v3837_v59, 0.0 }
 0x4ad   : > { %3838 = vpow2.f32 %v1538_v16  ;;  %1553 = vadd.xlane.f32.xlu2 %v1552_v18 }
 0x4b1   : > { %v1512_v12 = vpop.xlane.xlu1 %1511 }
 0x4b2   : > { %v1530_v14 = vsub.f32 %v1451_v52, %v1512_v12 }
 0x4b3   : > { %v3839_v20 = vpop.eup %3838 }
 0x4b4   : > { %v1555_v24 = vsel %vm1191_vm10, %v3839_v20, 0.0  ;;  %v1540_v30 = vmul.f32 1.442695, %v1530_v14 }
 0x4b5   : > { %1514 = vmax.xlane.f32.xlu2 %v1513_v28  ;;  %1556 = vadd.xlane.f32.xlu0 %v1555_v24 }
 0x4b6   : > { %3840 = vpow2.f32 %v1540_v30 }
 0x4bc   : > { %v4791_v39 = vpop.eup %3840 }
 0x4bd   : > { %v1558_v34 = vsel %vm1191_vm10, %v4791_v39, 0.0 }
 0x4c9   : > { %1630 = vrot.lane.b32.xlu0 %v4670_v29, %s4257_s1  ;;  %v1709_v38 = vpop.permute.xlu1 %1708 }
 0x4cd   : > { %1710 = vrot.lane.b32.xlu2 %v4625_v8, %s4258_s21 }
 0x4d1   : > { %v1735_v43 = vpop.permute.xlu1 %1734 }
 0x4d9   : > { %v4796_v35 = vpop.permute.xlu1 %1732 }
 0x4f3   : > { %1517 = vmax.xlane.f32.xlu0 %v1516_v31 }
 0x4f6   : > { %1523 = vmax.xlane.f32.xlu2 %v1522_v32 }
 0x4fb   : > { %1526 = vmax.xlane.f32.xlu0 %v1525_v33 }
 0x4fe   : > { %1559 = vadd.xlane.f32.xlu2 %v1558_v34 }
 0x504   : > { %v1521_v46 = vpop.xlane.xlu1 %1520 }
 0x505   : > { %v1533_v0 = vsub.f32 %v4766_v63, %v1521_v46 }
 0x507   : > { %v1546_v49 = vmul.f32 1.442695, %v1533_v0 }
 0x516   : > { %1758 = vrot.lane.b32.xlu2 %v4643_v45, %s4258_s21 }
 0x51c   : > { %v1656_v47 = vpop.permute.xlu1 %1655 }
 0x51d   : > { %1668 = vmatpush.bf16.msra.mxu0 %v1656_v47 }
 0x520   : > { %v1554_v51 = vpop.xlane.xlu2 %1553 }
 0x521   : > { %3842 = vrcp.f32 %v1554_v51 }
 0x527   : > { %v3843_v54 = vpop.eup %3842 }
 0x528   : > { %v1515_v52 = vpop.xlane.xlu2 %1514  ;;  %v1557_v53 = vpop.xlane.xlu0 %1556  ;;  %v1584_v57 = vmul.f32 %v3843_v54, %v3837_v59 }
 0x529   : > { %v1531_v55 = vsub.f32 %v1453_v19, %v1515_v52  ;;  %3844 = vrcp.f32 %v1557_v53 }
 0x52a   : > { %v1592_v1 = vpack.c.bf16 %v1584_v57, %v1584_v57 }
 0x52b   : > { %v1542_v56 = vmul.f32 1.442695, %v1531_v55 }
 0x52c   : > { %v1602_v25 = vunpack.c.l.b16 %v1592_v1 }
 0x52d   : > { %3846 = vpow2.f32 %v1542_v56 }
 0x52e   : > { %3848 = vpow2.f32 %v1546_v49 }
 0x52f   : > { %v3845_v2 = vpop.eup %3844 }
 0x530   : > { %v1585_v3 = vmul.f32 %v3845_v2, %v3839_v20  ;;  %v1711_v4 = vpop.permute.xlu2 %1710  ;;  %v1740_v20 = vsel %vm1080_vm9, %v1735_v43, 0 }
 0x531   : > { %v1716_v9 = vsel %vm1080_vm9, %v1711_v4, 0 }
 0x532   : > { %v1593_v48 = vpack.c.bf16 %v1585_v3, %v1585_v3  ;;  %1725 = vmatpush.bf16.xpose.msrb.mxu2 %v1716_v9 }
 0x533   : > { %v3847_v11 = vpop.eup %3846 }
 0x534   : > { %v1603_v16 = vunpack.c.l.b16 %v1593_v48  ;;  %v1561_v18 = vsel %vm1191_vm10, %v3847_v11, 0.0  ;;  %v4804_v63 = vpop.eup %3848 }
 0x535   : > { %1562 = vadd.xlane.f32.xlu0 %v1561_v18  ;;  %v1567_v28 = vsel %vm1191_vm10, %v4804_v63, 0.0 }
 0x536   : > { %v1604_v59 = vpack.c.b16 %v1603_v16, %v1602_v25 }
 0x538   : > { %3402 = vmatmul.msk.bf16.vlgmr.msra.gmra.mxu2 %vm1191_vm10, %v1604_v59 }
 0x53b   : > { %v1631_v19 = vpop.permute.xlu0 %1630 }
 0x53c   : > { %1643 = vmatpush.bf16.msra.mxu3 %v1631_v19 }
 0x53f   : > { %1568 = vadd.xlane.f32.xlu2 %v1567_v28 }
 0x540   : > { %1749 = vmatpush.bf16.xpose.msrb.mxu3 %v1740_v20 }
 0x548   : > { %3406 = vmatmul.msk.bf16.vlgmr.msrb.gmra.mxu2 %vm1080_vm9, %v1709_v38 }
 0x549   : > { %1680 = vrot.lane.b32.xlu0 %v4666_v26, %s4257_s1 }
 0x557   : > { %1782 = vrot.lane.b32.xlu2 %v4656_v7, %s4258_s21 }
 0x566   : > { %v1518_v24 = vpop.xlane.xlu0 %1517 }
 0x567   : > { %v1532_v12 = vsub.f32 %v4764_v62, %v1518_v24 }
 0x569   : > { %v1544_v14 = vmul.f32 1.442695, %v1532_v12  ;;  %v1524_v30 = vpop.xlane.xlu2 %1523 }
 0x56a   : > { %v1534_v31 = vsub.f32 %v4785_v15, %v1524_v30 }
 0x56b   : > { %3850 = vpow2.f32 %v1544_v14 }
 0x56c   : > { %v1548_v32 = vmul.f32 1.442695, %v1534_v31 }
 0x56e   : > { %3852 = vpow2.f32 %v1548_v32  ;;  %v1527_v33 = vpop.xlane.xlu0 %1526 }
 0x56f   : > { %v1535_v34 = vsub.f32 %v1501_v37, %v1527_v33 }
 0x571   : > { %v3851_v43 = vpop.eup %3850  ;;  %v1550_v38 = vmul.f32 1.442695, %v1535_v34  ;;  %v1560_v46 = vpop.xlane.xlu2 %1559 }
 0x572   : > { %v1564_v47 = vsel %vm1191_vm10, %v3851_v43, 0.0 }
 0x573   : > { %3854 = vpow2.f32 %v1550_v38  ;;  %1565 = vadd.xlane.f32.xlu0 %v1564_v47 }
 0x574   : > { %v4817_v51 = vpop.eup %3852  ;;  %3856 = vrcp.f32 %v1560_v46 }
 0x575   : > { %v1570_v62 = vsel %vm1191_vm10, %v4817_v51, 0.0 }
 0x576   : > { %1571 = vadd.xlane.f32.xlu1 %v1570_v62 }
 0x579   : > { %v4821_v52 = vpop.eup %3854  ;;  %v1759_v15 = vpop.permute.xlu2 %1758 }
 0x57a   : > { %v1764_v53 = vsel %vm1080_vm9, %v1759_v15, 0  ;;  %v1573_v37 = vsel %vm1191_vm10, %v4821_v52, 0.0  ;;  %v3857_v55 = vpop.eup %3856 }
 0x57b   : > { %1773 = vmatpush.bf16.xpose.msrb.mxu0 %v1764_v53  ;;  %1574 = vadd.xlane.f32.xlu0 %v1573_v37  ;;  %v1586_v56 = vmul.f32 %v3857_v55, %v4791_v39 }
 0x57d   : > { %v1594_v0 = vpack.c.bf16 %v1586_v56, %v1586_v56 }
 0x57f   : > { %v1627_v4 = vunpack.c.l.b16 %v1594_v0 }
 0x58f   : > { %1756 = vrot.lane.b32.xlu1 %v4649_v40, %s4258_s21  ;;  %1780 = vrot.lane.b32.xlu0 %v4668_v27, %s4258_s21 }
 0x597   : > { %2010 = vrot.lane.b32.xlu1 %v4625_v8, %s4259_s3 }
 0x5a8   : > { %v1563_v54 = vpop.xlane.xlu0 %1562 }
 0x5a9   : > { %3858 = vrcp.f32 %v1563_v54 }
 0x5af   : > { %v3859_v57 = vpop.eup %3858 }
 0x5b0   : > { %v1587_v2 = vmul.f32 %v3859_v57, %v3847_v11 }
 0x5b2   : > { %v1595_v1 = vpack.c.bf16 %v1587_v2, %v1587_v2  ;;  %v1569_v3 = vpop.xlane.xlu2 %1568 }
 0x5b3   : > { %3860 = vrcp.f32 %v1569_v3 }
 0x5b4   : > { %v1628_v49 = vunpack.c.l.b16 %v1595_v1 }
 0x5b6   : > { %v1629_v9 = vpack.c.b16 %v1628_v49, %v1627_v4 }
 0x5b8   : > { %3403 = vmatmul.msk.bf16.vlgmr.msra.gmra.mxu3 %vm1191_vm10, %v1629_v9 }
 0x5b9   : > { %v3861_v31 = vpop.eup %3860 }
 0x5ba   : > { %v1783_v48 = vpop.permute.xlu2 %1782  ;;  %v1589_v33 = vmul.f32 %v3861_v31, %v4804_v63 }
 0x5bb   : > { %v1788_v25 = vsel %vm1080_vm9, %v1783_v48, 0  ;;  %v1620_v8 = vpop.f32.mrf.mxu2  ;;  %v1681_v16 = vpop.permute.xlu0 %1680 }
 0x5bc   : > { %1693 = vmatpush.bf16.msrb.mxu1 %v1681_v16  ;;  %v1700_v18 = vpack.c.bf16 %v1620_v8, %v1620_v8  ;;  %v1597_v34 = vpack.c.bf16 %v1589_v33, %v1589_v33 }
 0x5be   : > { %v4835_v19 = vunpack.c.l.b16 %v1700_v18  ;;  %v1653_v15 = vunpack.c.l.b16 %v1597_v34 }
 0x5c0   : > { %1797 = vmatpush.bf16.xpose.msra.mxu1 %v1788_v25 }
 0x5c3   : > { %v1622_v59 = vpop.f32.mrf.mxu2 }
 0x5c4   : > { %v1701_v39 = vpack.c.bf16 %v1622_v59, %v1622_v59 }
 0x5c6   : > { %v4837_v11 = vunpack.c.l.b16 %v1701_v39 }
 0x5c8   : > { %v2344_v20 = vpack.c.b16 %v4837_v11, %v4835_v19  ;;  %3407 = vmatmul.msk.bf16.vlgmr.msrb.gmra.mxu3 %vm1080_vm9, %v4796_v35 }
 0x5cb   : > { %v1727_v28 = vpop.f32.mrf.mxu2 }
 0x5cc   : > { %v1804_v24 = vsel %vm1191_vm10, %v1727_v28, -inf }
 0x5cd   : > { %1805 = vmax.xlane.f32.xlu2 %v1804_v24 }
 0x5d3   : > { %v1729_v12 = vpop.f32.mrf.mxu2 }
 0x5d4   : > { %v1807_v14 = vsel %vm1191_vm10, %v1729_v12, -inf }
 0x5d5   : > { %1808 = vmax.xlane.f32.xlu0 %v1807_v14 }
 0x5e6   : > { %v1566_v30 = vpop.xlane.xlu0 %1565 }
 0x5e7   : > { %3862 = vrcp.f32 %v1566_v30 }
 0x5e9   : > { %v1572_v32 = vpop.xlane.xlu1 %1571  ;;  %1905 = vrot.lane.b32.xlu0 %v4658_v10, %s4258_s21 }
 0x5ea   : > { %3864 = vrcp.f32 %v1572_v32 }
 0x5ed   : > { %v3863_v35 = vpop.eup %3862 }
 0x5ee   : > { %v1588_v38 = vmul.f32 %v3863_v35, %v3851_v43  ;;  %v1575_v46 = vpop.xlane.xlu0 %1574 }
 0x5ef   : > { %3866 = vrcp.f32 %v1575_v46 }
 0x5f0   : > { %v3865_v47 = vpop.eup %3864  ;;  %v1596_v62 = vpack.c.bf16 %v1588_v38, %v1588_v38 }
 0x5f1   : > { %v1590_v37 = vmul.f32 %v3865_v47, %v4817_v51 }
 0x5f2   : > { %v1652_v53 = vunpack.c.l.b16 %v1596_v62 }
 0x5f3   : > { %v1598_v56 = vpack.c.bf16 %v1590_v37, %v1590_v37 }
 0x5f4   : > { %v1654_v54 = vpack.c.b16 %v1653_v15, %v1652_v53 }
 0x5f5   : > { %v3867_v55 = vpop.eup %3866  ;;  %v1677_v0 = vunpack.c.l.b16 %v1598_v56 }
 0x5f6   : > { %v1591_v57 = vmul.f32 %v3867_v55, %v4821_v52  ;;  %3404 = vmatmul.msk.bf16.vlgmr.msra.gmra.mxu0 %vm1191_vm10, %v1654_v54 }
 0x5f8   : > { %v1599_v63 = vpack.c.bf16 %v1591_v57, %v1591_v57 }
 0x5fa   : > { %v1678_v2 = vunpack.c.l.b16 %v1599_v63 }
 0x5fc   : > { %v1679_v1 = vpack.c.b16 %v1678_v2, %v1677_v0 }
 0x5fe   : > { %3405 = vmatmul.msk.bf16.vlgmr.msrb.gmra.mxu1 %vm1191_vm10, %v1679_v1 }
 0x601   : > { %v1757_v43 = vpop.permute.xlu1 %1756  ;;  %v1781_v3 = vpop.permute.xlu0 %1780 }
 0x606   : > { %3408 = vmatmul.msk.bf16.vlgmr.msrb.gmra.mxu0 %vm1080_vm9, %v1757_v43 }
 0x60e   : > { %3409 = vmatmul.msk.bf16.vlgmr.msra.gmra.mxu1 %vm1080_vm9, %v1781_v3 }
 0x63b   : > { %v1645_v51 = vpop.f32.mrf.mxu3 }
 0x63c   : > { %v1702_v9 = vpack.c.bf16 %v1645_v51, %v1645_v51 }
 0x63e   : > { %v4854_v8 = vunpack.c.l.b16 %v1702_v9 }
 0x640   : > { %v1806_v4 = vpop.xlane.xlu2 %1805 }
 0x641   : > { %v1828_v49 = vsub.f32 %v1727_v28, %v1806_v4 }
 0x643   : > { %v1836_v48 = vmul.f32 1.442695, %v1828_v49  ;;  %v1647_v52 = vpop.f32.mrf.mxu3 }
 0x644   : > { %v1703_v25 = vpack.c.bf16 %v1647_v52, %v1647_v52 }
 0x645   : > { %3868 = vpow2.f32 %v1836_v48 }
 0x646   : > { %v4856_v16 = vunpack.c.l.b16 %v1703_v25 }
 0x648   : > { %v2345_v18 = vpack.c.b16 %v4856_v16, %v4854_v8  ;;  %v1809_v59 = vpop.xlane.xlu0 %1808 }
 0x649   : > { %v1829_v39 = vsub.f32 %v1729_v12, %v1809_v59  ;;  %v2011_v12 = vpop.permute.xlu1 %2010 }
 0x64a   : > { %v2016_v46 = vsel %vm1080_vm9, %v2011_v12, 0 }
 0x64b   : > { %v4860_v24 = vpop.eup %3868  ;;  %v1838_v14 = vmul.f32 1.442695, %v1829_v39  ;;  %v1751_v30 = vpop.f32.mrf.mxu3 }
 0x64c   : > { %v1852_v28 = vsel %vm1191_vm10, %v4860_v24, 0.0  ;;  %v1810_v31 = vsel %vm1191_vm10, %v1751_v30, -inf }
 0x64d   : > { %3870 = vpow2.f32 %v1838_v14  ;;  %1853 = vadd.xlane.f32.xlu2 %v1852_v28  ;;  %1811 = vmax.xlane.f32.xlu1 %v1810_v31 }
 0x653   : > { %v3871_v32 = vpop.eup %3870  ;;  %v1753_v33 = vpop.f32.mrf.mxu3 }
 0x654   : > { %v1813_v35 = vsel %vm1191_vm10, %v1753_v33, -inf  ;;  %v1855_v34 = vsel %vm1191_vm10, %v3871_v32, 0.0 }
 0x655   : > { %1814 = vmax.xlane.f32.xlu2 %v1813_v35  ;;  %1856 = vadd.xlane.f32.xlu0 %v1855_v34 }
 0x65b   : > { %v1906_v38 = vpop.permute.xlu0 %1905 }
 0x65c   : > { %1918 = vmatpush.bf16.msra.mxu2 %v1906_v38 }
 0x660   : > { %2025 = vmatpush.bf16.xpose.msrb.mxu2 %v2016_v46 }
 0x666   : > { %2032 = vrot.lane.b32.xlu1 %v4639_v36, %s4259_s3 }
 0x66d   : > { %1930 = vrot.lane.b32.xlu2 %v4670_v29, %s4258_s21 }
 0x673   : > { %v1670_v47 = vpop.f32.mrf.mxu0 }
 0x674   : > { %v1704_v62 = vpack.c.bf16 %v1670_v47, %v1670_v47 }
 0x676   : > { %v4872_v54 = vunpack.c.l.b16 %v1704_v62 }
 0x67b   : > { %v1672_v15 = vpop.f32.mrf.mxu0  ;;  %v1695_v53 = vpop.f32.mrf.mxu1 }
 0x67c   : > { %v1705_v37 = vpack.c.bf16 %v1672_v15, %v1672_v15  ;;  %v1706_v57 = vpack.c.bf16 %v1695_v53, %v1695_v53 }
 0x67e   : > { %v4874_v55 = vunpack.c.l.b16 %v1705_v37  ;;  %v4879_v1 = vunpack.c.l.b16 %v1706_v57 }
 0x680   : > { %v2346_v56 = vpack.c.b16 %v4874_v55, %v4872_v54 }
 0x683   : > { %v1697_v63 = vpop.f32.mrf.mxu1  ;;  %v1775_v0 = vpop.f32.mrf.mxu0 }
 0x684   : > { %v1707_v2 = vpack.c.bf16 %v1697_v63, %v1697_v63  ;;  %v1816_v36 = vsel %vm1191_vm10, %v1775_v0, -inf }
 0x685   : > { %1817 = vmax.xlane.f32.xlu0 %v1816_v36 }
 0x686   : > { %v4881_v43 = vunpack.c.l.b16 %v1707_v2 }
 0x688   : > { %v2347_v3 = vpack.c.b16 %v4881_v43, %v4879_v1  ;;  %v3616_v1 = vld [vmem:[#allocation10 + $0x10] sm:$0xff] }
 0x68b   : > { %v4885_v51 = vpop.f32.mrf.mxu1  ;;  %v1777_v4 = vpop.f32.mrf.mxu0 }
 0x68c   : > { %v1819_v49 = vsel %vm1191_vm10, %v1777_v4, -inf  ;;  %v1822_v52 = vsel %vm1191_vm10, %v4885_v51, -inf }
 0x690   : > { %1820 = vmax.xlane.f32.xlu1 %v1819_v49 }
 0x693   : > { %v1801_v9 = vpop.f32.mrf.mxu1 }
 0x694   : > { %v1825_v48 = vsel %vm1191_vm10, %v1801_v9, -inf }
 0x696   : > { %1826 = vmax.xlane.f32.xlu2 %v1825_v48 }
 0x698   : > { %1823 = vmax.xlane.f32.xlu1 %v1822_v52 }
 0x699   : > { %2008 = vrot.lane.b32.xlu0 %v4631_v21, %s4259_s3 }
 0x6a1   : > { %2034 = vrot.lane.b32.xlu0 %v4633_v23, %s4259_s3 }
 0x6a9   : > { %2058 = vrot.lane.b32.xlu0 %v4643_v45, %s4259_s3 }
 0x6c0   : > { %v1854_v25 = vpop.xlane.xlu2 %1853  ;;  %v1812_v59 = vpop.xlane.xlu1 %1811 }
 0x6c1   : > { %v1830_v39 = vsub.f32 %v1751_v30, %v1812_v59  ;;  %3872 = vrcp.f32 %v1854_v25 }
 0x6c3   : > { %v1840_v14 = vmul.f32 1.442695, %v1830_v39 }
 0x6c5   : > { %3874 = vpow2.f32 %v1840_v14 }
 0x6c7   : > { %v3873_v35 = vpop.eup %3872 }
 0x6c8   : > { %v1815_v28 = vpop.xlane.xlu2 %1814  ;;  %v1857_v31 = vpop.xlane.xlu0 %1856  ;;  %v1884_v38 = vmul.f32 %v3873_v35, %v4860_v24 }
 0x6c9   : > { %v1831_v34 = vsub.f32 %v1753_v33, %v1815_v28  ;;  %3876 = vrcp.f32 %v1857_v31 }
 0x6ca   : > { %v1892_v30 = vpack.c.bf16 %v1884_v38, %v1884_v38 }
 0x6cb   : > { %v4897_v12 = vpop.eup %3874  ;;  %v1842_v21 = vmul.f32 1.442695, %v1831_v34 }
 0x6cc   : > { %v1858_v23 = vsel %vm1191_vm10, %v4897_v12, 0.0  ;;  %v1902_v53 = vunpack.c.l.b16 %v1892_v30 }
 0x6cd   : > { %3878 = vpow2.f32 %v1842_v21  ;;  %1859 = vadd.xlane.f32.xlu1 %v1858_v23 }
 0x6cf   : > { %v3877_v45 = vpop.eup %3876 }
 0x6d0   : > { %v1885_v46 = vmul.f32 %v3877_v45, %v3871_v32  ;;  %v1931_v47 = vpop.permute.xlu2 %1930 }
 0x6d1   : > { %1943 = vmatpush.bf16.msra.mxu3 %v1931_v47 }
 0x6d2   : > { %v1893_v62 = vpack.c.bf16 %v1885_v46, %v1885_v46 }
 0x6d3   : > { %v3879_v15 = vpop.eup %3878 }
 0x6d4   : > { %v1903_v33 = vunpack.c.l.b16 %v1893_v62  ;;  %v1861_v37 = vsel %vm1191_vm10, %v3879_v15, 0.0 }
 0x6d5   : > { %1862 = vadd.xlane.f32.xlu2 %v1861_v37 }
 0x6d6   : > { %v1904_v57 = vpack.c.b16 %v1903_v33, %v1902_v53 }
 0x6d8   : > { %3410 = vmatmul.msk.bf16.vlgmr.msra.gmra.mxu2 %vm1191_vm10, %v1904_v57  ;;  %v2033_v2 = vpop.permute.xlu1 %2032 }
 0x6e6   : > { %1955 = vrot.lane.b32.xlu1 %v4647_v17, %s4258_s21 }
 0x6f8   : > { %v1818_v24 = vpop.xlane.xlu0 %1817 }
 0x6f9   : > { %v1832_v63 = vsub.f32 %v1775_v0, %v1818_v24 }
 0x6fb   : > { %v1844_v36 = vmul.f32 1.442695, %v1832_v63 }
 0x6fd   : > { %3880 = vpow2.f32 %v1844_v36 }
 0x703   : > { %v4906_v32 = vpop.eup %3880  ;;  %v1821_v49 = vpop.xlane.xlu1 %1820 }
 0x704   : > { %v1833_v48 = vsub.f32 %v1777_v4, %v1821_v49  ;;  %v1864_v52 = vsel %vm1191_vm10, %v4906_v32, 0.0 }
 0x705   : > { %1865 = vadd.xlane.f32.xlu0 %v1864_v52 }
 0x706   : > { %v1846_v25 = vmul.f32 1.442695, %v1833_v48 }
 0x708   : > { %3882 = vpow2.f32 %v1846_v25 }
 0x709   : > { %v1827_v59 = vpop.xlane.xlu2 %1826 }
 0x70a   : > { %v1835_v39 = vsub.f32 %v1801_v9, %v1827_v59 }
 0x70b   : > { %v1824_v14 = vpop.xlane.xlu1 %1823  ;;  %v2009_v28 = vpop.permute.xlu0 %2008 }
 0x70c   : > { %v1850_v31 = vmul.f32 1.442695, %v1835_v39  ;;  %v1834_v0 = vsub.f32 %v4885_v51, %v1824_v14  ;;  %3414 = vmatmul.msk.bf16.vlgmr.msrb.gmra.mxu2 %vm1080_vm9, %v2009_v28 }
 0x70e   : > { %v3883_v35 = vpop.eup %3882  ;;  %3884 = vpow2.f32 %v1850_v31  ;;  %v1848_v34 = vmul.f32 1.442695, %v1834_v0 }
 0x70f   : > { %v1867_v4 = vsel %vm1191_vm10, %v3883_v35, 0.0 }
 0x710   : > { %3886 = vpow2.f32 %v1848_v34  ;;  %1868 = vadd.xlane.f32.xlu2 %v1867_v4 }
 0x713   : > { %v2035_v21 = vpop.permute.xlu0 %2034 }
 0x714   : > { %v4913_v38 = vpop.eup %3884  ;;  %v2040_v23 = vsel %vm1080_vm9, %v2035_v21, 0 }
 0x715   : > { %2049 = vmatpush.bf16.xpose.msrb.mxu3 %v2040_v23  ;;  %v1873_v51 = vsel %vm1191_vm10, %v4913_v38, 0.0 }
 0x716   : > { %v3887_v9 = vpop.eup %3886 }
 0x717   : > { %v1870_v45 = vsel %vm1191_vm10, %v3887_v9, 0.0 }
 0x718   : > { %1871 = vadd.xlane.f32.xlu1 %v1870_v45  ;;  %1874 = vadd.xlane.f32.xlu2 %v1873_v51 }
 0x719   : > { %2082 = vrot.lane.b32.xlu0 %v4656_v7, %s4259_s3 }
 0x721   : > { %2080 = vrot.lane.b32.xlu0 %v4668_v27, %s4259_s3  ;;  %v2059_v27 = vpop.permute.xlu0 %2058 }
 0x730   : > { %1980 = vrot.lane.b32.xlu2 %v4666_v26, %s4258_s21 }
 0x731   : > { %2056 = vrot.lane.b32.xlu1 %v4649_v40, %s4259_s3  ;;  %v2064_v40 = vsel %vm1080_vm9, %v2059_v27, 0 }
 0x740   : > { %v1860_v30 = vpop.xlane.xlu1 %1859 }
 0x741   : > { %3888 = vrcp.f32 %v1860_v30 }
 0x747   : > { %v3889_v47 = vpop.eup %3888 }
 0x748   : > { %v1863_v46 = vpop.xlane.xlu2 %1862  ;;  %v1886_v62 = vmul.f32 %v3889_v47, %v4897_v12 }
 0x749   : > { %3890 = vrcp.f32 %v1863_v46 }
 0x74a   : > { %v1894_v33 = vpack.c.bf16 %v1886_v62, %v1886_v62 }
 0x74c   : > { %v1927_v57 = vunpack.c.l.b16 %v1894_v33 }
 0x74f   : > { %v3891_v53 = vpop.eup %3890 }
 0x750   : > { %v1887_v37 = vmul.f32 %v3891_v53, %v3879_v15 }
 0x752   : > { %v1895_v7 = vpack.c.bf16 %v1887_v37, %v1887_v37 }
 0x754   : > { %v1928_v24 = vunpack.c.l.b16 %v1895_v7 }
 0x756   : > { %v1929_v63 = vpack.c.b16 %v1928_v24, %v1927_v57 }
 0x758   : > { %v1956_v36 = vpop.permute.xlu1 %1955  ;;  %3411 = vmatmul.msk.bf16.vlgmr.msra.gmra.mxu3 %vm1191_vm10, %v1929_v63 }
 0x759   : > { %1968 = vmatpush.bf16.msra.mxu0 %v1956_v36 }
 0x75b   : > { %v1920_v49 = vpop.f32.mrf.mxu2 }
 0x75c   : > { %v2000_v48 = vpack.c.bf16 %v1920_v49, %v1920_v49 }
 0x75d   : > { %2073 = vmatpush.bf16.xpose.msrb.mxu0 %v2064_v40 }
 0x75e   : > { %v4930_v12 = vunpack.c.l.b16 %v2000_v48 }
 0x763   : > { %v1922_v52 = vpop.f32.mrf.mxu2 }
 0x764   : > { %v2001_v25 = vpack.c.bf16 %v1922_v52, %v1922_v52 }
 0x766   : > { %v4932_v59 = vunpack.c.l.b16 %v2001_v25 }
 0x768   : > { %v2372_v15 = vpack.c.b16 %v4932_v59, %v4930_v12  ;;  %3415 = vmatmul.msk.bf16.vlgmr.msrb.gmra.mxu3 %vm1080_vm9, %v2033_v2 }
 0x778   : > { %v1866_v39 = vpop.xlane.xlu0 %1865 }
 0x779   : > { %3892 = vrcp.f32 %v1866_v39 }
 0x77f   : > { %v3893_v28 = vpop.eup %3892 }
 0x780   : > { %v1888_v31 = vmul.f32 %v3893_v28, %v4906_v32 }
 0x782   : > { %v1896_v34 = vpack.c.bf16 %v1888_v31, %v1888_v31 }
 0x783   : > { %v1869_v14 = vpop.xlane.xlu2 %1868 }
 0x784   : > { %3894 = vrcp.f32 %v1869_v14  ;;  %v1952_v51 = vunpack.c.l.b16 %v1896_v34 }
 0x78a   : > { %v3895_v0 = vpop.eup %3894 }
 0x78b   : > { %v1889_v4 = vmul.f32 %v3895_v0, %v3883_v35  ;;  %v1872_v21 = vpop.xlane.xlu1 %1871  ;;  %v1875_v23 = vpop.xlane.xlu2 %1874 }
 0x78c   : > { %3896 = vrcp.f32 %v1872_v21  ;;  %v2083_v62 = vpop.permute.xlu0 %2082 }
 0x78d   : > { %v1897_v45 = vpack.c.bf16 %v1889_v4, %v1889_v4  ;;  %3898 = vrcp.f32 %v1875_v23  ;;  %v2088_v7 = vsel %vm1080_vm9, %v2083_v62, 0 }
 0x78f   : > { %v1953_v30 = vunpack.c.l.b16 %v1897_v45  ;;  %v2027_v46 = vpop.f32.mrf.mxu2 }
 0x790   : > { %v2104_v2 = vsel %vm1191_vm10, %v2027_v46, -inf }
 0x791   : > { %v1954_v47 = vpack.c.b16 %v1953_v30, %v1952_v51  ;;  %2105 = vmax.xlane.f32.xlu2 %v2104_v2 }
 0x792   : > { %v3897_v53 = vpop.eup %3896 }
 0x793   : > { %v3899_v33 = vpop.eup %3898  ;;  %v1890_v37 = vmul.f32 %v3897_v53, %v3887_v9  ;;  %v1981_v32 = vpop.permute.xlu2 %1980  ;;  %3412 = vmatmul.msk.bf16.vlgmr.msra.gmra.mxu0 %vm1191_vm10, %v1954_v47 }
 0x794   : > { %v1891_v35 = vmul.f32 %v3899_v33, %v4913_v38  ;;  %1993 = vmatpush.bf16.msrb.mxu1 %v1981_v32  ;;  %v2081_v48 = vpop.permute.xlu0 %2080 }
 0x795   : > { %v1898_v57 = vpack.c.bf16 %v1890_v37, %v1890_v37 }
 0x796   : > { %v1899_v24 = vpack.c.bf16 %v1891_v35, %v1891_v35 }
 0x797   : > { %v1977_v27 = vunpack.c.l.b16 %v1898_v57  ;;  %v2029_v63 = vpop.f32.mrf.mxu2 }
 0x798   : > { %2097 = vmatpush.bf16.xpose.msra.mxu1 %v2088_v7  ;;  %v1978_v36 = vunpack.c.l.b16 %v1899_v24  ;;  %v2107_v40 = vsel %vm1191_vm10, %v2029_v63, -inf }
 0x799   : > { %2108 = vmax.xlane.f32.xlu0 %v2107_v40 }
 0x79a   : > { %v1979_v49 = vpack.c.b16 %v1978_v36, %v1977_v27 }
 0x79c   : > { %3413 = vmatmul.msk.bf16.vlgmr.msrb.gmra.mxu1 %vm1191_vm10, %v1979_v49 }
 0x7a3   : > { %v2057_v9 = vpop.permute.xlu1 %2056 }
 0x7a4   : > { %3416 = vmatmul.msk.bf16.vlgmr.msrb.gmra.mxu0 %vm1080_vm9, %v2057_v9 }
 0x7ac   : > { %3417 = vmatmul.msk.bf16.vlgmr.msra.gmra.mxu1 %vm1080_vm9, %v2081_v48 }
 0x7db   : > { %v1945_v38 = vpop.f32.mrf.mxu3 }
 0x7dc   : > { %v2002_v52 = vpack.c.bf16 %v1945_v38, %v1945_v38 }
 0x7de   : > { %v4946_v14 = vunpack.c.l.b16 %v2002_v52 }
 0x7e3   : > { %v1947_v25 = vpop.f32.mrf.mxu3 }
 0x7e4   : > { %v2003_v39 = vpack.c.bf16 %v1947_v25, %v1947_v25 }
 0x7e6   : > { %v4948_v28 = vunpack.c.l.b16 %v2003_v39 }
 0x7e8   : > { %v2373_v31 = vpack.c.b16 %v4948_v28, %v4946_v14 }
 0x7eb   : > { %v2051_v0 = vpop.f32.mrf.mxu3 }
 0x7ec   : > { %v2110_v34 = vsel %vm1191_vm10, %v2051_v0, -inf }
 0x7ed   : > { %2111 = vmax.xlane.f32.xlu1 %v2110_v34 }
 0x7f3   : > { %v2053_v4 = vpop.f32.mrf.mxu3 }
 0x7f4   : > { %v2113_v21 = vsel %vm1191_vm10, %v2053_v4, -inf }
 0x7f5   : > { %2114 = vmax.xlane.f32.xlu2 %v2113_v21 }
 0x804   : > { %v2106_v23 = vpop.xlane.xlu2 %2105 }
 0x805   : > { %v2128_v45 = vsub.f32 %v2027_v46, %v2106_v23 }
 0x807   : > { %v2136_v51 = vmul.f32 1.442695, %v2128_v45 }
 0x809   : > { %3900 = vpow2.f32 %v2136_v51 }
 0x80c   : > { %v2109_v62 = vpop.xlane.xlu0 %2108 }
 0x80d   : > { %v2129_v37 = vsub.f32 %v2029_v63, %v2109_v62 }
 0x80f   : > { %v4954_v30 = vpop.eup %3900  ;;  %v2138_v46 = vmul.f32 1.442695, %v2129_v37 }
 0x810   : > { %v1970_v2 = vpop.f32.mrf.mxu0  ;;  %v2152_v47 = vsel %vm1191_vm10, %v4954_v30, 0.0 }
 0x811   : > { %2153 = vadd.xlane.f32.xlu1 %v2152_v47  ;;  %v2004_v53 = vpack.c.bf16 %v1970_v2, %v1970_v2  ;;  %3902 = vpow2.f32 %v2138_v46 }
 0x813   : > { %v4958_v7 = vunpack.c.l.b16 %v2004_v53 }
 0x817   : > { %v3903_v52 = vpop.eup %3902 }
 0x818   : > { %v1972_v33 = vpop.f32.mrf.mxu0  ;;  %v2155_v21 = vsel %vm1191_vm10, %v3903_v52, 0.0 }
 0x819   : > { %v2005_v32 = vpack.c.bf16 %v1972_v33, %v1972_v33  ;;  %v1995_v35 = vpop.f32.mrf.mxu1 }
 0x81a   : > { %v2006_v27 = vpack.c.bf16 %v1995_v35, %v1995_v35 }
 0x81b   : > { %v4960_v57 = vunpack.c.l.b16 %v2005_v32 }
 0x81c   : > { %v4965_v48 = vunpack.c.l.b16 %v2006_v27 }
 0x81d   : > { %v2374_v24 = vpack.c.b16 %v4960_v57, %v4958_v7  ;;  %v1402_v7 = vpack.c.bf16 %v4745_v44, %v4745_v44 }
 0x821   : > { %v1997_v36 = vpop.f32.mrf.mxu1  ;;  %v2075_v40 = vpop.f32.mrf.mxu0 }
 0x822   : > { %v2007_v49 = vpack.c.bf16 %v1997_v36, %v1997_v36  ;;  %v2116_v9 = vsel %vm1191_vm10, %v2075_v40, -inf }
 0x823   : > { %2117 = vmax.xlane.f32.xlu0 %v2116_v9 }
 0x824   : > { %v4967_v63 = vunpack.c.l.b16 %v2007_v49 }
 0x826   : > { %v2375_v38 = vpack.c.b16 %v4967_v63, %v4965_v48 }
 0x829   : > { %v2099_v25 = vpop.f32.mrf.mxu1  ;;  %v2077_v39 = vpop.f32.mrf.mxu0 }
 0x82a   : > { %v2119_v34 = vsel %vm1191_vm10, %v2077_v39, -inf  ;;  %v2122_v51 = vsel %vm1191_vm10, %v2099_v25, -inf }
 0x82b   : > { %2120 = vmax.xlane.f32.xlu2 %v2119_v34  ;;  %2156 = vadd.xlane.f32.xlu0 %v2155_v21 }
 0x831   : > { %v4973_v23 = vpop.f32.mrf.mxu1 }
 0x832   : > { %v2125_v45 = vsel %vm1191_vm10, %v4973_v23, -inf }
 0x833   : > { %2126 = vmax.xlane.f32.xlu1 %v2125_v45  ;;  %2123 = vmax.xlane.f32.xlu2 %v2122_v51 }
 0x83f   : > { %2205 = vrot.lane.b32.xlu0 %v4658_v10, %s4259_s3 }
 0x860   : > { %v2112_v2 = vpop.xlane.xlu1 %2111 }
 0x861   : > { %v2130_v47 = vsub.f32 %v2051_v0, %v2112_v2 }
 0x863   : > { %v2140_v62 = vmul.f32 1.442695, %v2130_v47 }
 0x865   : > { %3904 = vpow2.f32 %v2140_v62 }
 0x868   : > { %v2115_v37 = vpop.xlane.xlu2 %2114 }
 0x869   : > { %v2131_v46 = vsub.f32 %v2053_v4, %v2115_v37 }
 0x86b   : > { %v4980_v53 = vpop.eup %3904  ;;  %v2142_v10 = vmul.f32 1.442695, %v2131_v46 }
 0x86c   : > { %v2158_v33 = vsel %vm1191_vm10, %v4980_v53, 0.0 }
 0x86d   : > { %2159 = vadd.xlane.f32.xlu2 %v2158_v33 }
 0x884   : > { %v2154_v36 = vpop.xlane.xlu1 %2153 }
 0x885   : > { %2230 = vrot.lane.b32.xlu2 %v4670_v29, %s4259_s3 }
 0x896   : > { %v2118_v32 = vpop.xlane.xlu0 %2117 }
 0x897   : > { %v2132_v35 = vsub.f32 %v2075_v40, %v2118_v32 }
 0x899   : > { %v2144_v27 = vmul.f32 1.442695, %v2132_v35 }
 0x89b   : > { %3906 = vpow2.f32 %v2144_v27 }
 0x89e   : > { %v2121_v0 = vpop.xlane.xlu2 %2120  ;;  %v2157_v49 = vpop.xlane.xlu0 %2156 }
 0x89f   : > { %v2133_v9 = vsub.f32 %v2077_v39, %v2121_v0  ;;  %3908 = vrcp.f32 %v2157_v49 }
 0x8a0   : > { %3910 = vrcp.f32 %v2154_v36 }
 0x8a1   : > { %v4986_v34 = vpop.eup %3906  ;;  %3912 = vpow2.f32 %v2142_v10  ;;  %v2146_v21 = vmul.f32 1.442695, %v2133_v9 }
 0x8a2   : > { %v2164_v29 = vsel %vm1191_vm10, %v4986_v34, 0.0 }
 0x8a3   : > { %3914 = vpow2.f32 %v2146_v21  ;;  %2165 = vadd.xlane.f32.xlu1 %v2164_v29 }
 0x8a5   : > { %v3909_v40 = vpop.eup %3908 }
 0x8a6   : > { %v3911_v4 = vpop.eup %3910  ;;  %v2124_v45 = vpop.xlane.xlu2 %2123  ;;  %v2185_v2 = vmul.f32 %v3909_v40, %v3903_v52 }
 0x8a7   : > { %v3913_v51 = vpop.eup %3912  ;;  %v2134_v47 = vsub.f32 %v2099_v25, %v2124_v45  ;;  %v2184_v39 = vmul.f32 %v3911_v4, %v4954_v30 }
 0x8a8   : > { %v2161_v32 = vsel %vm1191_vm10, %v3913_v51, 0.0  ;;  %v2193_v35 = vpack.c.bf16 %v2185_v2, %v2185_v2 }
 0x8a9   : > { %v3915_v62 = vpop.eup %3914  ;;  %v2148_v33 = vmul.f32 1.442695, %v2134_v47  ;;  %v2192_v46 = vpack.c.bf16 %v2184_v39, %v2184_v39 }
 0x8aa   : > { %v2167_v37 = vsel %vm1191_vm10, %v3915_v62, 0.0  ;;  %v2203_v27 = vunpack.c.l.b16 %v2193_v35 }
 0x8ab   : > { %2168 = vadd.xlane.f32.xlu0 %v2167_v37  ;;  %2162 = vadd.xlane.f32.xlu1 %v2161_v32  ;;  %3916 = vpow2.f32 %v2148_v33  ;;  %v2202_v10 = vunpack.c.l.b16 %v2192_v46  ;;  %v3621_v46 = vld [vmem:[#allocation10 + $0x38] sm:$0xff] }
 0x8ad   : > { %v2204_v52 = vpack.c.b16 %v2203_v27, %v2202_v10  ;;  %v3620_v27 = vld [vmem:[#allocation10 + $0x30] sm:$0xff]  ;;  %v3619_v10 = vld [vmem:[#allocation10 + $0x28] sm:$0xff] }
 0x8b1   : > { %v2206_v36 = vpop.permute.xlu0 %2205  ;;  %v4993_v0 = vpop.eup %3916 }
 0x8b2   : > { %2218 = vmatpush.bf16.msra.mxu2 %v2206_v36  ;;  %v2170_v30 = vsel %vm1191_vm10, %v4993_v0, 0.0 }
 0x8b3   : > { %2171 = vadd.xlane.f32.xlu2 %v2170_v30  ;;  %v3617_v30 = vld [vmem:[#allocation10 + $0x18] sm:$0xff] }
 0x8b5   : > { %3418 = vmatmul.msk.bf16.vlgmr.msra.gmra.mxu2 %vm1191_vm10, %v2204_v52  ;;  %v3618_v52 = vld [vmem:[#allocation10 + $0x20] sm:$0xff] }
 0x8b6   : > { %2510 = vmatpush.bf16.msrb.mxu2 %v3621_v46 }
 0x8ba   : > { %2511 = vmatpush.bf16.msrb.mxu2 %v3620_v27 }
 0x8be   : > { %2512 = vmatpush.bf16.msrb.mxu2 %v3619_v10 }
 0x8bf   : > { %2280 = vrot.lane.b32.xlu0 %v4666_v26, %s4259_s3 }
 0x8c2   : > { %2513 = vmatpush.bf16.msrb.mxu2 %v3618_v52 }
 0x8c4   : > { %2255 = vrot.lane.b32.xlu1 %v4647_v17, %s4259_s3  ;;  %v2127_v17 = vpop.xlane.xlu1 %2126 }
 0x8c5   : > { %v2135_v26 = vsub.f32 %v4973_v23, %v2127_v17 }
 0x8c6   : > { %2514 = vmatpush.bf16.msrb.mxu2 %v3617_v30 }
 0x8c7   : > { %2376 = vrot.lane.b32.xlu0 %v2372_v15, %s4258_s21  ;;  %v2150_v19 = vmul.f32 1.442695, %v2135_v26 }
 0x8c9   : > { %3918 = vpow2.f32 %v2150_v19 }
 0x8ca   : > { %2515 = vmatpush.bf16.msrb.mxu2 %v3616_v1 }
 0x8cb   : > { %2348 = vrot.lane.b32.xlu2 %v2344_v20, %s4259_s3 }
 0x8cf   : > { %2350 = vrot.lane.b32.xlu0 %v2345_v18, %s4259_s3  ;;  %v5023_v8 = vpop.eup %3918 }
 0x8d0   : > { %v2173_v16 = vsel %vm1191_vm10, %v5023_v8, 0.0 }
 0x8d7   : > { %2378 = vrot.lane.b32.xlu0 %v2373_v31, %s4258_s21 }
 0x8df   : > { %2352 = vrot.lane.b32.xlu0 %v2346_v56, %s4259_s3 }
 0x8e0   : > { %v2160_v11 = vpop.xlane.xlu2 %2159 }
 0x8e1   : > { %3920 = vrcp.f32 %v2160_v11 }
 0x8e7   : > { %v3921_v59 = vpop.eup %3920 }
 0x8e8   : > { %v2231_v20 = vpop.permute.xlu2 %2230  ;;  %v2186_v54 = vmul.f32 %v3921_v59, %v4980_v53  ;;  %v3615_v59 = vld [vmem:[#allocation10 + $0x8] sm:$0xff] }
 0x8e9   : > { %2243 = vmatpush.bf16.msra.mxu3 %v2231_v20  ;;  %2516 = vmatpush.bf16.msrb.mxu2 %v3615_v59 }
 0x8ea   : > { %v2194_v56 = vpack.c.bf16 %v2186_v54, %v2186_v54  ;;  %v1400_v54 = vpack.c.bf16 %v4740_v42, %v4740_v42 }
 0x8ec   : > { %v2227_v25 = vunpack.c.l.b16 %v2194_v56  ;;  %v2316_v56 = vunpack.c.l.b16 %v1400_v54 }
 0x8ed   : > { %3656 = vmatpush.bf16.msrb.mxu3 %v3621_v46 }
 0x8ee   : > { %2174 = vadd.xlane.f32.xlu1 %v2173_v16 }
 0x8f1   : > { %3657 = vmatpush.bf16.msrb.mxu3 %v3620_v27 }
 0x8f5   : > { %3658 = vmatpush.bf16.msrb.mxu3 %v3619_v10 }
 0x8f9   : > { %3659 = vmatpush.bf16.msrb.mxu3 %v3618_v52 }
 0x8fd   : > { %3660 = vmatpush.bf16.msrb.mxu3 %v3617_v30 }
 0x901   : > { %3661 = vmatpush.bf16.msrb.mxu3 %v3616_v1 }
 0x905   : > { %3662 = vmatpush.bf16.msrb.mxu3 %v3615_v59 }
 0x916   : > { %v2166_v18 = vpop.xlane.xlu1 %2165 }
 0x91e   : > { %v2163_v12 = vpop.xlane.xlu1 %2162  ;;  %v2169_v15 = vpop.xlane.xlu0 %2168 }
 0x91f   : > { %3922 = vrcp.f32 %v2163_v12 }
 0x920   : > { %3924 = vrcp.f32 %v2169_v15  ;;  %v3614_v15 = vld [vmem:[#allocation10] sm:$0xff] }
 0x921   : > { %3926 = vrcp.f32 %v2166_v18  ;;  %2517 = vmatpush.bf16.msrb.mxu2 %v3614_v15  ;;  %3663 = vmatpush.bf16.msrb.mxu3 %v3614_v15 }
 0x925   : > { %v3923_v55 = vpop.eup %3922 }
 0x926   : > { %v2187_v14 = vmul.f32 %v3923_v55, %v3913_v51  ;;  %v3925_v31 = vpop.eup %3924  ;;  %v2172_v36 = vpop.xlane.xlu2 %2171 }
 0x927   : > { %v3927_v49 = vpop.eup %3926  ;;  %v2189_v21 = vmul.f32 %v3925_v31, %v3915_v62  ;;  %3928 = vrcp.f32 %v2172_v36  ;;  %v1403_v36 = vpack.c.bf16 %v4748_v50, %v4748_v50 }
 0x928   : > { %v2195_v28 = vpack.c.bf16 %v2187_v14, %v2187_v14  ;;  %v2188_v29 = vmul.f32 %v3927_v49, %v4986_v34 }
 0x929   : > { %v2197_v40 = vpack.c.bf16 %v2189_v21, %v2189_v21  ;;  %v2319_v57 = vunpack.c.l.b16 %v1403_v36 }
 0x92a   : > { %v2228_v23 = vunpack.c.l.b16 %v2195_v28  ;;  %v2196_v45 = vpack.c.bf16 %v2188_v29, %v2188_v29 }
 0x92b   : > { %v2253_v53 = vunpack.c.l.b16 %v2197_v40 }
 0x92c   : > { %v2229_v9 = vpack.c.b16 %v2228_v23, %v2227_v25  ;;  %v2252_v2 = vunpack.c.l.b16 %v2196_v45 }
 0x92d   : > { %v3929_v26 = vpop.eup %3928 }
 0x92e   : > { %3419 = vmatmul.msk.bf16.vlgmr.msra.gmra.mxu3 %vm1191_vm10, %v2229_v9  ;;  %v2254_v51 = vpack.c.b16 %v2253_v53, %v2252_v2  ;;  %v2190_v43 = vmul.f32 %v3929_v26, %v4993_v0  ;;  %v1401_v0 = vpack.c.bf16 %v4743_v22, %v4743_v22  ;;  %v2349_v14 = vpop.permute.xlu2 %2348 }
 0x930   : > { %v2198_v19 = vpack.c.bf16 %v2190_v43, %v2190_v43 }
 0x931   : > { %v2281_v4 = vpop.permute.xlu0 %2280 }
 0x932   : > { %2293 = vmatpush.bf16.msrb.mxu1 %v2281_v4  ;;  %v2277_v16 = vunpack.c.l.b16 %v2198_v19 }
 0x936   : > { %v2256_v47 = vpop.permute.xlu1 %2255 }
 0x937   : > { %2268 = vmatpush.bf16.msra.mxu0 %v2256_v47 }
 0x938   : > { %v2220_v39 = vpop.f32.mrf.mxu2 }
 0x939   : > { %v2300_v33 = vpack.c.bf16 %v2220_v39, %v2220_v39  ;;  %v2377_v31 = vpop.permute.xlu0 %2376 }
 0x93a   : > { %3420 = vmatmul.msk.bf16.vlgmr.msra.gmra.mxu0 %vm1191_vm10, %v2254_v51 }
 0x93b   : > { %v2392_v62 = vunpack.c.l.b16 %v2300_v33 }
 0x940   : > { %v2222_v37 = vpop.f32.mrf.mxu2 }
 0x941   : > { %v2301_v32 = vpack.c.bf16 %v2222_v37, %v2222_v37  ;;  %v2351_v10 = vpop.permute.xlu0 %2350 }
 0x943   : > { %v2393_v35 = vunpack.c.l.b16 %v2301_v32 }
 0x945   : > { %v2400_v34 = vpack.c.b16 %v2393_v35, %v2392_v62 }
 0x947   : > { %2404 = vrot.lane.b32.xlu1 %v2400_v34, %s4257_s1 }
 0x949   : > { %v2379_v63 = vpop.permute.xlu0 %2378 }
 0x94f   : > { %2354 = vrot.lane.b32.xlu1 %v2347_v3, %s4259_s3  ;;  %s3139_s3 = sshll.u32 %s5226_s4, 4  ;;  %s3140_s3 = int_to_ptr.vmem [resolvable:$true] %s3139_s3 }
 0x951   : > { %v2353_v26 = vpop.permute.xlu0 %2352 }
 0x952   : > { %v2420_v44 = vsel %vm1080_vm9, %v2326_v61, %v2353_v26 }
 0x961   : > { %v2175_v17 = vpop.xlane.xlu1 %2174 }
 0x962   : > { %3930 = vrcp.f32 %v2175_v17 }
 0x968   : > { %v3931_v3 = vpop.eup %3930 }
 0x969   : > { %v2191_v11 = vmul.f32 %v3931_v3, %v5023_v8  ;;  %v2317_v8 = vunpack.c.l.b16 %v1401_v0 }
 0x96b   : > { %v2199_v20 = vpack.c.bf16 %v2191_v11, %v2191_v11  ;;  %v2324_v28 = vpack.c.b16 %v2317_v8, %v2316_v56  ;;  %v3948_v11 = vld [vmem:[%s4487_s14] sm:$0xff] }
 0x96d   : > { %v2278_v18 = vunpack.c.l.b16 %v2199_v20  ;;  %v2414_v23 = vsel %vm1080_vm9, %v2324_v28, %v2349_v14  ;;  %v3951_v14 = vld [vmem:[%s4487_s14 + $0x18] sm:$0xff] }
 0x96e   : > { %v2426_v9 = vsel %vm2424_vm11, %v2414_v23, %v2377_v31 }
 0x96f   : > { %v2279_v12 = vpack.c.b16 %v2278_v18, %v2277_v16  ;;  %v3949_v18 = vld [vmem:[%s4487_s14 + $0x8] sm:$0xff] }
 0x971   : > { %3421 = vmatmul.msk.bf16.vlgmr.msrb.gmra.mxu1 %vm1191_vm10, %v2279_v12 }
 0x9b1   : > { %v2245_v55 = vpop.f32.mrf.mxu3 }
 0x9b2   : > { %v2302_v49 = vpack.c.bf16 %v2245_v55, %v2245_v55  ;;  %v3950_v55 = vld [vmem:[%s4487_s14 + $0x10] sm:$0xff] }
 0x9b4   : > { %v2394_v42 = vunpack.c.l.b16 %v2302_v49 }
 0x9b7   : > { %v2270_v25 = vpop.f32.mrf.mxu0 }
 0x9b8   : > { %v2304_v45 = vpack.c.bf16 %v2270_v25, %v2270_v25 }
 0x9b9   : > { %v2247_v21 = vpop.f32.mrf.mxu3  ;;  %v2405_v29 = vpop.permute.xlu1 %2404 }
 0x9ba   : > { %v2303_v22 = vpack.c.bf16 %v2247_v21, %v2247_v21  ;;  %v2435_v40 = vsel %vm2433_vm12, %v2426_v9, %v2405_v29  ;;  %v2396_v51 = vunpack.c.l.b16 %v2304_v45  ;;  %v3952_v9 = vld [vmem:[%s4487_s14 + $0x20] sm:$0xff] }
 0x9bb   : > { %2518 = vmatmul.bf16.vlgmr.msrb.gmra.mxu2 %v2435_v40  ;;  %v3953_v40 = vld [vmem:[%s4487_s14 + $0x28] sm:$0xff] }
 0x9bc   : > { %v2395_v4 = vunpack.c.l.b16 %v2303_v22 }
 0x9be   : > { %v2401_v53 = vpack.c.b16 %v2395_v4, %v2394_v42 }
 0x9bf   : > { %v2272_v2 = vpop.f32.mrf.mxu0 }
 0x9c0   : > { %v2305_v47 = vpack.c.bf16 %v2272_v2, %v2272_v2  ;;  %2406 = vrot.lane.b32.xlu2 %v2401_v53, %s4257_s1  ;;  %v3954_v53 = vld [vmem:[%s4487_s14 + $0x30] sm:$0xff] }
 0x9c1   : > { %v2355_v58 = vpop.permute.xlu1 %2354 }
 0x9c2   : > { %v2397_v39 = vunpack.c.l.b16 %v2305_v47  ;;  %v2423_v61 = vsel %vm1080_vm9, %v2327_v6, %v2355_v58 }
 0x9c4   : > { %v2402_v33 = vpack.c.b16 %v2397_v39, %v2396_v51  ;;  %v3955_v51 = vld [vmem:[%s4487_s14 + $0x38] sm:$0xff] }
 0x9c6   : > { %2408 = vrot.lane.b32.xlu0 %v2402_v33, %s4257_s1 }
 0x9c8   : > { %2380 = vrot.lane.b32.xlu2 %v2374_v24, %s4258_s21  ;;  %v2318_v24 = vunpack.c.l.b16 %v1402_v7 }
 0x9ca   : > { %v2325_v48 = vpack.c.b16 %v2319_v57, %v2318_v24  ;;  %v3504_v24 = vld [vmem:[#allocation11 + $0x60] sm:$0xf] }
 0x9d0   : > { %2382 = vrot.lane.b32.xlu2 %v2375_v38, %s4258_s21  ;;  %v2417_v38 = vsel %vm1080_vm9, %v2325_v48, %v2351_v10  ;;  %v3514_v10 = vld [vmem:[#allocation11 + $0x78] sm:$0xf0]  ;;  %v3635_v48 = vld [vmem:[#allocation11 + $0x64] sm:$0xf0] }
 0x9d1   : > { %v2428_v52 = vsel %vm2424_vm11, %v2417_v38, %v2379_v63  ;;  %v3634_v63 = vld [vmem:[#allocation11 + $0x64] sm:$0xf]  ;;  %v3505_v38 = vor.u32 %v3635_v48, %v3504_v24 }
 0x9ee   : > { %v2295_v37 = vpop.f32.mrf.mxu1 }
 0x9ef   : > { %v2306_v32 = vpack.c.bf16 %v2295_v37, %v2295_v37 }
 0x9f1   : > { %v2398_v34 = vunpack.c.l.b16 %v2306_v32 }
 0x9f6   : > { %v2297_v62 = vpop.f32.mrf.mxu1 }
 0x9f7   : > { %v2307_v35 = vpack.c.bf16 %v2297_v62, %v2297_v62 }
 0x9f9   : > { %v2399_v46 = vunpack.c.l.b16 %v2307_v35  ;;  %v3512_v35 = vld [vmem:[#allocation11 + $0x70] sm:$0xf] }
 0x9fb   : > { %v2403_v27 = vpack.c.b16 %v2399_v46, %v2398_v34  ;;  %v3637_v34 = vld [vmem:[#allocation11 + $0x74] sm:$0xf0]  ;;  %v3636_v46 = vld [vmem:[#allocation11 + $0x74] sm:$0xf] }
 0x9fc   : > { %v3517_v36 = vor.u32 %v3636_v46, %v3514_v10  ;;  %v3622_v46 = vld [vmem:[#allocation11 + $0x4] sm:$0xf]  ;;  %v3458_v10 = vld [vmem:[#allocation11 + $0x8] sm:$0xf0] }
 0x9fd   : > { %2410 = vrot.lane.b32.xlu0 %v2403_v27, %s4257_s1  ;;  %v3513_v27 = vor.u32 %v3637_v34, %v3512_v35  ;;  %v3456_v35 = vld [vmem:[#allocation11] sm:$0xf]  ;;  %v3623_v34 = vld [vmem:[#allocation11 + $0x4] sm:$0xf0]  ;;  %s5328_s1 = sld [smem:[#allocation27_spill]] }
 0x9fe   : > { %2866 = vmatpush.bf16.msrb.mxu0 %v3517_v36 }
 0x9ff   : > { %2837 = vmatpush.bf16.msra.mxu3 %v3513_v27  ;;  %v3457_v27 = vor.u32 %v3623_v34, %v3456_v35 }
 0xa03   : > { %2838 = vmatpush.bf16.msra.mxu3 %v3505_v38  ;;  %s3138_s21 = scalar_lea.hbm %s5328_s1, %s3655_s11  ;;  %s4186_s19 = scalar_lea.hbm %s5328_s1, 128 }
 0xa04   : > { %s3141_s30 = sshll.u32 %s3138_s21, 4  ;;  %s3142_s30 = int_to_ptr.hbm [resolvable:$true] %s3141_s30 }
 0xa05   : > { %s4180_s18 = sshra.s32 %s3142_s30, 4  ;;  %s4181_s18 = int_to_ptr.hbm [resolvable:$true] %s4180_s18 }
 0xa06   : > { %s4182_s22 = scalar_lea.hbm %s4181_s18, 64  ;;  %p4187_p12 = scmp.lt.s32.totalorder %s4181_s18, %s5328_s1 }
 0xa07   : > { %p4183_p1 = scmp.ne.s32.totalorder %s4181_s18, %s4182_s22  ;;  %p4188_p7 = scmp.lt.s32.totalorder %s4186_s19, %s4182_s22 }
 0xa09   : > { %p4184_p3 = pnand %p4183_p1, %p4447_p4  ;;  %p4189_p8 = por %p4188_p7, %p4187_p12 }
 0xa0b   : > { %p4185_p5 = pneg %p4184_p3 }
 0xa0d   : > { %p4190_p9 = pnand %p4189_p8, %p4185_p5 }
 0xa1a   : > { %v2407_v30 = vpop.permute.xlu2 %2406 }
 0xa1b   : > { %v2438_v17 = vsel %vm2433_vm12, %v2428_v52, %v2407_v30  ;;  %v3506_v52 = vld [vmem:[#allocation11 + $0x68] sm:$0xf0] }
 0xa1c   : > { %2523 = vmatmul.bf16.gmra.mxu2 %v2438_v17  ;;  %v3509_v17 = vor.u32 %v3634_v63, %v3506_v52 }
 0xa1e   : > { %2867 = vmatpush.bf16.msrb.mxu0 %v3509_v17 }
 0xa22   : > { %v2381_v1 = vpop.permute.xlu2 %2380 }
 0xa23   : > { %v2430_v50 = vsel %vm2424_vm11, %v2420_v44, %v2381_v1  ;;  %v3496_v1 = vld [vmem:[#allocation11 + $0x50] sm:$0xf]  ;;  %v3633_v44 = vld [vmem:[#allocation11 + $0x54] sm:$0xf0] }
 0xa2a   : > { %v2383_v60 = vpop.permute.xlu2 %2382 }
 0xa2b   : > { %v2432_v59 = vsel %vm2424_vm11, %v2423_v61, %v2383_v60  ;;  %v3490_v60 = vld [vmem:[#allocation11 + $0x48] sm:$0xf0] }
 0xa38   : > { %v2409_v43 = vpop.permute.xlu0 %2408 }
 0xa39   : > { %v2441_v3 = vsel %vm2433_vm12, %v2430_v50, %v2409_v43  ;;  %v3632_v50 = vld [vmem:[#allocation11 + $0x54] sm:$0xf]  ;;  %v3497_v43 = vor.u32 %v3633_v44, %v3496_v1 }
 0xa3a   : > { %2528 = vmatmul.bf16.vlgmr.msrb.gmra.mxu3 %v2441_v3  ;;  %v3498_v3 = vld [vmem:[#allocation11 + $0x58] sm:$0xf0] }
 0xa3b   : > { %2839 = vmatpush.bf16.msra.mxu3 %v3497_v43 }
 0xa3e   : > { %v2519_v19 = vpop.f32.mrf.mxu2 }
 0xa3f   : > { %v5071_v20 = vadd.f32 %v3948_v11, %v2519_v19  ;;  %v3501_v19 = vor.u32 %v3632_v50, %v3498_v3  ;;  %v3488_v11 = vld [vmem:[#allocation11 + $0x40] sm:$0xf] }
 0xa41   : > { %2547 = vadd.xlane.f32.xlu1 %v5071_v20  ;;  %2868 = vmatpush.bf16.msrb.mxu0 %v3501_v19 }
 0xa46   : > { %v2521_v16 = vpop.f32.mrf.mxu2 }
 0xa47   : > { %v5075_v12 = vadd.f32 %v3949_v18, %v2521_v16  ;;  %v3631_v16 = vld [vmem:[#allocation11 + $0x44] sm:$0xf0]  ;;  %v3630_v18 = vld [vmem:[#allocation11 + $0x44] sm:$0xf] }
 0xa48   : > { %v3489_v58 = vor.u32 %v3631_v16, %v3488_v11  ;;  %v3493_v61 = vor.u32 %v3630_v18, %v3490_v60 }
 0xa49   : > { %2549 = vadd.xlane.f32.xlu2 %v5075_v12 }
 0xa4a   : > { %2840 = vmatpush.bf16.msra.mxu3 %v3489_v58  ;;  %2869 = vmatpush.bf16.msrb.mxu0 %v3493_v61  ;;  %v5149_v61 = vld [vmem:[%s5295_s7] ss:$0 sm:$0xff] }
 0xa6f   : > { %v2411_v15 = vpop.permute.xlu0 %2410 }
 0xa70   : > { %v2444_v0 = vsel %vm2433_vm12, %v2432_v59, %v2411_v15  ;;  %v3480_v59 = vld [vmem:[#allocation11 + $0x30] sm:$0xf]  ;;  %v3629_v15 = vld [vmem:[#allocation11 + $0x34] sm:$0xf0] }
 0xa71   : > { %2533 = vmatmul.bf16.gmra.mxu3 %v2444_v0  ;;  %v3628_v0 = vld [vmem:[#allocation11 + $0x34] sm:$0xf] }
 0xa9f   : > { %v2524_v54 = vpop.f32.mrf.mxu2 }
 0xaa0   : > { %v5085_v8 = vadd.f32 %v3950_v55, %v2524_v54  ;;  %v3481_v54 = vor.u32 %v3629_v15, %v3480_v59  ;;  %v3482_v55 = vld [vmem:[#allocation11 + $0x38] sm:$0xf0] }
 0xaa2   : > { %2551 = vadd.xlane.f32.xlu0 %v5085_v8  ;;  %2841 = vmatpush.bf16.msra.mxu3 %v3481_v54  ;;  %v5155_v54 = vld [vmem:[%s5296_s8] ss:$0 sm:$0xff] }
 0xaa7   : > { %v2526_v56 = vpop.f32.mrf.mxu2 }
 0xaa8   : > { %v5089_v28 = vadd.f32 %v3951_v14, %v2526_v56  ;;  %v3485_v56 = vor.u32 %v3628_v0, %v3482_v55 }
 0xaaa   : > { %2553 = vadd.xlane.f32.xlu1 %v5089_v28  ;;  %2870 = vmatpush.bf16.msrb.mxu0 %v3485_v56 }
 0xab4   : > { %v2548_v5 = vpop.xlane.xlu1 %2547 }
 0xab5   : > { %v2563_v41 = vmul.f32 %v2548_v5, %v4512_v13  ;;  %v3472_v5 = vld [vmem:[#allocation11 + $0x20] sm:$0xf] }
 0xab7   : > { %v5094_v6 = vsub.f32 %v5071_v20, %v2563_v41  ;;  %v3627_v41 = vld [vmem:[#allocation11 + $0x24] sm:$0xf0] }
 0xab9   : > { %v2579_v31 = vmul.f32 %v5094_v6, %v5094_v6 }
 0xabb   : > { %2587 = vadd.xlane.f32.xlu1 %v2579_v31  ;;  %v3626_v31 = vld [vmem:[#allocation11 + $0x24] sm:$0xf] }
 0xabc   : > { %v2550_v25 = vpop.xlane.xlu2 %2549 }
 0xabd   : > { %v2529_v23 = vpop.f32.mrf.mxu3  ;;  %v2564_v49 = vmul.f32 %v2550_v25, %v4512_v13 }
 0xabe   : > { %v5100_v21 = vadd.f32 %v3952_v9, %v2529_v23  ;;  %v3473_v23 = vor.u32 %v3627_v41, %v3472_v5 }
 0xabf   : > { %v5104_v29 = vsub.f32 %v5075_v12, %v2564_v49  ;;  %v3474_v49 = vld [vmem:[#allocation11 + $0x28] sm:$0xf0] }
 0xac0   : > { %2555 = vadd.xlane.f32.xlu2 %v5100_v21  ;;  %v3477_v9 = vor.u32 %v3626_v31, %v3474_v49  ;;  %2842 = vmatpush.bf16.msra.mxu3 %v3473_v23 }
 0xac1   : > { %v2580_v4 = vmul.f32 %v5104_v29, %v5104_v29 }
 0xac2   : > { %2871 = vmatpush.bf16.msrb.mxu0 %v3477_v9 }
 0xac5   : > { %v2531_v22 = vpop.f32.mrf.mxu3 }
 0xac6   : > { %v5107_v42 = vadd.f32 %v3953_v40, %v2531_v22  ;;  %v3464_v40 = vld [vmem:[#allocation11 + $0x10] sm:$0xf] }
 0xac8   : > { %2589 = vadd.xlane.f32.xlu2 %v2580_v4  ;;  %2557 = vadd.xlane.f32.xlu0 %v5107_v42  ;;  %v3625_v4 = vld [vmem:[#allocation11 + $0x14] sm:$0xf0] }
 0xaf4   : > { %v2534_v45 = vpop.f32.mrf.mxu3 }
 0xaf5   : > { %v5113_v2 = vadd.f32 %v3954_v53, %v2534_v45  ;;  %v3624_v45 = vld [vmem:[#allocation11 + $0x14] sm:$0xf] }
 0xaf7   : > { %2559 = vadd.xlane.f32.xlu0 %v5113_v2 }
 0xafc   : > { %v2536_v47 = vpop.f32.mrf.mxu3 }
 0xafd   : > { %v5117_v39 = vadd.f32 %v3955_v51, %v2536_v47  ;;  %v3465_v47 = vor.u32 %v3625_v4, %v3464_v40  ;;  %v3466_v51 = vld [vmem:[#allocation11 + $0x18] sm:$0xf0] }
 0xaff   : > { %2561 = vadd.xlane.f32.xlu1 %v5117_v39  ;;  %2843 = vmatpush.bf16.msra.mxu3 %v3465_v47 }
 0xb03   : > { %2844 = vmatpush.bf16.msra.mxu3 %v3457_v27 }
 0xb15   : > { %v2552_v33 = vpop.xlane.xlu0 %2551 }
 0xb16   : > { %v2565_v37 = vmul.f32 %v2552_v33, %v4512_v13 }
 0xb18   : > { %v5122_v32 = vsub.f32 %v5085_v8, %v2565_v37  ;;  %v3469_v37 = vor.u32 %v3624_v45, %v3466_v51 }
 0xb1a   : > { %v2581_v62 = vmul.f32 %v5122_v32, %v5122_v32  ;;  %2872 = vmatpush.bf16.msrb.mxu0 %v3469_v37 }
 0xb1c   : > { %2591 = vadd.xlane.f32.xlu2 %v2581_v62 }
 0xb1d   : > { %v2554_v7 = vpop.xlane.xlu1 %2553 }
 0xb1e   : > { %v2566_v57 = vmul.f32 %v2554_v7, %v4512_v13  ;;  %v3461_v7 = vor.u32 %v3622_v46, %v3458_v10 }
 0xb20   : > { %v5128_v30 = vsub.f32 %v5089_v28, %v2566_v57  ;;  %2873 = vmatpush.bf16.msrb.mxu0 %v3461_v7 }
 0xb22   : > { %v2582_v26 = vmul.f32 %v5128_v30, %v5128_v30 }
 0xb24   : > { %2593 = vadd.xlane.f32.xlu0 %v2582_v26 }
 0xb2e   : > { %v2588_v14 = vpop.xlane.xlu1 %2587 }
 0xb2f   : > { %v2603_v25 = vmul.f32 %v2588_v14, %v4512_v13 }
 0xb31   : > { %v2611_v22 = vadd.f32 1e-05, %v2603_v25 }
 0xb33   : > { %3932 = vrsqrt.f32 %v2611_v22  ;;  %v2556_v53 = vpop.xlane.xlu2 %2555  ;;  %vm2625_vm14 = vweird.f32 %v2611_v22 }
 0xb34   : > { %v2567_v33 = vmul.f32 %v2556_v53, %v4512_v13 }
 0xb36   : > { %v5135_v62 = vsub.f32 %v5100_v21, %v2567_v33 }
 0xb38   : > { %v2583_v36 = vmul.f32 %v5135_v62, %v5135_v62 }
 0xb39   : > { %v3933_v57 = vpop.eup %3932 }
 0xb3a   : > { %v2620_v24 = vmul.f32 %v3933_v57, %v2611_v22  ;;  %2595 = vadd.xlane.f32.xlu1 %v2583_v36  ;;  %vm2626_vm13 = vweird.f32 %v3933_v57 }
 0xb3b   : > { %v2590_v48 = vpop.xlane.xlu2 %2589  ;;  %v2558_v63 = vpop.xlane.xlu0 %2557  ;;  %vm2627_vm15 = vmor %vm2625_vm14, %vm2626_vm13 }
 0xb3c   : > { %v2621_v38 = vmul.f32 %v3933_v57, %v2620_v24  ;;  %v2604_v52 = vmul.f32 %v2590_v48, %v4512_v13  ;;  %v2568_v17 = vmul.f32 %v2558_v63, %v4512_v13  ;;  %v3653_v63 = vld [vmem:[#allocation13 + $0x78] sm:$0xff] }
 0xb3d   : > { %3080 = vmatpush.bf16.msra.mxu2 %v3653_v63 }
 0xb3e   : > { %v2612_v26 = vadd.f32 1e-05, %v2604_v52  ;;  %v5142_v1 = vsub.f32 %v5107_v42, %v2568_v17  ;;  %v2622_v44 = vmul.f32 0.5, %v2621_v38 }
 0xb40   : > { %3934 = vrsqrt.f32 %v2612_v26  ;;  %v2584_v50 = vmul.f32 %v5142_v1, %v5142_v1  ;;  %v2623_v43 = vsub.f32 1.5, %v2622_v44  ;;  %vm2635_vm1 = vweird.f32 %v2612_v26  ;;  %v3645_v44 = vld [vmem:[#allocation13 + $0x38] sm:$0xff] }
 0xb41   : > { %3051 = vmatpush.bf16.msra.mxu1 %v3645_v44 }
 0xb42   : > { %2597 = vadd.xlane.f32.xlu2 %v2584_v50  ;;  %v2624_v19 = vmul.f32 %v3933_v57, %v2623_v43 }
 0xb44   : > { %v2628_v18 = vsel %vm2627_vm15, %v3933_v57, %v2624_v19 }
 0xb45   : > { %v2699_v59 = vmul.f32 %v2628_v18, %v5094_v6  ;;  %v3644_v18 = vld [vmem:[#allocation13 + $0x30] sm:$0xff] }
 0xb46   : > { %v3935_v3 = vpop.eup %3934  ;;  %3052 = vmatpush.bf16.msra.mxu1 %v3644_v18 }
 0xb47   : > { %v2630_v11 = vmul.f32 %v3935_v3, %v2612_v26  ;;  %vm2636_vm0 = vweird.f32 %v3935_v3  ;;  %v2711_v55 = vmul.f32 %v5149_v61, %v2699_v59  ;;  %v3652_v26 = vld [vmem:[#allocation13 + $0x70] sm:$0xff] }
 0xb48   : > { %vm2637_vm2 = vmor %vm2635_vm1, %vm2636_vm0  ;;  %3081 = vmatpush.bf16.msra.mxu2 %v3652_v26 }
 0xb49   : > { %v2631_v16 = vmul.f32 %v3935_v3, %v2630_v11  ;;  %v2723_v5 = vadd.f32 %v5155_v54, %v2711_v55  ;;  %v3643_v55 = vld [vmem:[#allocation13 + $0x28] sm:$0xff] }
 0xb4a   : > { %3053 = vmatpush.bf16.msra.mxu1 %v3643_v55 }
 0xb4b   : > { %v2632_v58 = vmul.f32 0.5, %v2631_v16 }
 0xb4d   : > { %v2633_v60 = vsub.f32 1.5, %v2632_v58 }
 0xb4f   : > { %v2634_v15 = vmul.f32 %v3935_v3, %v2633_v60  ;;  %v3650_v60 = vld [vmem:[#allocation13 + $0x60] sm:$0xff] }
 0xb51   : > { %v2638_v0 = vsel %vm2637_vm2, %v3935_v3, %v2634_v15  ;;  %v3651_v3 = vld [vmem:[#allocation13 + $0x68] sm:$0xff] }
 0xb52   : > { %v2700_v56 = vmul.f32 %v2638_v0, %v5104_v29  ;;  %3082 = vmatpush.bf16.msra.mxu2 %v3651_v3 }
 0xb54   : > { %v2712_v14 = vmul.f32 %v5149_v61, %v2700_v56 }
 0xb56   : > { %v2724_v41 = vadd.f32 %v5155_v54, %v2712_v14  ;;  %3083 = vmatpush.bf16.msra.mxu2 %v3650_v60  ;;  %v3649_v14 = vld [vmem:[#allocation13 + $0x58] sm:$0xff] }
 0xb58   : > { %v2731_v6 = vpack.c.bf16 %v2724_v41, %v2723_v5 }
 0xb5a   : > { %2845 = vmatmul.bf16.vlgmr.msra.gmra.mxu3 %v2731_v6  ;;  %2874 = vmatmul.bf16.vlgmr.msrb.gmra.mxu0 %v2731_v6 }
 0xb5b   : > { %3084 = vmatpush.bf16.msra.mxu2 %v3649_v14 }
 0xb6a   : > { %v2560_v31 = vpop.xlane.xlu0 %2559 }
 0xb6b   : > { %v2569_v25 = vmul.f32 %v2560_v31, %v4512_v13  ;;  %v3642_v31 = vld [vmem:[#allocation13 + $0x20] sm:$0xff] }
 0xb6c   : > { %3054 = vmatpush.bf16.msra.mxu1 %v3642_v31 }
 0xb6d   : > { %v5164_v23 = vsub.f32 %v5113_v2, %v2569_v25  ;;  %v3648_v25 = vld [vmem:[#allocation13 + $0x50] sm:$0xff] }
 0xb6e   : > { %3085 = vmatpush.bf16.msra.mxu2 %v3648_v25 }
 0xb6f   : > { %v2585_v49 = vmul.f32 %v5164_v23, %v5164_v23 }
 0xb71   : > { %2599 = vadd.xlane.f32.xlu0 %v2585_v49 }
 0xb72   : > { %v2562_v29 = vpop.xlane.xlu1 %2561 }
 0xb73   : > { %v2570_v9 = vmul.f32 %v2562_v29, %v4512_v13 }
 0xb75   : > { %v5170_v22 = vsub.f32 %v5117_v39, %v2570_v9  ;;  %v3641_v9 = vld [vmem:[#allocation13 + $0x18] sm:$0xff] }
 0xb76   : > { %3055 = vmatpush.bf16.msra.mxu1 %v3641_v9 }
 0xb77   : > { %v2586_v40 = vmul.f32 %v5170_v22, %v5170_v22 }
 0xb79   : > { %2601 = vadd.xlane.f32.xlu1 %v2586_v40 }
 0xb8f   : > { %v2592_v4 = vpop.xlane.xlu2 %2591 }
 0xb90   : > { %v2605_v45 = vmul.f32 %v2592_v4, %v4512_v13  ;;  %v3647_v4 = vld [vmem:[#allocation13 + $0x48] sm:$0xff] }
 0xb91   : > { %3086 = vmatpush.bf16.msra.mxu2 %v3647_v4 }
 0xb92   : > { %v2613_v53 = vadd.f32 1e-05, %v2605_v45 }
 0xb94   : > { %3936 = vrsqrt.f32 %v2613_v53  ;;  %vm2645_vm4 = vweird.f32 %v2613_v53 }
 0xb97   : > { %v2594_v47 = vpop.xlane.xlu0 %2593 }
 0xb98   : > { %v2606_v51 = vmul.f32 %v2594_v47, %v4512_v13 }
 0xb9a   : > { %v3937_v33 = vpop.eup %3936  ;;  %v2614_v37 = vadd.f32 1e-05, %v2606_v51  ;;  %v3640_v51 = vld [vmem:[#allocation13 + $0x10] sm:$0xff] }
 0xb9b   : > { %v2640_v35 = vmul.f32 %v3937_v33, %v2613_v53  ;;  %vm2646_vm3 = vweird.f32 %v3937_v33  ;;  %3056 = vmatpush.bf16.msra.mxu1 %v3640_v51 }
 0xb9c   : > { %3938 = vrsqrt.f32 %v2614_v37  ;;  %vm2647_vm5 = vmor %vm2645_vm4, %vm2646_vm3  ;;  %vm2655_vm7 = vweird.f32 %v2614_v37 }
 0xb9d   : > { %v2641_v34 = vmul.f32 %v3937_v33, %v2640_v35 }
 0xb9f   : > { %v2642_v46 = vmul.f32 0.5, %v2641_v34 }
 0xba1   : > { %v2643_v27 = vsub.f32 1.5, %v2642_v46  ;;  %v3639_v46 = vld [vmem:[#allocation13 + $0x8] sm:$0xff] }
 0xba2   : > { %v3939_v10 = vpop.eup %3938  ;;  %3057 = vmatpush.bf16.msra.mxu1 %v3639_v46 }
 0xba3   : > { %v2644_v36 = vmul.f32 %v3937_v33, %v2643_v27  ;;  %v2650_v7 = vmul.f32 %v3939_v10, %v2614_v37  ;;  %vm2656_vm6 = vweird.f32 %v3939_v10  ;;  %v3646_v37 = vld [vmem:[#allocation13 + $0x40] sm:$0xff] }
 0xba4   : > { %vm2657_vm8 = vmor %vm2655_vm7, %vm2656_vm6  ;;  %3087 = vmatpush.bf16.msra.mxu2 %v3646_v37 }
 0xba5   : > { %v2651_v57 = vmul.f32 %v3939_v10, %v2650_v7  ;;  %v2648_v24 = vsel %vm2647_vm5, %v3937_v33, %v2644_v36  ;;  %v3638_v7 = vld [vmem:[#allocation13] sm:$0xff] }
 0xba6   : > { %v2701_v52 = vmul.f32 %v2648_v24, %v5122_v32  ;;  %3058 = vmatpush.bf16.msra.mxu1 %v3638_v7 }
 0xba7   : > { %v2652_v48 = vmul.f32 0.5, %v2651_v57 }
 0xba8   : > { %v2713_v16 = vmul.f32 %v5149_v61, %v2701_v52 }
 0xba9   : > { %v2653_v38 = vsub.f32 1.5, %v2652_v48 }
 0xbaa   : > { %v2725_v59 = vadd.f32 %v5155_v54, %v2713_v16 }
 0xbab   : > { %v2654_v17 = vmul.f32 %v3939_v10, %v2653_v38 }
 0xbad   : > { %v2658_v50 = vsel %vm2657_vm8, %v3939_v10, %v2654_v17  ;;  %v2596_v43 = vpop.xlane.xlu1 %2595 }
 0xbae   : > { %v2702_v19 = vmul.f32 %v2658_v50, %v5128_v30  ;;  %v2607_v11 = vmul.f32 %v2596_v43, %v4512_v13 }
 0xbb0   : > { %v2615_v58 = vadd.f32 1e-05, %v2607_v11  ;;  %v2714_v32 = vmul.f32 %v5149_v61, %v2702_v19 }
 0xbb2   : > { %3940 = vrsqrt.f32 %v2615_v58  ;;  %v2726_v15 = vadd.f32 %v5155_v54, %v2714_v32  ;;  %vm2665_vm10 = vweird.f32 %v2615_v58 }
 0xbb4   : > { %v2732_v0 = vpack.c.bf16 %v2726_v15, %v2725_v59 }
 0xbb5   : > { %v2598_v30 = vpop.xlane.xlu2 %2597 }
 0xbb6   : > { %v2608_v56 = vmul.f32 %v2598_v30, %v4512_v13  ;;  %2850 = vmatmul.bf16.gmra.mxu3 %v2732_v0  ;;  %2879 = vmatmul.bf16.gmra.mxu0 %v2732_v0 }
 0xbb8   : > { %v3941_v5 = vpop.eup %3940  ;;  %v2616_v41 = vadd.f32 1e-05, %v2608_v56 }
 0xbb9   : > { %v2660_v6 = vmul.f32 %v3941_v5, %v2615_v58  ;;  %vm2666_vm9 = vweird.f32 %v3941_v5 }
 0xbba   : > { %3942 = vrsqrt.f32 %v2616_v41  ;;  %vm2667_vm11 = vmor %vm2665_vm10, %vm2666_vm9  ;;  %vm2675_vm13 = vweird.f32 %v2616_v41 }
 0xbbb   : > { %v2661_v49 = vmul.f32 %v3941_v5, %v2660_v6 }
 0xbbd   : > { %v2662_v29 = vmul.f32 0.5, %v2661_v49 }
 0xbbf   : > { %v2663_v40 = vsub.f32 1.5, %v2662_v29 }
 0xbc0   : > { %v3943_v45 = vpop.eup %3942 }
 0xbc1   : > { %v2664_v53 = vmul.f32 %v3941_v5, %v2663_v40  ;;  %v2670_v47 = vmul.f32 %v3943_v45, %v2616_v41  ;;  %vm2676_vm12 = vweird.f32 %v3943_v45 }
 0xbc2   : > { %vm2677_vm14 = vmor %vm2675_vm13, %vm2676_vm12 }
 0xbc3   : > { %v2671_v33 = vmul.f32 %v3943_v45, %v2670_v47  ;;  %v2668_v35 = vsel %vm2667_vm11, %v3941_v5, %v2664_v53 }
 0xbc4   : > { %v2703_v10 = vmul.f32 %v2668_v35, %v5135_v62  ;;  %v2751_v62 = vld [vmem:[%s5298_s10] sm:$0x3] }
 0xbc5   : > { %v2672_v34 = vmul.f32 0.5, %v2671_v33  ;;  %v5193_v44 = vperm.slane %v2751_v62, 1  ;;  %v5196_v3 = vperm.slane %v2751_v62, 0 }
 0xbc6   : > { %v2715_v48 = vmul.f32 %v5149_v61, %v2703_v10 }
 0xbc7   : > { %v2673_v27 = vsub.f32 1.5, %v2672_v34 }
 0xbc8   : > { %v2727_v38 = vadd.f32 %v5155_v54, %v2715_v48 }
 0xbc9   : > { %v2674_v36 = vmul.f32 %v3943_v45, %v2673_v27 }
 0xbcb   : > { %v2678_v57 = vsel %vm2677_vm14, %v3943_v45, %v2674_v36 }
 0xbcc   : > { %v2704_v24 = vmul.f32 %v2678_v57, %v5142_v1 }
 0xbce   : > { %v2716_v63 = vmul.f32 %v5149_v61, %v2704_v24 }
 0xbd0   : > { %v2728_v52 = vadd.f32 %v5155_v54, %v2716_v63 }
 0xbd2   : > { %v2733_v17 = vpack.c.bf16 %v2728_v52, %v2727_v38 }
 0xbd4   : > { %2855 = vmatmul.bf16.gmra.mxu3 %v2733_v17  ;;  %2884 = vmatmul.bf16.gmra.mxu0 %v2733_v17 }
 0xbd7   : > { %v2875_v26 = vpop.f32.mrf.mxu0 }
 0xbd8   : > { %v2876_v1 = vadd.f32 %v2875_v26, %v5193_v44 }
 0xbda   : > { %v2896_v11 = vmax.f32 %v2876_v1, 0.0 }
 0xbdd   : > { %v2846_v50 = vpop.f32.mrf.mxu3 }
 0xbde   : > { %v2847_v18 = vadd.f32 %v2846_v50, %v5196_v3 }
 0xbdf   : > { %v2877_v43 = vpop.f32.mrf.mxu0 }
 0xbe0   : > { %v2878_v19 = vadd.f32 %v2877_v43, %v5193_v44  ;;  %v2895_v55 = vmax.f32 %v2847_v18, 0.0 }
 0xbe2   : > { %v2898_v16 = vmax.f32 %v2878_v19, 0.0 }
 0xbe4   : > { %v2912_v58 = vpack.c.bf16 %v2898_v16, %v2896_v11  ;;  %v2600_v32 = vpop.xlane.xlu0 %2599 }
 0xbe5   : > { %v2609_v60 = vmul.f32 %v2600_v32, %v4512_v13  ;;  %v2848_v59 = vpop.f32.mrf.mxu3 }
 0xbe6   : > { %v2849_v15 = vadd.f32 %v2848_v59, %v5196_v3  ;;  %3088 = vmatmul.bf16.vlgmr.msra.gmra.mxu2 %v2912_v58 }
 0xbe7   : > { %v2617_v0 = vadd.f32 1e-05, %v2609_v60 }
 0xbe8   : > { %v2897_v30 = vmax.f32 %v2849_v15, 0.0 }
 0xbe9   : > { %3944 = vrsqrt.f32 %v2617_v0  ;;  %vm2685_vm0 = vweird.f32 %v2617_v0 }
 0xbea   : > { %v2911_v56 = vpack.c.bf16 %v2897_v30, %v2895_v55  ;;  %v5220_v30 = vld [vmem:[%s5300_s12] ss:$0 sm:$0xff] }
 0xbec   : > { %3059 = vmatmul.bf16.vlgmr.msra.gmra.mxu1 %v2911_v56  ;;  %v2602_v14 = vpop.xlane.xlu1 %2601 }
 0xbed   : > { %v2610_v5 = vmul.f32 %v2602_v14, %v4512_v13 }
 0xbef   : > { %v3945_v41 = vpop.eup %3944  ;;  %v2618_v6 = vadd.f32 1e-05, %v2610_v5 }
 0xbf0   : > { %v2680_v31 = vmul.f32 %v3945_v41, %v2617_v0  ;;  %vm2686_vm15 = vweird.f32 %v3945_v41 }
 0xbf1   : > { %3946 = vrsqrt.f32 %v2618_v6  ;;  %vm2687_vm1 = vmor %vm2685_vm0, %vm2686_vm15  ;;  %vm2695_vm3 = vweird.f32 %v2618_v6 }
 0xbf2   : > { %v2681_v25 = vmul.f32 %v3945_v41, %v2680_v31 }
 0xbf4   : > { %v2682_v49 = vmul.f32 0.5, %v2681_v25 }
 0xbf6   : > { %v2683_v29 = vsub.f32 1.5, %v2682_v49 }
 0xbf7   : > { %v3947_v9 = vpop.eup %3946 }
 0xbf8   : > { %v2684_v40 = vmul.f32 %v3945_v41, %v2683_v29  ;;  %v2690_v4 = vmul.f32 %v3947_v9, %v2618_v6  ;;  %vm2696_vm2 = vweird.f32 %v3947_v9 }
 0xbf9   : > { %vm2697_vm4 = vmor %vm2695_vm3, %vm2696_vm2 }
 0xbfa   : > { %v2691_v45 = vmul.f32 %v3947_v9, %v2690_v4  ;;  %v2688_v53 = vsel %vm2687_vm1, %v3945_v41, %v2684_v40 }
 0xbfb   : > { %v2705_v13 = vmul.f32 %v2688_v53, %v5164_v23 }
 0xbfc   : > { %v2692_v47 = vmul.f32 0.5, %v2691_v45 }
 0xbfd   : > { %v2717_v34 = vmul.f32 %v5149_v61, %v2705_v13 }
 0xbfe   : > { %v2693_v51 = vsub.f32 1.5, %v2692_v47 }
 0xbff   : > { %v2729_v27 = vadd.f32 %v5155_v54, %v2717_v34 }
 0xc00   : > { %v2694_v33 = vmul.f32 %v3947_v9, %v2693_v51 }
 0xc02   : > { %v2698_v37 = vsel %vm2697_vm4, %v3947_v9, %v2694_v33 }
 0xc03   : > { %v2706_v35 = vmul.f32 %v2698_v37, %v5170_v22 }
 0xc05   : > { %v2718_v46 = vmul.f32 %v5149_v61, %v2706_v35 }
 0xc07   : > { %v2730_v10 = vadd.f32 %v5155_v54, %v2718_v46 }
 0xc09   : > { %v2734_v36 = vpack.c.bf16 %v2730_v10, %v2729_v27 }
 0xc0b   : > { %2860 = vmatmul.bf16.gmra.mxu3 %v2734_v36  ;;  %2889 = vmatmul.bf16.gmra.mxu0 %v2734_v36 }
 0xc33   : > { %v2880_v7 = vpop.f32.mrf.mxu0 }
 0xc34   : > { %v2881_v23 = vadd.f32 %v2880_v7, %v5193_v44 }
 0xc36   : > { %v2900_v63 = vmax.f32 %v2881_v23, 0.0 }
 0xc39   : > { %v2851_v57 = vpop.f32.mrf.mxu3 }
 0xc3a   : > { %v2852_v38 = vadd.f32 %v2851_v57, %v5196_v3 }
 0xc3b   : > { %v2882_v24 = vpop.f32.mrf.mxu0 }
 0xc3c   : > { %v2883_v48 = vadd.f32 %v2882_v24, %v5193_v44  ;;  %v2899_v54 = vmax.f32 %v2852_v38, 0.0 }
 0xc3e   : > { %v2902_v22 = vmax.f32 %v2883_v48, 0.0 }
 0xc40   : > { %v2914_v52 = vpack.c.bf16 %v2902_v22, %v2900_v63 }
 0xc41   : > { %v2853_v61 = vpop.f32.mrf.mxu3 }
 0xc42   : > { %v2854_v17 = vadd.f32 %v2853_v61, %v5196_v3  ;;  %3093 = vmatmul.bf16.gmra.mxu2 %v2914_v52 }
 0xc44   : > { %v2901_v62 = vmax.f32 %v2854_v17, 0.0 }
 0xc46   : > { %v2913_v26 = vpack.c.bf16 %v2901_v62, %v2899_v54 }
 0xc48   : > { %3064 = vmatmul.bf16.gmra.mxu1 %v2913_v26 }
 0xc51   : > { %v2885_v50 = vpop.f32.mrf.mxu0 }
 0xc52   : > { %v2886_v43 = vadd.f32 %v2885_v50, %v5193_v44 }
 0xc54   : > { %v2904_v16 = vmax.f32 %v2886_v43, 0.0 }
 0xc57   : > { %v2856_v1 = vpop.f32.mrf.mxu3 }
 0xc58   : > { %v2857_v58 = vadd.f32 %v2856_v1, %v5196_v3 }
 0xc59   : > { %v2887_v19 = vpop.f32.mrf.mxu0 }
 0xc5a   : > { %v2888_v11 = vadd.f32 %v2887_v19, %v5193_v44  ;;  %v2903_v15 = vmax.f32 %v2857_v58, 0.0 }
 0xc5c   : > { %v2906_v18 = vmax.f32 %v2888_v11, 0.0 }
 0xc5e   : > { %v2916_v32 = vpack.c.bf16 %v2906_v18, %v2904_v16 }
 0xc5f   : > { %v2858_v60 = vpop.f32.mrf.mxu3 }
 0xc60   : > { %v2859_v59 = vadd.f32 %v2858_v60, %v5196_v3  ;;  %3098 = vmatmul.bf16.gmra.mxu2 %v2916_v32 }
 0xc62   : > { %v2905_v0 = vmax.f32 %v2859_v59, 0.0 }
 0xc64   : > { %v2915_v55 = vpack.c.bf16 %v2905_v0, %v2903_v15 }
 0xc66   : > { %3069 = vmatmul.bf16.gmra.mxu1 %v2915_v55 }
 0xc69   : > { %v3060_v56 = vpop.f32.mrf.mxu1  ;;  %v3089_v14 = vpop.f32.mrf.mxu2 }
 0xc6a   : > { %v3061_v5 = vadd.f32 %v5220_v30, %v3060_v56 }
 0xc6c   : > { %v3090_v41 = vadd.f32 %v3089_v14, %v3061_v5 }
 0xc6e   : > { %v3109_v6 = vadd.f32 %v3090_v41, %v5071_v20 }
 0xc70   : > { %3117 = vst [vmem:[%s5226_s4] sm:$0xff] %v3109_v6 }
 0xc71   : > { %v3062_v31 = vpop.f32.mrf.mxu1  ;;  %v3091_v49 = vpop.f32.mrf.mxu2 }
 0xc72   : > { %v3063_v25 = vadd.f32 %v5220_v30, %v3062_v31 }
 0xc74   : > { %v3092_v29 = vadd.f32 %v3091_v49, %v3063_v25 }
 0xc76   : > { %v3110_v9 = vadd.f32 %v3092_v29, %v5075_v12 }
 0xc78   : > { %3118 = vst [vmem:[%s5226_s4 + $0x8] sm:$0xff] %v3110_v9 }
 0xc88   : > { %v2890_v40 = vpop.f32.mrf.mxu0 }
 0xc89   : > { %v2891_v45 = vadd.f32 %v2890_v40, %v5193_v44 }
 0xc8b   : > { %v2908_v47 = vmax.f32 %v2891_v45, 0.0 }
 0xc8e   : > { %v2861_v4 = vpop.f32.mrf.mxu3 }
 0xc8f   : > { %v2862_v13 = vadd.f32 %v2861_v4, %v5196_v3 }
 0xc90   : > { %v2892_v53 = vpop.f32.mrf.mxu0 }
 0xc91   : > { %v2893_v20 = vadd.f32 %v2892_v53, %v5193_v44  ;;  %v2907_v12 = vmax.f32 %v2862_v13, 0.0 }
 0xc93   : > { %v2910_v51 = vmax.f32 %v2893_v20, 0.0 }
 0xc95   : > { %v2918_v33 = vpack.c.bf16 %v2910_v51, %v2908_v47 }
 0xc96   : > { %v2863_v37 = vpop.f32.mrf.mxu3 }
 0xc97   : > { %v2864_v35 = vadd.f32 %v2863_v37, %v5196_v3  ;;  %3103 = vmatmul.bf16.gmra.mxu2 %v2918_v33 }
 0xc99   : > { %v2909_v34 = vmax.f32 %v2864_v35, 0.0 }
 0xc9b   : > { %v2917_v46 = vpack.c.bf16 %v2909_v34, %v2907_v12 }
 0xc9d   : > { %3074 = vmatmul.bf16.gmra.mxu1 %v2917_v46 }
 0xcc5   : > { %v3065_v27 = vpop.f32.mrf.mxu1  ;;  %v3094_v10 = vpop.f32.mrf.mxu2 }
 0xcc6   : > { %v3066_v44 = vadd.f32 %v5220_v30, %v3065_v27 }
 0xcc8   : > { %v3095_v36 = vadd.f32 %v3094_v10, %v3066_v44 }
 0xcca   : > { %v3111_v7 = vadd.f32 %v3095_v36, %v5085_v8 }
 0xccc   : > { %3119 = vst [vmem:[%s5226_s4 + $0x10] sm:$0xff] %v3111_v7 }
 0xccd   : > { %v3067_v57 = vpop.f32.mrf.mxu1  ;;  %v3096_v3 = vpop.f32.mrf.mxu2 }
 0xcce   : > { %v3068_v23 = vadd.f32 %v5220_v30, %v3067_v57 }
 0xcd0   : > { %v3097_v24 = vadd.f32 %v3096_v3, %v3068_v23 }
 0xcd2   : > { %v3112_v48 = vadd.f32 %v3097_v24, %v5089_v28 }
 0xcd4   : > { %3120 = vst [vmem:[%s5226_s4 + $0x18] sm:$0xff] %v3112_v48 }
 0xce3   : > { %v3070_v63 = vpop.f32.mrf.mxu1  ;;  %v3099_v22 = vpop.f32.mrf.mxu2 }
 0xce4   : > { %v3071_v38 = vadd.f32 %v5220_v30, %v3070_v63 }
 0xce6   : > { %v3100_v52 = vadd.f32 %v3099_v22, %v3071_v38 }
 0xce8   : > { %v3113_v61 = vadd.f32 %v3100_v52, %v5100_v21 }
 0xcea   : > { %3121 = vst [vmem:[%s5226_s4 + $0x20] sm:$0xff] %v3113_v61 }
 0xceb   : > { %v3072_v8 = vpop.f32.mrf.mxu1  ;;  %v3101_v54 = vpop.f32.mrf.mxu2 }
 0xcec   : > { %v3073_v17 = vadd.f32 %v5220_v30, %v3072_v8 }
 0xcee   : > { %v3102_v62 = vadd.f32 %v3101_v54, %v3073_v17 }
 0xcf0   : > { %v3114_v26 = vadd.f32 %v3102_v62, %v5107_v42 }
 0xcf2   : > { %3122 = vst [vmem:[%s5226_s4 + $0x28] sm:$0xff] %v3114_v26 }
 0xd1a   : > { %v3075_v28 = vpop.f32.mrf.mxu1  ;;  %v3104_v50 = vpop.f32.mrf.mxu2 }
 0xd1b   : > { %v3076_v1 = vadd.f32 %v5220_v30, %v3075_v28 }
 0xd1d   : > { %v3105_v43 = vadd.f32 %v3104_v50, %v3076_v1 }
 0xd1f   : > { %v3115_v21 = vadd.f32 %v3105_v43, %v5113_v2 }
 0xd21   : > { %3123 = vst [vmem:[%s5226_s4 + $0x30] sm:$0xff] %v3115_v21 }
 0xd22   : > { %v3077_v19 = vpop.f32.mrf.mxu1  ;;  %v3106_v11 = vpop.f32.mrf.mxu2 }
 0xd23   : > { %v3078_v42 = vadd.f32 %v5220_v30, %v3077_v19 }
 0xd25   : > { %v3107_v16 = vadd.f32 %v3106_v11, %v3078_v42 }
 0xd27   : > { %v3116_v18 = vadd.f32 %v3107_v16, %v5117_v39 }
 0xd29   : > { %3124 = vst [vmem:[%s5226_s4 + $0x38] sm:$0xff] %v3116_v18 }
 0xd2a   : > { %4193 = shalt.err (!%p4190_p9)
}
 0xd2b   : > { %s4260_s20 = smov 128   ;;  %s4261_s4 = smov 8  }
 0xd2c   : > { %3690 = dma.vmem_to_hbm [thread:$0]  (%p4447_p4), %s3140_s3, 1024, %s3142_s30, %s3126_s15, %s4260_s20, %s4260_s20, %s4261_s4  }
 0xd2d PF: > { %s3156_s11 = sand.u32 1, %s4232_s25   ;;  %p5329_p10 = scmp.ge.s32.totalorder %s4244_s28, 2 }
 0xd2e   : > { %s3157_s9 = scalar_lea.sflag [#allocation4], %s3156_s11 }
 0xd2f   : > { %p3716_p13 = pnand %p5329_p10, %p4451_p6 }
 0xd31   : > { %p3717_p11 = pneg %p3716_p13 }
 0xd33   : > { %4227 = dma.done.wait (%p3717_p11), %s3157_s9, 1024  }
 0xd34   : > { %4229 = vsyncadd (%p3717_p11), %s3157_s9, 4294966272  ;;  %s5330_s16 = sld [smem:[#allocation20_spill]]  ;;  %p29_p0 = scmp.ge.s32.totalorder %s4421_s17, 4  }
 0xd35   : > { %s5331_s25 = smov %s4236_s26  ;;  %s5332_s26 = smov %s4240_s27 }
 0xd36   : > { %s5334_s28 = smov %s4421_s17  ;;  %31 = sbr.rel (!%p29_p0) target bundleno = 16 (0x10), region = 141 }
 0xd3a   : > { %s5333_s27 = smov %s5330_s16 }
 0xd3b   :  { %3163 = vsyncpa [#allocation3], 1 }
 0xd3c   :  { %3165 = vsyncpa [#allocation3 + $0x1], 1 }
 0xd3d   :  { %3166 = vsyncpa [#allocation6], 1 }
 0xd3e   :  { %3167 = vsyncpa [#allocation9], 1 }
 0xd3f   :  { %3168 = vsyncpa [#allocation12], 1 }
 0xd40   :  { %3169 = vsyncpa [#allocation4], 1 }
 0xd41   :  { %3171 = vsyncpa [#allocation4 + $0x1], 1 }

</bundles_post_ra>
